<compile_context>
chip_gen: v5e
topology: v5e:2x2
jax: 0.10.0
libtpu: 0.0.40
codegen_flags: <defaults>
</compile_context>

<pallas_src>
import functools
import math

import numpy as np
import jax
import jax.numpy as jnp
from jax.experimental import pallas as pl
from jax.experimental.pallas import tpu as pltpu

INIT_DIM = 9       # init_dim
HIDDEN_DIM = 32    # hidden_dim (small for the demo)
EDGE_DIM = 3       # edge_dim
N_LAYERS = 4       # n_layers
N_HEADS = 4        # n_heads


# ----------------------------------------------------------------------------
# In-kernel building blocks (traced inside the single fused pallas_call)
# ----------------------------------------------------------------------------
def _gatv2_layer(x_raw, mask_add, eattr, wlr_t, blr, we_t, att_bd, bias,
                 *, heads, out_ch, apply_relu, residual, negative_slope=0.2):
    """Dense-adjacency GATv2Conv, all heads processed jointly, MXU-heavy."""
    n = x_raw.shape[0]
    hc = heads * out_ch

    x_in = jnp.maximum(x_raw, 0.0) if apply_relu else x_raw

    # fused lin_l / lin_r: one matmul -> [N, 2*H*C] (pre-concat + transposed host-side)
    xlr = jnp.dot(x_in, wlr_t, preferred_element_type=jnp.float32) + blr
    xl = xlr[:, :hc]                                   # source features  [N, H*C]
    xr = xlr[:, hc:]                                   # target features  [N, H*C]

    # lin_edge (no bias) on the dense NxN edge-attribute table -> [N*N, H*C]
    ea = jnp.dot(eattr, we_t, preferred_element_type=jnp.float32)

    # GATv2 message m[i,j] = x_r[i] + x_l[j] + lin_edge(e_ij), leaky_relu(0.2)
    msg = xr[:, None, :] + xl[None, :, :] + ea.reshape(n, n, hc)   # [i, j, H*C]
    g = jnp.where(msg > 0, msg, negative_slope * msg)

    # all-head logits with ONE MXU matmul against block-diagonal att -> [N*N, H],
    # then relayout to [H, N, N] so softmax reduces over the lane axis (j).
    logit2d = jnp.dot(g.reshape(n * n, hc), att_bd,
                      preferred_element_type=jnp.float32)          # [N*N, H]
    if heads == 1:
        logit = logit2d.reshape(1, n, n)
    else:
        logit = logit2d.T.reshape(heads, n, n)                     # [H, i, j]
    logit = logit + mask_add                                       # additive mask (hoisted)

    # masked softmax over source nodes j (lane-dense reduce); no `* adj` needed:
    # self-loops guarantee a finite row max, masked entries underflow to 0.
    m = jnp.max(logit, axis=-1, keepdims=True)
    p = jnp.exp(logit - m)
    alpha = p * pl.reciprocal(jnp.sum(p, axis=-1, keepdims=True), approx=True)

    # aggregation on the MXU: out[h,i,c] = sum_j alpha[h,i,j] * x_l[j,h,c]
    xl_h = jnp.transpose(xl.reshape(n, heads, out_ch), (1, 0, 2))  # [H, N, C]
    out_h = jnp.einsum("hij,hjc->hic", alpha, xl_h,
                       preferred_element_type=jnp.float32)         # [H, N, C]
    # concat=False -> mean over heads; heads==1 (concat=True) -> plain sum.
    out = jnp.sum(out_h, axis=0) * (1.0 / heads) + bias            # [N, C]

    if residual:
        out = (out + x_raw) * 0.5                  # (gat(relu(x)) + x) / 2
    return out


def _mha_layer(x, wqkv_t, bqkv, wo_t, bo, *, num_heads):
    """Multi-head self-attention + residual average (no padding mask needed)."""
    n, d = x.shape
    dh = d // num_heads

    # 1/sqrt(dh) query scale is folded into wqkv_t / bqkv host-side.
    qkv = jnp.dot(x, wqkv_t, preferred_element_type=jnp.float32) + bqkv   # [N, 3D]
    q = qkv[:, :d].reshape(n, num_heads, dh)
    k = qkv[:, d:2 * d].reshape(n, num_heads, dh)
    v = qkv[:, 2 * d:].reshape(n, num_heads, dh)

    logits = jnp.einsum("nhd,mhd->hnm", q, k, preferred_element_type=jnp.float32)
    m = jnp.max(logits, axis=-1, keepdims=True)
    p = jnp.exp(logits - m)
    attn = p * pl.reciprocal(jnp.sum(p, axis=-1, keepdims=True), approx=True)
    ctx = jnp.einsum("hnm,mhd->nhd", attn, v,
                     preferred_element_type=jnp.float32).reshape(n, d)

    attn_out = jnp.dot(ctx, wo_t, preferred_element_type=jnp.float32) + bo
    return (x + attn_out) * 0.5                    # res=True branch


# ----------------------------------------------------------------------------
# Single fused kernel: init GAT + residual GATs + transformer head (per graph)
# ----------------------------------------------------------------------------
def fused_gatres_kernel(x_ref, adj_ref, eattr_ref,
                        wlr0_ref, blr0_ref, we0_ref, att0_ref, bias0_ref,
                        wlrs_ref, blrs_ref, wes_ref, atts_ref, biases_ref,
                        wqkv_ref, bqkv_ref, wo_ref, bo_ref,
                        out_ref, *, heads, hidden, n_res):
    eattr = eattr_ref[...]
    # additive adjacency mask, computed ONCE (hoisted out of the layer loop)
    mask_add = jnp.where(adj_ref[...] > 0.0, 0.0, -1e30).astype(jnp.float32)

    # init_gat: GATv2Conv(init_dim, hidden, heads=1, concat=True)
    x = _gatv2_layer(x_ref[...], mask_add, eattr,
                     wlr0_ref[...], blr0_ref[...], we0_ref[...],
                     att0_ref[...], bias0_ref[...],
                     heads=1, out_ch=hidden, apply_relu=False, residual=False)

    # gats[i]: GATv2Conv(hidden, hidden, heads=H, concat=False) + (.. + x)/2
    for i in range(n_res):                          # static unrolled layer loop
        x = _gatv2_layer(x, mask_add, eattr,
                         wlrs_ref[i], blrs_ref[i], wes_ref[i],
                         atts_ref[i], biases_ref[i],
                         heads=heads, out_ch=hidden,
                         apply_relu=True, residual=True)

    # transformer self-attention head with residual average
    out_ref[...] = _mha_layer(x, wqkv_ref[...], bqkv_ref[...],
                              wo_ref[...], bo_ref[...], num_heads=heads)


def _graph_spec(full_shape):
    """Per-graph block: leading (graph) dim squeezed, rest full-extent."""
    tail = tuple(full_shape[1:])
    zeros = (0,) * len(tail)

    def idx(g):
        return (g,) + zeros
    return pl.BlockSpec((None,) + tail, idx)


def _resident_spec(arr):
    """Whole-array block with a constant index_map -> DMA'd once, stays in VMEM."""
    zeros = (0,) * arr.ndim

    def idx(g):
        return zeros
    return pl.BlockSpec(arr.shape, idx)


def gat_res_forward(xb, adjb, eattrb, packed):
    b, n, _ = xb.shape
    weights = (packed["init"]["wlr_t"], packed["init"]["blr"], packed["init"]["we_t"],
               packed["init"]["att_bd"], packed["init"]["bias"],
               packed["gats"]["wlr_t"], packed["gats"]["blr"], packed["gats"]["we_t"],
               packed["gats"]["att_bd"], packed["gats"]["bias"],
               packed["mha"]["wqkv_t"], packed["mha"]["bqkv"],
               packed["mha"]["wo_t"], packed["mha"]["bo"])

    in_specs = [_graph_spec(xb.shape), _graph_spec(adjb.shape), _graph_spec(eattrb.shape)]
    in_specs += [_resident_spec(w) for w in weights]

    kernel = functools.partial(fused_gatres_kernel, heads=N_HEADS,
                               hidden=HIDDEN_DIM, n_res=N_LAYERS - 1)

    return pl.pallas_call(
        kernel,
        out_shape=jax.ShapeDtypeStruct((b, n, HIDDEN_DIM), jnp.float32),
        grid_spec=pltpu.PrefetchScalarGridSpec(
            num_scalar_prefetch=0,
            grid=(b,),
            in_specs=in_specs,
            out_specs=_graph_spec((b, n, HIDDEN_DIM)),
        ),
        compiler_params=pltpu.CompilerParams(
            # graphs are independent -> shard across TensorCores (v7x: 2 TCs)
            dimension_semantics=("parallel",),
            # actual per-step footprint at N=8 is a few hundred KiB; explicit,
            # generation-aware budget (when row-tiling for large N keep the
            # tile under ~56 MiB on v7x; v5e/v6e can go higher).
            vmem_limit_bytes=16 * 1024 * 1024,
        ),
    )(xb, adjb, eattrb, *weights)


# ----------------------------------------------------------------------------
# Glue: parameter init + host-side weight packing + sparse -> dense graph
# ----------------------------------------------------------------------------
def init_params(key):
    keys = iter(jax.random.split(key, 64))

    def glorot(shape, fan_in, fan_out):
        lim = math.sqrt(6.0 / (fan_in + fan_out))
        return jax.random.uniform(next(keys), shape, jnp.float32, -lim, lim)

    def gat_layer(in_dim, out_ch, heads, concat):
        hc = heads * out_ch
        out_dim = hc if concat else out_ch
        return {
            "wl": glorot((hc, in_dim), in_dim, hc),
            "bl": glorot((1, hc), in_dim, hc),
            "wr": glorot((hc, in_dim), in_dim, hc),
            "br": glorot((1, hc), in_dim, hc),
            "we": glorot((hc, EDGE_DIM), EDGE_DIM, hc),
            "att": glorot((heads, out_ch), out_ch, 1),
            "bias": jnp.zeros((1, out_dim), jnp.float32),
        }

    return {
        "init": gat_layer(INIT_DIM, HIDDEN_DIM, heads=1, concat=True),
        "gats": [gat_layer(HIDDEN_DIM, HIDDEN_DIM, heads=N_HEADS, concat=False)
                 for _ in range(N_LAYERS - 1)],
        "mha": {
            "w_qkv": glorot((3 * HIDDEN_DIM, HIDDEN_DIM), HIDDEN_DIM, 3 * HIDDEN_DIM),
            "b_qkv": jnp.zeros((1, 3 * HIDDEN_DIM), jnp.float32),
            "w_out": glorot((HIDDEN_DIM, HIDDEN_DIM), HIDDEN_DIM, HIDDEN_DIM),
            "b_out": jnp.zeros((1, HIDDEN_DIM), jnp.float32),
        },
    }


def pack_params(params):
    """Host-side repacking: pre-transpose, concat lin_l/lin_r, block-diag att,
    fold the 1/sqrt(d_head) query scale into the qkv projection."""
    def pack_gat(p, heads, out_ch):
        hc = heads * out_ch
        att_np = np.asarray(p["att"])
        att_bd = np.zeros((hc, heads), np.float32)          # block-diagonal att
        for h in range(heads):
            att_bd[h * out_ch:(h + 1) * out_ch, h] = att_np[h]
        return {
            "wlr_t": jnp.concatenate([p["wl"].T, p["wr"].T], axis=1),  # [in, 2*H*C]
            "blr": jnp.concatenate([p["bl"], p["br"]], axis=1),        # [1, 2*H*C]
            "we_t": p["we"].T,                                         # [edge, H*C]
            "att_bd": jnp.asarray(att_bd),                             # [H*C, H]
            "bias": p["bias"],
        }

    init = pack_gat(params["init"], 1, HIDDEN_DIM)
    gats_list = [pack_gat(p, N_HEADS, HIDDEN_DIM) for p in params["gats"]]
    gats = {k: jnp.stack([g[k] for g in gats_list]) for k in gats_list[0]}

    d = HIDDEN_DIM
    scale = 1.0 / math.sqrt(d // N_HEADS)
    wqkv_t = np.array(np.asarray(params["mha"]["w_qkv"]).T, copy=True)   # [D, 3D]
    bqkv = np.array(np.asarray(params["mha"]["b_qkv"]), copy=True)       # [1, 3D]
    wqkv_t[:, :d] *= scale                     # fold query scale (free at runtime)
    bqkv[:, :d] *= scale
    mha = {
        "wqkv_t": jnp.asarray(wqkv_t),
        "bqkv": jnp.asarray(bqkv),
        "wo_t": params["mha"]["w_out"].T,      # [D, D]
        "bo": params["mha"]["b_out"],
    }
    return {"init": init, "gats": gats, "mha": mha}


def densify_graph(edge_index, edge_attr, n):
    """PyG-style: remove self loops, add self loops with fill_value='mean'."""
    src = np.asarray(edge_index[0])
    tgt = np.asarray(edge_index[1])
    ea = np.asarray(edge_attr, dtype=np.float32)
    keep = src != tgt
    src, tgt, ea = src[keep], tgt[keep], ea[keep]

    adj = np.zeros((n, n), np.float32)
    dense_ea = np.zeros((n, n, ea.shape[-1]), np.float32)
    adj[tgt, src] = 1.0
    dense_ea[tgt, src] = ea
    deg = adj.sum(axis=1, keepdims=True)
    loop_attr = dense_ea.sum(axis=1) / np.maximum(deg, 1.0)   # mean of incoming attrs
    idx = np.arange(n)
    adj[idx, idx] = 1.0
    dense_ea[idx, idx] = loop_attr
    return jnp.asarray(adj), jnp.asarray(dense_ea.reshape(n * n, -1))


if __name__ == "__main__":
    key = jax.random.PRNGKey(0)
    kx, ke, kp = jax.random.split(key, 3)

    n_nodes, n_graphs = 8, 4
    xb = jax.random.normal(kx, (n_graphs, n_nodes, INIT_DIM), jnp.float32)

    # batch of molecules: bidirectional ring + g extra chords per graph g
    adjs, eattrs = [], []
    ekeys = jax.random.split(ke, n_graphs)
    for g in range(n_graphs):
        src = [i for i in range(n_nodes)] + [(i + 1) % n_nodes for i in range(n_nodes)]
        tgt = [(i + 1) % n_nodes for i in range(n_nodes)] + [i for i in range(n_nodes)]
        for c in range(g):
            a, bnode = c, (c + n_nodes // 2) % n_nodes
            src += [a, bnode]
            tgt += [bnode, a]
        edge_index = np.stack([np.array(src, np.int32), np.array(tgt, np.int32)])
        edge_attr = jax.random.normal(ekeys[g], (edge_index.shape[1], EDGE_DIM),
                                      jnp.float32)
        adj, ea_flat = densify_graph(edge_index, edge_attr, n_nodes)
        adjs.append(adj)
        eattrs.append(ea_flat)
    adjb = jnp.stack(adjs)            # [B, N, N]
    eattrb = jnp.stack(eattrs)        # [B, N*N, E]

    # self-loop invariant that lets the kernel drop the post-exp `* adj` guard
    assert np.all(np.asarray(adjb).sum(axis=-1) > 0)

    params = init_params(kp)
    packed = pack_params(params)

    out = gat_res_forward(xb, adjb, eattrb, packed)
    out = jax.block_until_ready(out)

    assert out.shape == (n_graphs, n_nodes, HIDDEN_DIM), out.shape
    assert bool(jnp.all(jnp.isfinite(out)))
    print("KERNEL_OK")
</pallas_src>

<mosaic_0001>
module attributes {stable_mosaic.version = 11 : i64} {
  func.func @fused_gatres_kernel(%arg0: i32, %arg1: memref<1x8x9xf32, #tpu.memory_space<vmem>>, %arg2: memref<1x8x8xf32, #tpu.memory_space<vmem>>, %arg3: memref<1x64x3xf32, #tpu.memory_space<vmem>>, %arg4: memref<9x64xf32, #tpu.memory_space<vmem>>, %arg5: memref<1x64xf32, #tpu.memory_space<vmem>>, %arg6: memref<3x32xf32, #tpu.memory_space<vmem>>, %arg7: memref<32x1xf32, #tpu.memory_space<vmem>>, %arg8: memref<1x32xf32, #tpu.memory_space<vmem>>, %arg9: memref<3x32x256xf32, #tpu.memory_space<vmem>>, %arg10: memref<3x1x256xf32, #tpu.memory_space<vmem>>, %arg11: memref<3x3x128xf32, #tpu.memory_space<vmem>>, %arg12: memref<3x128x4xf32, #tpu.memory_space<vmem>>, %arg13: memref<3x1x32xf32, #tpu.memory_space<vmem>>, %arg14: memref<32x96xf32, #tpu.memory_space<vmem>>, %arg15: memref<1x96xf32, #tpu.memory_space<vmem>>, %arg16: memref<32x32xf32, #tpu.memory_space<vmem>>, %arg17: memref<1x32xf32, #tpu.memory_space<vmem>>, %arg18: memref<1x8x32xf32, #tpu.memory_space<vmem>>) attributes {dimension_semantics = [#tpu.dimension_semantics<parallel>], iteration_bounds = array<i64: 4>, scalar_prefetch = 0 : i64, scratch_operands = 0 : i64, tpu.core_type = #tpu.core_type<tc>, window_params = [{transform_indices = @transform_0, window_bounds = array<i64: 1, 8, 9>}, {transform_indices = @transform_1, window_bounds = array<i64: 1, 8, 8>}, {transform_indices = @transform_2, window_bounds = array<i64: 1, 64, 3>}, {pipeline_mode = #tpu.pipeline_mode<synchronous>, transform_indices = @transform_3, window_bounds = array<i64: 9, 64>}, {pipeline_mode = #tpu.pipeline_mode<synchronous>, transform_indices = @transform_4, window_bounds = array<i64: 1, 64>}, {pipeline_mode = #tpu.pipeline_mode<synchronous>, transform_indices = @transform_5, window_bounds = array<i64: 3, 32>}, {pipeline_mode = #tpu.pipeline_mode<synchronous>, transform_indices = @transform_6, window_bounds = array<i64: 32, 1>}, {pipeline_mode = #tpu.pipeline_mode<synchronous>, transform_indices = @transform_7, window_bounds = array<i64: 1, 32>}, {pipeline_mode = #tpu.pipeline_mode<synchronous>, transform_indices = @transform_8, window_bounds = array<i64: 3, 32, 256>}, {pipeline_mode = #tpu.pipeline_mode<synchronous>, transform_indices = @transform_9, window_bounds = array<i64: 3, 1, 256>}, {pipeline_mode = #tpu.pipeline_mode<synchronous>, transform_indices = @transform_10, window_bounds = array<i64: 3, 3, 128>}, {pipeline_mode = #tpu.pipeline_mode<synchronous>, transform_indices = @transform_11, window_bounds = array<i64: 3, 128, 4>}, {pipeline_mode = #tpu.pipeline_mode<synchronous>, transform_indices = @transform_12, window_bounds = array<i64: 3, 1, 32>}, {pipeline_mode = #tpu.pipeline_mode<synchronous>, transform_indices = @transform_13, window_bounds = array<i64: 32, 96>}, {pipeline_mode = #tpu.pipeline_mode<synchronous>, transform_indices = @transform_14, window_bounds = array<i64: 1, 96>}, {pipeline_mode = #tpu.pipeline_mode<synchronous>, transform_indices = @transform_15, window_bounds = array<i64: 32, 32>}, {pipeline_mode = #tpu.pipeline_mode<synchronous>, transform_indices = @transform_16, window_bounds = array<i64: 1, 32>}, {transform_indices = @transform_17, window_bounds = array<i64: 1, 8, 32>}]} {
    %c0 = arith.constant 0 : index
    %c0_0 = arith.constant 0 : index
    %c0_1 = arith.constant 0 : index
    %0 = vector.load %arg3[%c0, %c0_0, %c0_1] : memref<1x64x3xf32, #tpu.memory_space<vmem>>, vector<1x64x3xf32>
    %1 = vector.shape_cast %0 : vector<1x64x3xf32> to vector<64x3xf32>
    %c0_2 = arith.constant 0 : index
    %c0_3 = arith.constant 0 : index
    %c0_4 = arith.constant 0 : index
    %2 = vector.load %arg2[%c0_2, %c0_3, %c0_4] : memref<1x8x8xf32, #tpu.memory_space<vmem>>, vector<1x8x8xf32>
    %3 = vector.shape_cast %2 : vector<1x8x8xf32> to vector<8x8xf32>
    %cst = arith.constant 0.000000e+00 : f32
    %4 = vector.broadcast %cst : f32 to vector<8x8xf32>
    %5 = arith.cmpf ogt, %3, %4 : vector<8x8xf32>
    %cst_5 = arith.constant 0.000000e+00 : f32
    %cst_6 = arith.constant -1.000000e+30 : f32
    %6 = vector.broadcast %cst_5 : f32 to vector<8x8xf32>
    %7 = vector.broadcast %cst_6 : f32 to vector<8x8xf32>
    %8 = arith.select %5, %6, %7 : vector<8x8xi1>, vector<8x8xf32>
    %c0_7 = arith.constant 0 : index
    %c0_8 = arith.constant 0 : index
    %c0_9 = arith.constant 0 : index
    %9 = vector.load %arg1[%c0_7, %c0_8, %c0_9] : memref<1x8x9xf32, #tpu.memory_space<vmem>>, vector<1x8x9xf32>
    %10 = vector.shape_cast %9 : vector<1x8x9xf32> to vector<8x9xf32>
    %c0_10 = arith.constant 0 : index
    %c0_11 = arith.constant 0 : index
    %11 = vector.load %arg4[%c0_10, %c0_11] : memref<9x64xf32, #tpu.memory_space<vmem>>, vector<9x64xf32>
    %c0_12 = arith.constant 0 : index
    %c0_13 = arith.constant 0 : index
    %12 = vector.load %arg5[%c0_12, %c0_13] : memref<1x64xf32, #tpu.memory_space<vmem>>, vector<1x64xf32>
    %c0_14 = arith.constant 0 : index
    %c0_15 = arith.constant 0 : index
    %13 = vector.load %arg6[%c0_14, %c0_15] : memref<3x32xf32, #tpu.memory_space<vmem>>, vector<3x32xf32>
    %c0_16 = arith.constant 0 : index
    %c0_17 = arith.constant 0 : index
    %14 = vector.load %arg7[%c0_16, %c0_17] : memref<32x1xf32, #tpu.memory_space<vmem>>, vector<32x1xf32>
    %c0_18 = arith.constant 0 : index
    %c0_19 = arith.constant 0 : index
    %15 = vector.load %arg8[%c0_18, %c0_19] : memref<1x32xf32, #tpu.memory_space<vmem>>, vector<1x32xf32>
    %cst_20 = arith.constant dense<0.000000e+00> : vector<8x64xf32>
    %16 = tpu.matmul %10, %11, %cst_20 {dimension_numbers = #tpu.dot_dimension_numbers<[1], [0], [0], [1], [0, 0, 1, 1], [], []>} : vector<8x9xf32>, vector<9x64xf32>, vector<8x64xf32> -> vector<8x64xf32>
    %17 = vector.broadcast %12 : vector<1x64xf32> to vector<8x64xf32>
    %18 = arith.addf %16, %17 : vector<8x64xf32>
    %19 = vector.extract_strided_slice %18 {offsets = [0, 0], sizes = [8, 32], strides = [1, 1]} : vector<8x64xf32> to vector<8x32xf32>
    %20 = vector.extract_strided_slice %18 {offsets = [0, 32], sizes = [8, 32], strides = [1, 1]} : vector<8x64xf32> to vector<8x32xf32>
    %cst_21 = arith.constant dense<0.000000e+00> : vector<64x32xf32>
    %21 = tpu.matmul %1, %13, %cst_21 {dimension_numbers = #tpu.dot_dimension_numbers<[1], [0], [0], [1], [0, 0, 1, 1], [], []>} : vector<64x3xf32>, vector<3x32xf32>, vector<64x32xf32> -> vector<64x32xf32>
    %22 = vector.shape_cast %20 : vector<8x32xf32> to vector<8x1x32xf32>
    %23 = vector.shape_cast %19 : vector<8x32xf32> to vector<1x8x32xf32>
    %24 = vector.broadcast %22 : vector<8x1x32xf32> to vector<8x8x32xf32>
    %25 = vector.broadcast %23 : vector<1x8x32xf32> to vector<8x8x32xf32>
    %26 = arith.addf %24, %25 : vector<8x8x32xf32>
    %27 = vector.shape_cast %21 : vector<64x32xf32> to vector<8x8x32xf32>
    %28 = arith.addf %26, %27 : vector<8x8x32xf32>
    %cst_22 = arith.constant 0.000000e+00 : f32
    %29 = vector.broadcast %cst_22 : f32 to vector<8x8x32xf32>
    %30 = arith.cmpf ogt, %28, %29 : vector<8x8x32xf32>
    %cst_23 = arith.constant 2.000000e-01 : f32
    %31 = vector.broadcast %cst_23 : f32 to vector<8x8x32xf32>
    %32 = arith.mulf %31, %28 : vector<8x8x32xf32>
    %33 = arith.select %30, %28, %32 : vector<8x8x32xi1>, vector<8x8x32xf32>
    %34 = vector.shape_cast %33 : vector<8x8x32xf32> to vector<64x32xf32>
    %cst_24 = arith.constant dense<0.000000e+00> : vector<64x1xf32>
    %35 = tpu.matmul %34, %14, %cst_24 {dimension_numbers = #tpu.dot_dimension_numbers<[1], [0], [0], [1], [0, 0, 1, 1], [], []>} : vector<64x32xf32>, vector<32x1xf32>, vector<64x1xf32> -> vector<64x1xf32>
    %36 = vector.shape_cast %35 : vector<64x1xf32> to vector<1x8x8xf32>
    %37 = vector.shape_cast %8 : vector<8x8xf32> to vector<1x8x8xf32>
    %38 = arith.addf %36, %37 : vector<1x8x8xf32>
    %cst_25 = arith.constant dense<0xFF800000> : vector<1x8xf32>
    %39 = vector.multi_reduction <maximumf>, %38, %cst_25 [2] : vector<1x8x8xf32> to vector<1x8xf32>
    %40 = vector.shape_cast %39 : vector<1x8xf32> to vector<1x8x1xf32>
    %41 = vector.broadcast %40 : vector<1x8x1xf32> to vector<1x8x8xf32>
    %42 = arith.subf %38, %41 : vector<1x8x8xf32>
    %43 = math.exp %42 : vector<1x8x8xf32>
    %cst_26 = arith.constant dense<0.000000e+00> : vector<1x8xf32>
    %44 = vector.multi_reduction <add>, %43, %cst_26 [2] : vector<1x8x8xf32> to vector<1x8xf32>
    %45 = vector.shape_cast %44 : vector<1x8xf32> to vector<1x8x1xf32>
    %46 = tpu.reciprocal %45 {approx = true} : vector<1x8x1xf32> -> vector<1x8x1xf32>
    %47 = vector.broadcast %46 : vector<1x8x1xf32> to vector<1x8x8xf32>
    %48 = arith.mulf %43, %47 : vector<1x8x8xf32>
    %49 = vector.shape_cast %19 : vector<8x32xf32> to vector<8x1x32xf32>
    %50 = tpu.transpose %49, [1, 0, 2] : vector<8x1x32xf32> -> vector<1x8x32xf32>
    "tpu.trace_start"() <{level = 10 : i32, message = "hij,hjc->hic"}> : () -> ()
    %cst_27 = arith.constant dense<0.000000e+00> : vector<1x8x32xf32>
    %51 = tpu.matmul %48, %50, %cst_27 {dimension_numbers = #tpu.dot_dimension_numbers<[2], [1], [1], [2], [0, 0, 0, 1, 1, 2], [0], [0]>} : vector<1x8x8xf32>, vector<1x8x32xf32>, vector<1x8x32xf32> -> vector<1x8x32xf32>
    "tpu.trace_stop"() : () -> ()
    %cst_28 = arith.constant dense<0.000000e+00> : vector<8x32xf32>
    %52 = vector.multi_reduction <add>, %51, %cst_28 [0] : vector<1x8x32xf32> to vector<8x32xf32>
    %cst_29 = arith.constant 1.000000e+00 : f32
    %53 = vector.broadcast %cst_29 : f32 to vector<8x32xf32>
    %54 = arith.mulf %52, %53 : vector<8x32xf32>
    %55 = vector.broadcast %15 : vector<1x32xf32> to vector<8x32xf32>
    %56 = arith.addf %54, %55 : vector<8x32xf32>
    %c0_30 = arith.constant 0 : index
    %c0_31 = arith.constant 0 : index
    %c0_32 = arith.constant 0 : index
    %57 = vector.load %arg9[%c0_30, %c0_31, %c0_32] : memref<3x32x256xf32, #tpu.memory_space<vmem>>, vector<1x32x256xf32>
    %58 = vector.shape_cast %57 : vector<1x32x256xf32> to vector<32x256xf32>
    %c0_33 = arith.constant 0 : index
    %c0_34 = arith.constant 0 : index
    %c0_35 = arith.constant 0 : index
    %59 = vector.load %arg10[%c0_33, %c0_34, %c0_35] : memref<3x1x256xf32, #tpu.memory_space<vmem>>, vector<1x1x256xf32>
    %60 = vector.shape_cast %59 : vector<1x1x256xf32> to vector<1x256xf32>
    %c0_36 = arith.constant 0 : index
    %c0_37 = arith.constant 0 : index
    %c0_38 = arith.constant 0 : index
    %61 = vector.load %arg11[%c0_36, %c0_37, %c0_38] : memref<3x3x128xf32, #tpu.memory_space<vmem>>, vector<1x3x128xf32>
    %62 = vector.shape_cast %61 : vector<1x3x128xf32> to vector<3x128xf32>
    %c0_39 = arith.constant 0 : index
    %c0_40 = arith.constant 0 : index
    %c0_41 = arith.constant 0 : index
    %63 = vector.load %arg12[%c0_39, %c0_40, %c0_41] : memref<3x128x4xf32, #tpu.memory_space<vmem>>, vector<1x128x4xf32>
    %64 = vector.shape_cast %63 : vector<1x128x4xf32> to vector<128x4xf32>
    %c0_42 = arith.constant 0 : index
    %c0_43 = arith.constant 0 : index
    %c0_44 = arith.constant 0 : index
    %65 = vector.load %arg13[%c0_42, %c0_43, %c0_44] : memref<3x1x32xf32, #tpu.memory_space<vmem>>, vector<1x1x32xf32>
    %66 = vector.shape_cast %65 : vector<1x1x32xf32> to vector<1x32xf32>
    %cst_45 = arith.constant 0.000000e+00 : f32
    %67 = vector.broadcast %cst_45 : f32 to vector<8x32xf32>
    %68 = arith.maximumf %56, %67 : vector<8x32xf32>
    %cst_46 = arith.constant dense<0.000000e+00> : vector<8x256xf32>
    %69 = tpu.matmul %68, %58, %cst_46 {dimension_numbers = #tpu.dot_dimension_numbers<[1], [0], [0], [1], [0, 0, 1, 1], [], []>} : vector<8x32xf32>, vector<32x256xf32>, vector<8x256xf32> -> vector<8x256xf32>
    %70 = vector.broadcast %60 : vector<1x256xf32> to vector<8x256xf32>
    %71 = arith.addf %69, %70 : vector<8x256xf32>
    %72 = vector.extract_strided_slice %71 {offsets = [0, 0], sizes = [8, 128], strides = [1, 1]} : vector<8x256xf32> to vector<8x128xf32>
    %73 = vector.extract_strided_slice %71 {offsets = [0, 128], sizes = [8, 128], strides = [1, 1]} : vector<8x256xf32> to vector<8x128xf32>
    %cst_47 = arith.constant dense<0.000000e+00> : vector<64x128xf32>
    %74 = tpu.matmul %1, %62, %cst_47 {dimension_numbers = #tpu.dot_dimension_numbers<[1], [0], [0], [1], [0, 0, 1, 1], [], []>} : vector<64x3xf32>, vector<3x128xf32>, vector<64x128xf32> -> vector<64x128xf32>
    %75 = vector.shape_cast %73 : vector<8x128xf32> to vector<8x1x128xf32>
    %76 = vector.shape_cast %72 : vector<8x128xf32> to vector<1x8x128xf32>
    %77 = vector.broadcast %75 : vector<8x1x128xf32> to vector<8x8x128xf32>
    %78 = vector.broadcast %76 : vector<1x8x128xf32> to vector<8x8x128xf32>
    %79 = arith.addf %77, %78 : vector<8x8x128xf32>
    %80 = vector.shape_cast %74 : vector<64x128xf32> to vector<8x8x128xf32>
    %81 = arith.addf %79, %80 : vector<8x8x128xf32>
    %cst_48 = arith.constant 0.000000e+00 : f32
    %82 = vector.broadcast %cst_48 : f32 to vector<8x8x128xf32>
    %83 = arith.cmpf ogt, %81, %82 : vector<8x8x128xf32>
    %cst_49 = arith.constant 2.000000e-01 : f32
    %84 = vector.broadcast %cst_49 : f32 to vector<8x8x128xf32>
    %85 = arith.mulf %84, %81 : vector<8x8x128xf32>
    %86 = arith.select %83, %81, %85 : vector<8x8x128xi1>, vector<8x8x128xf32>
    %87 = vector.shape_cast %86 : vector<8x8x128xf32> to vector<64x128xf32>
    %cst_50 = arith.constant dense<0.000000e+00> : vector<64x4xf32>
    %88 = tpu.matmul %87, %64, %cst_50 {dimension_numbers = #tpu.dot_dimension_numbers<[1], [0], [0], [1], [0, 0, 1, 1], [], []>} : vector<64x128xf32>, vector<128x4xf32>, vector<64x4xf32> -> vector<64x4xf32>
    %89 = tpu.transpose %88, [1, 0] : vector<64x4xf32> -> vector<4x64xf32>
    %90 = vector.shape_cast %89 : vector<4x64xf32> to vector<4x8x8xf32>
    %91 = vector.shape_cast %8 : vector<8x8xf32> to vector<1x8x8xf32>
    %92 = vector.broadcast %91 : vector<1x8x8xf32> to vector<4x8x8xf32>
    %93 = arith.addf %90, %92 : vector<4x8x8xf32>
    %cst_51 = arith.constant dense<0xFF800000> : vector<4x8xf32>
    %94 = vector.multi_reduction <maximumf>, %93, %cst_51 [2] : vector<4x8x8xf32> to vector<4x8xf32>
    %95 = vector.shape_cast %94 : vector<4x8xf32> to vector<4x8x1xf32>
    %96 = vector.broadcast %95 : vector<4x8x1xf32> to vector<4x8x8xf32>
    %97 = arith.subf %93, %96 : vector<4x8x8xf32>
    %98 = math.exp %97 : vector<4x8x8xf32>
    %cst_52 = arith.constant dense<0.000000e+00> : vector<4x8xf32>
    %99 = vector.multi_reduction <add>, %98, %cst_52 [2] : vector<4x8x8xf32> to vector<4x8xf32>
    %100 = vector.shape_cast %99 : vector<4x8xf32> to vector<4x8x1xf32>
    %101 = tpu.reciprocal %100 {approx = true} : vector<4x8x1xf32> -> vector<4x8x1xf32>
    %102 = vector.broadcast %101 : vector<4x8x1xf32> to vector<4x8x8xf32>
    %103 = arith.mulf %98, %102 : vector<4x8x8xf32>
    %104 = vector.shape_cast %72 : vector<8x128xf32> to vector<8x4x32xf32>
    %105 = tpu.transpose %104, [1, 0, 2] : vector<8x4x32xf32> -> vector<4x8x32xf32>
    "tpu.trace_start"() <{level = 10 : i32, message = "hij,hjc->hic"}> : () -> ()
    %cst_53 = arith.constant dense<0.000000e+00> : vector<4x8x32xf32>
    %106 = tpu.matmul %103, %105, %cst_53 {dimension_numbers = #tpu.dot_dimension_numbers<[2], [1], [1], [2], [0, 0, 0, 1, 1, 2], [0], [0]>} : vector<4x8x8xf32>, vector<4x8x32xf32>, vector<4x8x32xf32> -> vector<4x8x32xf32>
    "tpu.trace_stop"() : () -> ()
    %cst_54 = arith.constant dense<0.000000e+00> : vector<8x32xf32>
    %107 = vector.multi_reduction <add>, %106, %cst_54 [0] : vector<4x8x32xf32> to vector<8x32xf32>
    %cst_55 = arith.constant 2.500000e-01 : f32
    %108 = vector.broadcast %cst_55 : f32 to vector<8x32xf32>
    %109 = arith.mulf %107, %108 : vector<8x32xf32>
    %110 = vector.broadcast %66 : vector<1x32xf32> to vector<8x32xf32>
    %111 = arith.addf %109, %110 : vector<8x32xf32>
    %112 = arith.addf %111, %56 : vector<8x32xf32>
    %cst_56 = arith.constant 5.000000e-01 : f32
    %113 = vector.broadcast %cst_56 : f32 to vector<8x32xf32>
    %114 = arith.mulf %112, %113 : vector<8x32xf32>
    %c1 = arith.constant 1 : index
    %c0_57 = arith.constant 0 : index
    %c0_58 = arith.constant 0 : index
    %115 = vector.load %arg9[%c1, %c0_57, %c0_58] : memref<3x32x256xf32, #tpu.memory_space<vmem>>, vector<1x32x256xf32>
    %116 = vector.shape_cast %115 : vector<1x32x256xf32> to vector<32x256xf32>
    %c1_59 = arith.constant 1 : index
    %c0_60 = arith.constant 0 : index
    %c0_61 = arith.constant 0 : index
    %117 = vector.load %arg10[%c1_59, %c0_60, %c0_61] : memref<3x1x256xf32, #tpu.memory_space<vmem>>, vector<1x1x256xf32>
    %118 = vector.shape_cast %117 : vector<1x1x256xf32> to vector<1x256xf32>
    %c1_62 = arith.constant 1 : index
    %c0_63 = arith.constant 0 : index
    %c0_64 = arith.constant 0 : index
    %119 = vector.load %arg11[%c1_62, %c0_63, %c0_64] : memref<3x3x128xf32, #tpu.memory_space<vmem>>, vector<1x3x128xf32>
    %120 = vector.shape_cast %119 : vector<1x3x128xf32> to vector<3x128xf32>
    %c1_65 = arith.constant 1 : index
    %c0_66 = arith.constant 0 : index
    %c0_67 = arith.constant 0 : index
    %121 = vector.load %arg12[%c1_65, %c0_66, %c0_67] : memref<3x128x4xf32, #tpu.memory_space<vmem>>, vector<1x128x4xf32>
    %122 = vector.shape_cast %121 : vector<1x128x4xf32> to vector<128x4xf32>
    %c1_68 = arith.constant 1 : index
    %c0_69 = arith.constant 0 : index
    %c0_70 = arith.constant 0 : index
    %123 = vector.load %arg13[%c1_68, %c0_69, %c0_70] : memref<3x1x32xf32, #tpu.memory_space<vmem>>, vector<1x1x32xf32>
    %124 = vector.shape_cast %123 : vector<1x1x32xf32> to vector<1x32xf32>
    %cst_71 = arith.constant 0.000000e+00 : f32
    %125 = vector.broadcast %cst_71 : f32 to vector<8x32xf32>
    %126 = arith.maximumf %114, %125 : vector<8x32xf32>
    %cst_72 = arith.constant dense<0.000000e+00> : vector<8x256xf32>
    %127 = tpu.matmul %126, %116, %cst_72 {dimension_numbers = #tpu.dot_dimension_numbers<[1], [0], [0], [1], [0, 0, 1, 1], [], []>} : vector<8x32xf32>, vector<32x256xf32>, vector<8x256xf32> -> vector<8x256xf32>
    %128 = vector.broadcast %118 : vector<1x256xf32> to vector<8x256xf32>
    %129 = arith.addf %127, %128 : vector<8x256xf32>
    %130 = vector.extract_strided_slice %129 {offsets = [0, 0], sizes = [8, 128], strides = [1, 1]} : vector<8x256xf32> to vector<8x128xf32>
    %131 = vector.extract_strided_slice %129 {offsets = [0, 128], sizes = [8, 128], strides = [1, 1]} : vector<8x256xf32> to vector<8x128xf32>
    %cst_73 = arith.constant dense<0.000000e+00> : vector<64x128xf32>
    %132 = tpu.matmul %1, %120, %cst_73 {dimension_numbers = #tpu.dot_dimension_numbers<[1], [0], [0], [1], [0, 0, 1, 1], [], []>} : vector<64x3xf32>, vector<3x128xf32>, vector<64x128xf32> -> vector<64x128xf32>
    %133 = vector.shape_cast %131 : vector<8x128xf32> to vector<8x1x128xf32>
    %134 = vector.shape_cast %130 : vector<8x128xf32> to vector<1x8x128xf32>
    %135 = vector.broadcast %133 : vector<8x1x128xf32> to vector<8x8x128xf32>
    %136 = vector.broadcast %134 : vector<1x8x128xf32> to vector<8x8x128xf32>
    %137 = arith.addf %135, %136 : vector<8x8x128xf32>
    %138 = vector.shape_cast %132 : vector<64x128xf32> to vector<8x8x128xf32>
    %139 = arith.addf %137, %138 : vector<8x8x128xf32>
    %cst_74 = arith.constant 0.000000e+00 : f32
    %140 = vector.broadcast %cst_74 : f32 to vector<8x8x128xf32>
    %141 = arith.cmpf ogt, %139, %140 : vector<8x8x128xf32>
    %cst_75 = arith.constant 2.000000e-01 : f32
    %142 = vector.broadcast %cst_75 : f32 to vector<8x8x128xf32>
    %143 = arith.mulf %142, %139 : vector<8x8x128xf32>
    %144 = arith.select %141, %139, %143 : vector<8x8x128xi1>, vector<8x8x128xf32>
    %145 = vector.shape_cast %144 : vector<8x8x128xf32> to vector<64x128xf32>
    %cst_76 = arith.constant dense<0.000000e+00> : vector<64x4xf32>
    %146 = tpu.matmul %145, %122, %cst_76 {dimension_numbers = #tpu.dot_dimension_numbers<[1], [0], [0], [1], [0, 0, 1, 1], [], []>} : vector<64x128xf32>, vector<128x4xf32>, vector<64x4xf32> -> vector<64x4xf32>
    %147 = tpu.transpose %146, [1, 0] : vector<64x4xf32> -> vector<4x64xf32>
    %148 = vector.shape_cast %147 : vector<4x64xf32> to vector<4x8x8xf32>
    %149 = vector.shape_cast %8 : vector<8x8xf32> to vector<1x8x8xf32>
    %150 = vector.broadcast %149 : vector<1x8x8xf32> to vector<4x8x8xf32>
    %151 = arith.addf %148, %150 : vector<4x8x8xf32>
    %cst_77 = arith.constant dense<0xFF800000> : vector<4x8xf32>
    %152 = vector.multi_reduction <maximumf>, %151, %cst_77 [2] : vector<4x8x8xf32> to vector<4x8xf32>
    %153 = vector.shape_cast %152 : vector<4x8xf32> to vector<4x8x1xf32>
    %154 = vector.broadcast %153 : vector<4x8x1xf32> to vector<4x8x8xf32>
    %155 = arith.subf %151, %154 : vector<4x8x8xf32>
    %156 = math.exp %155 : vector<4x8x8xf32>
    %cst_78 = arith.constant dense<0.000000e+00> : vector<4x8xf32>
    %157 = vector.multi_reduction <add>, %156, %cst_78 [2] : vector<4x8x8xf32> to vector<4x8xf32>
    %158 = vector.shape_cast %157 : vector<4x8xf32> to vector<4x8x1xf32>
    %159 = tpu.reciprocal %158 {approx = true} : vector<4x8x1xf32> -> vector<4x8x1xf32>
    %160 = vector.broadcast %159 : vector<4x8x1xf32> to vector<4x8x8xf32>
    %161 = arith.mulf %156, %160 : vector<4x8x8xf32>
    %162 = vector.shape_cast %130 : vector<8x128xf32> to vector<8x4x32xf32>
    %163 = tpu.transpose %162, [1, 0, 2] : vector<8x4x32xf32> -> vector<4x8x32xf32>
    "tpu.trace_start"() <{level = 10 : i32, message = "hij,hjc->hic"}> : () -> ()
    %cst_79 = arith.constant dense<0.000000e+00> : vector<4x8x32xf32>
    %164 = tpu.matmul %161, %163, %cst_79 {dimension_numbers = #tpu.dot_dimension_numbers<[2], [1], [1], [2], [0, 0, 0, 1, 1, 2], [0], [0]>} : vector<4x8x8xf32>, vector<4x8x32xf32>, vector<4x8x32xf32> -> vector<4x8x32xf32>
    "tpu.trace_stop"() : () -> ()
    %cst_80 = arith.constant dense<0.000000e+00> : vector<8x32xf32>
    %165 = vector.multi_reduction <add>, %164, %cst_80 [0] : vector<4x8x32xf32> to vector<8x32xf32>
    %cst_81 = arith.constant 2.500000e-01 : f32
    %166 = vector.broadcast %cst_81 : f32 to vector<8x32xf32>
    %167 = arith.mulf %165, %166 : vector<8x32xf32>
    %168 = vector.broadcast %124 : vector<1x32xf32> to vector<8x32xf32>
    %169 = arith.addf %167, %168 : vector<8x32xf32>
    %170 = arith.addf %169, %114 : vector<8x32xf32>
    %cst_82 = arith.constant 5.000000e-01 : f32
    %171 = vector.broadcast %cst_82 : f32 to vector<8x32xf32>
    %172 = arith.mulf %170, %171 : vector<8x32xf32>
    %c2 = arith.constant 2 : index
    %c0_83 = arith.constant 0 : index
    %c0_84 = arith.constant 0 : index
    %173 = vector.load %arg9[%c2, %c0_83, %c0_84] : memref<3x32x256xf32, #tpu.memory_space<vmem>>, vector<1x32x256xf32>
    %174 = vector.shape_cast %173 : vector<1x32x256xf32> to vector<32x256xf32>
    %c2_85 = arith.constant 2 : index
    %c0_86 = arith.constant 0 : index
    %c0_87 = arith.constant 0 : index
    %175 = vector.load %arg10[%c2_85, %c0_86, %c0_87] : memref<3x1x256xf32, #tpu.memory_space<vmem>>, vector<1x1x256xf32>
    %176 = vector.shape_cast %175 : vector<1x1x256xf32> to vector<1x256xf32>
    %c2_88 = arith.constant 2 : index
    %c0_89 = arith.constant 0 : index
    %c0_90 = arith.constant 0 : index
    %177 = vector.load %arg11[%c2_88, %c0_89, %c0_90] : memref<3x3x128xf32, #tpu.memory_space<vmem>>, vector<1x3x128xf32>
    %178 = vector.shape_cast %177 : vector<1x3x128xf32> to vector<3x128xf32>
    %c2_91 = arith.constant 2 : index
    %c0_92 = arith.constant 0 : index
    %c0_93 = arith.constant 0 : index
    %179 = vector.load %arg12[%c2_91, %c0_92, %c0_93] : memref<3x128x4xf32, #tpu.memory_space<vmem>>, vector<1x128x4xf32>
    %180 = vector.shape_cast %179 : vector<1x128x4xf32> to vector<128x4xf32>
    %c2_94 = arith.constant 2 : index
    %c0_95 = arith.constant 0 : index
    %c0_96 = arith.constant 0 : index
    %181 = vector.load %arg13[%c2_94, %c0_95, %c0_96] : memref<3x1x32xf32, #tpu.memory_space<vmem>>, vector<1x1x32xf32>
    %182 = vector.shape_cast %181 : vector<1x1x32xf32> to vector<1x32xf32>
    %cst_97 = arith.constant 0.000000e+00 : f32
    %183 = vector.broadcast %cst_97 : f32 to vector<8x32xf32>
    %184 = arith.maximumf %172, %183 : vector<8x32xf32>
    %cst_98 = arith.constant dense<0.000000e+00> : vector<8x256xf32>
    %185 = tpu.matmul %184, %174, %cst_98 {dimension_numbers = #tpu.dot_dimension_numbers<[1], [0], [0], [1], [0, 0, 1, 1], [], []>} : vector<8x32xf32>, vector<32x256xf32>, vector<8x256xf32> -> vector<8x256xf32>
    %186 = vector.broadcast %176 : vector<1x256xf32> to vector<8x256xf32>
    %187 = arith.addf %185, %186 : vector<8x256xf32>
    %188 = vector.extract_strided_slice %187 {offsets = [0, 0], sizes = [8, 128], strides = [1, 1]} : vector<8x256xf32> to vector<8x128xf32>
    %189 = vector.extract_strided_slice %187 {offsets = [0, 128], sizes = [8, 128], strides = [1, 1]} : vector<8x256xf32> to vector<8x128xf32>
    %cst_99 = arith.constant dense<0.000000e+00> : vector<64x128xf32>
    %190 = tpu.matmul %1, %178, %cst_99 {dimension_numbers = #tpu.dot_dimension_numbers<[1], [0], [0], [1], [0, 0, 1, 1], [], []>} : vector<64x3xf32>, vector<3x128xf32>, vector<64x128xf32> -> vector<64x128xf32>
    %191 = vector.shape_cast %189 : vector<8x128xf32> to vector<8x1x128xf32>
    %192 = vector.shape_cast %188 : vector<8x128xf32> to vector<1x8x128xf32>
    %193 = vector.broadcast %191 : vector<8x1x128xf32> to vector<8x8x128xf32>
    %194 = vector.broadcast %192 : vector<1x8x128xf32> to vector<8x8x128xf32>
    %195 = arith.addf %193, %194 : vector<8x8x128xf32>
    %196 = vector.shape_cast %190 : vector<64x128xf32> to vector<8x8x128xf32>
    %197 = arith.addf %195, %196 : vector<8x8x128xf32>
    %cst_100 = arith.constant 0.000000e+00 : f32
    %198 = vector.broadcast %cst_100 : f32 to vector<8x8x128xf32>
    %199 = arith.cmpf ogt, %197, %198 : vector<8x8x128xf32>
    %cst_101 = arith.constant 2.000000e-01 : f32
    %200 = vector.broadcast %cst_101 : f32 to vector<8x8x128xf32>
    %201 = arith.mulf %200, %197 : vector<8x8x128xf32>
    %202 = arith.select %199, %197, %201 : vector<8x8x128xi1>, vector<8x8x128xf32>
    %203 = vector.shape_cast %202 : vector<8x8x128xf32> to vector<64x128xf32>
    %cst_102 = arith.constant dense<0.000000e+00> : vector<64x4xf32>
    %204 = tpu.matmul %203, %180, %cst_102 {dimension_numbers = #tpu.dot_dimension_numbers<[1], [0], [0], [1], [0, 0, 1, 1], [], []>} : vector<64x128xf32>, vector<128x4xf32>, vector<64x4xf32> -> vector<64x4xf32>
    %205 = tpu.transpose %204, [1, 0] : vector<64x4xf32> -> vector<4x64xf32>
    %206 = vector.shape_cast %205 : vector<4x64xf32> to vector<4x8x8xf32>
    %207 = vector.shape_cast %8 : vector<8x8xf32> to vector<1x8x8xf32>
    %208 = vector.broadcast %207 : vector<1x8x8xf32> to vector<4x8x8xf32>
    %209 = arith.addf %206, %208 : vector<4x8x8xf32>
    %cst_103 = arith.constant dense<0xFF800000> : vector<4x8xf32>
    %210 = vector.multi_reduction <maximumf>, %209, %cst_103 [2] : vector<4x8x8xf32> to vector<4x8xf32>
    %211 = vector.shape_cast %210 : vector<4x8xf32> to vector<4x8x1xf32>
    %212 = vector.broadcast %211 : vector<4x8x1xf32> to vector<4x8x8xf32>
    %213 = arith.subf %209, %212 : vector<4x8x8xf32>
    %214 = math.exp %213 : vector<4x8x8xf32>
    %cst_104 = arith.constant dense<0.000000e+00> : vector<4x8xf32>
    %215 = vector.multi_reduction <add>, %214, %cst_104 [2] : vector<4x8x8xf32> to vector<4x8xf32>
    %216 = vector.shape_cast %215 : vector<4x8xf32> to vector<4x8x1xf32>
    %217 = tpu.reciprocal %216 {approx = true} : vector<4x8x1xf32> -> vector<4x8x1xf32>
    %218 = vector.broadcast %217 : vector<4x8x1xf32> to vector<4x8x8xf32>
    %219 = arith.mulf %214, %218 : vector<4x8x8xf32>
    %220 = vector.shape_cast %188 : vector<8x128xf32> to vector<8x4x32xf32>
    %221 = tpu.transpose %220, [1, 0, 2] : vector<8x4x32xf32> -> vector<4x8x32xf32>
    "tpu.trace_start"() <{level = 10 : i32, message = "hij,hjc->hic"}> : () -> ()
    %cst_105 = arith.constant dense<0.000000e+00> : vector<4x8x32xf32>
    %222 = tpu.matmul %219, %221, %cst_105 {dimension_numbers = #tpu.dot_dimension_numbers<[2], [1], [1], [2], [0, 0, 0, 1, 1, 2], [0], [0]>} : vector<4x8x8xf32>, vector<4x8x32xf32>, vector<4x8x32xf32> -> vector<4x8x32xf32>
    "tpu.trace_stop"() : () -> ()
    %cst_106 = arith.constant dense<0.000000e+00> : vector<8x32xf32>
    %223 = vector.multi_reduction <add>, %222, %cst_106 [0] : vector<4x8x32xf32> to vector<8x32xf32>
    %cst_107 = arith.constant 2.500000e-01 : f32
    %224 = vector.broadcast %cst_107 : f32 to vector<8x32xf32>
    %225 = arith.mulf %223, %224 : vector<8x32xf32>
    %226 = vector.broadcast %182 : vector<1x32xf32> to vector<8x32xf32>
    %227 = arith.addf %225, %226 : vector<8x32xf32>
    %228 = arith.addf %227, %172 : vector<8x32xf32>
    %cst_108 = arith.constant 5.000000e-01 : f32
    %229 = vector.broadcast %cst_108 : f32 to vector<8x32xf32>
    %230 = arith.mulf %228, %229 : vector<8x32xf32>
    %c0_109 = arith.constant 0 : index
    %c0_110 = arith.constant 0 : index
    %231 = vector.load %arg14[%c0_109, %c0_110] : memref<32x96xf32, #tpu.memory_space<vmem>>, vector<32x96xf32>
    %c0_111 = arith.constant 0 : index
    %c0_112 = arith.constant 0 : index
    %232 = vector.load %arg15[%c0_111, %c0_112] : memref<1x96xf32, #tpu.memory_space<vmem>>, vector<1x96xf32>
    %c0_113 = arith.constant 0 : index
    %c0_114 = arith.constant 0 : index
    %233 = vector.load %arg16[%c0_113, %c0_114] : memref<32x32xf32, #tpu.memory_space<vmem>>, vector<32x32xf32>
    %c0_115 = arith.constant 0 : index
    %c0_116 = arith.constant 0 : index
    %234 = vector.load %arg17[%c0_115, %c0_116] : memref<1x32xf32, #tpu.memory_space<vmem>>, vector<1x32xf32>
    %cst_117 = arith.constant dense<0.000000e+00> : vector<8x96xf32>
    %235 = tpu.matmul %230, %231, %cst_117 {dimension_numbers = #tpu.dot_dimension_numbers<[1], [0], [0], [1], [0, 0, 1, 1], [], []>} : vector<8x32xf32>, vector<32x96xf32>, vector<8x96xf32> -> vector<8x96xf32>
    %236 = vector.broadcast %232 : vector<1x96xf32> to vector<8x96xf32>
    %237 = arith.addf %235, %236 : vector<8x96xf32>
    %238 = vector.extract_strided_slice %237 {offsets = [0, 0], sizes = [8, 32], strides = [1, 1]} : vector<8x96xf32> to vector<8x32xf32>
    %239 = vector.shape_cast %238 : vector<8x32xf32> to vector<8x4x8xf32>
    %240 = vector.extract_strided_slice %237 {offsets = [0, 32], sizes = [8, 32], strides = [1, 1]} : vector<8x96xf32> to vector<8x32xf32>
    %241 = vector.shape_cast %240 : vector<8x32xf32> to vector<8x4x8xf32>
    %242 = vector.extract_strided_slice %237 {offsets = [0, 64], sizes = [8, 32], strides = [1, 1]} : vector<8x96xf32> to vector<8x32xf32>
    %243 = vector.shape_cast %242 : vector<8x32xf32> to vector<8x4x8xf32>
    "tpu.trace_start"() <{level = 10 : i32, message = "nhd,mhd->hnm"}> : () -> ()
    %cst_118 = arith.constant dense<0.000000e+00> : vector<4x8x8xf32>
    %244 = tpu.matmul %239, %241, %cst_118 {dimension_numbers = #tpu.dot_dimension_numbers<[2], [2], [0], [0], [0, 1, 0, 0, 1, 0], [1], [1]>} : vector<8x4x8xf32>, vector<8x4x8xf32>, vector<4x8x8xf32> -> vector<4x8x8xf32>
    "tpu.trace_stop"() : () -> ()
    %cst_119 = arith.constant dense<0xFF800000> : vector<4x8xf32>
    %245 = vector.multi_reduction <maximumf>, %244, %cst_119 [2] : vector<4x8x8xf32> to vector<4x8xf32>
    %246 = vector.shape_cast %245 : vector<4x8xf32> to vector<4x8x1xf32>
    %247 = vector.broadcast %246 : vector<4x8x1xf32> to vector<4x8x8xf32>
    %248 = arith.subf %244, %247 : vector<4x8x8xf32>
    %249 = math.exp %248 : vector<4x8x8xf32>
    %cst_120 = arith.constant dense<0.000000e+00> : vector<4x8xf32>
    %250 = vector.multi_reduction <add>, %249, %cst_120 [2] : vector<4x8x8xf32> to vector<4x8xf32>
    %251 = vector.shape_cast %250 : vector<4x8xf32> to vector<4x8x1xf32>
    %252 = tpu.reciprocal %251 {approx = true} : vector<4x8x1xf32> -> vector<4x8x1xf32>
    %253 = vector.broadcast %252 : vector<4x8x1xf32> to vector<4x8x8xf32>
    %254 = arith.mulf %249, %253 : vector<4x8x8xf32>
    "tpu.trace_start"() <{level = 10 : i32, message = "hnm,mhd->nhd"}> : () -> ()
    %cst_121 = arith.constant dense<0.000000e+00> : vector<4x8x8xf32>
    %255 = tpu.matmul %243, %254, %cst_121 {dimension_numbers = #tpu.dot_dimension_numbers<[0], [2], [2], [1], [0, 1, 0, 2, 1, 1], [1], [0]>} : vector<8x4x8xf32>, vector<4x8x8xf32>, vector<4x8x8xf32> -> vector<4x8x8xf32>
    %256 = tpu.transpose %255, [2, 0, 1] : vector<4x8x8xf32> -> vector<8x4x8xf32>
    "tpu.trace_stop"() : () -> ()
    %257 = vector.shape_cast %256 : vector<8x4x8xf32> to vector<8x32xf32>
    %cst_122 = arith.constant dense<0.000000e+00> : vector<8x32xf32>
    %258 = tpu.matmul %257, %233, %cst_122 {dimension_numbers = #tpu.dot_dimension_numbers<[1], [0], [0], [1], [0, 0, 1, 1], [], []>} : vector<8x32xf32>, vector<32x32xf32>, vector<8x32xf32> -> vector<8x32xf32>
    %259 = vector.broadcast %234 : vector<1x32xf32> to vector<8x32xf32>
    %260 = arith.addf %258, %259 : vector<8x32xf32>
    %261 = arith.addf %230, %260 : vector<8x32xf32>
    %cst_123 = arith.constant 5.000000e-01 : f32
    %262 = vector.broadcast %cst_123 : f32 to vector<8x32xf32>
    %263 = arith.mulf %261, %262 : vector<8x32xf32>
    %c0_124 = arith.constant 0 : index
    %c0_125 = arith.constant 0 : index
    %c0_126 = arith.constant 0 : index
    %264 = vector.load %arg18[%c0_124, %c0_125, %c0_126] : memref<1x8x32xf32, #tpu.memory_space<vmem>>, vector<1x8x32xf32>
    %265 = vector.shape_cast %264 : vector<1x8x32xf32> to vector<8x32xf32>
    %266 = vector.shape_cast %263 : vector<8x32xf32> to vector<1x8x32xf32>
    tpu.vector_store %arg18[%c0_124, %c0_125, %c0_126], %266 {strides = array<i32>} : memref<1x8x32xf32, #tpu.memory_space<vmem>>, vector<1x8x32xf32>,
    return
  }
  func.func @transform_0(%arg0: i32) -> (i32, i32, i32) {
    %c0_i32 = arith.constant 0 : i32
    %c0_i32_0 = arith.constant 0 : i32
    %c0_i32_1 = arith.constant 0 : i32
    return %arg0, %c0_i32, %c0_i32_0 : i32, i32, i32
  }
  func.func @transform_1(%arg0: i32) -> (i32, i32, i32) {
    %c0_i32 = arith.constant 0 : i32
    %c0_i32_0 = arith.constant 0 : i32
    %c0_i32_1 = arith.constant 0 : i32
    return %arg0, %c0_i32, %c0_i32_0 : i32, i32, i32
  }
  func.func @transform_2(%arg0: i32) -> (i32, i32, i32) {
    %c0_i32 = arith.constant 0 : i32
    %c0_i32_0 = arith.constant 0 : i32
    %c0_i32_1 = arith.constant 0 : i32
    return %arg0, %c0_i32, %c0_i32_0 : i32, i32, i32
  }
  func.func @transform_3(%arg0: i32) -> (i32, i32) {
    %c0_i32 = arith.constant 0 : i32
    %c0_i32_0 = arith.constant 0 : i32
    %c0_i32_1 = arith.constant 0 : i32
    return %c0_i32, %c0_i32_0 : i32, i32
  }
  func.func @transform_4(%arg0: i32) -> (i32, i32) {
    %c0_i32 = arith.constant 0 : i32
    %c0_i32_0 = arith.constant 0 : i32
    %c0_i32_1 = arith.constant 0 : i32
    return %c0_i32, %c0_i32_0 : i32, i32
  }
  func.func @transform_5(%arg0: i32) -> (i32, i32) {
    %c0_i32 = arith.constant 0 : i32
    %c0_i32_0 = arith.constant 0 : i32
    %c0_i32_1 = arith.constant 0 : i32
    return %c0_i32, %c0_i32_0 : i32, i32
  }
  func.func @transform_6(%arg0: i32) -> (i32, i32) {
    %c0_i32 = arith.constant 0 : i32
    %c0_i32_0 = arith.constant 0 : i32
    %c0_i32_1 = arith.constant 0 : i32
    return %c0_i32, %c0_i32_0 : i32, i32
  }
  func.func @transform_7(%arg0: i32) -> (i32, i32) {
    %c0_i32 = arith.constant 0 : i32
    %c0_i32_0 = arith.constant 0 : i32
    %c0_i32_1 = arith.constant 0 : i32
    return %c0_i32, %c0_i32_0 : i32, i32
  }
  func.func @transform_8(%arg0: i32) -> (i32, i32, i32) {
    %c0_i32 = arith.constant 0 : i32
    %c0_i32_0 = arith.constant 0 : i32
    %c0_i32_1 = arith.constant 0 : i32
    %c0_i32_2 = arith.constant 0 : i32
    return %c0_i32, %c0_i32_0, %c0_i32_1 : i32, i32, i32
  }
  func.func @transform_9(%arg0: i32) -> (i32, i32, i32) {
    %c0_i32 = arith.constant 0 : i32
    %c0_i32_0 = arith.constant 0 : i32
    %c0_i32_1 = arith.constant 0 : i32
    %c0_i32_2 = arith.constant 0 : i32
    return %c0_i32, %c0_i32_0, %c0_i32_1 : i32, i32, i32
  }
  func.func @transform_10(%arg0: i32) -> (i32, i32, i32) {
    %c0_i32 = arith.constant 0 : i32
    %c0_i32_0 = arith.constant 0 : i32
    %c0_i32_1 = arith.constant 0 : i32
    %c0_i32_2 = arith.constant 0 : i32
    return %c0_i32, %c0_i32_0, %c0_i32_1 : i32, i32, i32
  }
  func.func @transform_11(%arg0: i32) -> (i32, i32, i32) {
    %c0_i32 = arith.constant 0 : i32
    %c0_i32_0 = arith.constant 0 : i32
    %c0_i32_1 = arith.constant 0 : i32
    %c0_i32_2 = arith.constant 0 : i32
    return %c0_i32, %c0_i32_0, %c0_i32_1 : i32, i32, i32
  }
  func.func @transform_12(%arg0: i32) -> (i32, i32, i32) {
    %c0_i32 = arith.constant 0 : i32
    %c0_i32_0 = arith.constant 0 : i32
    %c0_i32_1 = arith.constant 0 : i32
    %c0_i32_2 = arith.constant 0 : i32
    return %c0_i32, %c0_i32_0, %c0_i32_1 : i32, i32, i32
  }
  func.func @transform_13(%arg0: i32) -> (i32, i32) {
    %c0_i32 = arith.constant 0 : i32
    %c0_i32_0 = arith.constant 0 : i32
    %c0_i32_1 = arith.constant 0 : i32
    return %c0_i32, %c0_i32_0 : i32, i32
  }
  func.func @transform_14(%arg0: i32) -> (i32, i32) {
    %c0_i32 = arith.constant 0 : i32
    %c0_i32_0 = arith.constant 0 : i32
    %c0_i32_1 = arith.constant 0 : i32
    return %c0_i32, %c0_i32_0 : i32, i32
  }
  func.func @transform_15(%arg0: i32) -> (i32, i32) {
    %c0_i32 = arith.constant 0 : i32
    %c0_i32_0 = arith.constant 0 : i32
    %c0_i32_1 = arith.constant 0 : i32
    return %c0_i32, %c0_i32_0 : i32, i32
  }
  func.func @transform_16(%arg0: i32) -> (i32, i32) {
    %c0_i32 = arith.constant 0 : i32
    %c0_i32_0 = arith.constant 0 : i32
    %c0_i32_1 = arith.constant 0 : i32
    return %c0_i32, %c0_i32_0 : i32, i32
  }
  func.func @transform_17(%arg0: i32) -> (i32, i32, i32) {
    %c0_i32 = arith.constant 0 : i32
    %c0_i32_0 = arith.constant 0 : i32
    %c0_i32_1 = arith.constant 0 : i32
    return %arg0, %c0_i32, %c0_i32_0 : i32, i32, i32
  }
}

</mosaic_0001>

<bundles_post_ra>
// kernel: tpu_custom_call.1
= control target key start
LH: loop header
LB: loop body
LE: loop exit
PB: predicated region body
PF: predicated region fallthrough
CT: control target
= control target key end

     0   :  { %s5626_s0 = inlined_call_operand.vmem [shape: f32[4,8,9], index: 0, kind: input, shape index: {}]   ;;  %s5627_s1 = inlined_call_operand.vmem [shape: f32[4,8,8], index: 1, kind: input, shape index: {}]   ;;  %s5628_s2 = inlined_call_operand.vmem [shape: f32[4,64,3], index: 2, kind: input, shape index: {}]   ;;  %s5629_s3 = inlined_call_operand.vmem [shape: f32[9,64], index: 3, kind: input, shape index: {}]   ;;  %s5630_s4 = inlined_call_operand.vmem [shape: f32[1,64], index: 4, kind: input, shape index: {}]   ;;  %s5631_s5 = inlined_call_operand.vmem [shape: f32[3,32], index: 5, kind: input, shape index: {}]   ;;  %s5632_s6 = inlined_call_operand.vmem [shape: f32[32,1], index: 6, kind: input, shape index: {}]   ;;  %s5633_s7 = inlined_call_operand.vmem [shape: f32[1,32], index: 7, kind: input, shape index: {}]   ;;  %s5634_s8 = inlined_call_operand.vmem [shape: f32[3,32,256], index: 8, kind: input, shape index: {}]   ;;  %s5635_s9 = inlined_call_operand.vmem [shape: f32[3,1,256], index: 9, kind: input, shape index: {}]   ;;  %s5636_s10 = inlined_call_operand.vmem [shape: f32[3,3,128], index: 10, kind: input, shape index: {}]   ;;  %s5637_s11 = inlined_call_operand.vmem [shape: f32[3,128,4], index: 11, kind: input, shape index: {}]   ;;  %s5638_s12 = inlined_call_operand.vmem [shape: f32[3,1,32], index: 12, kind: input, shape index: {}]   ;;  %s5639_s13 = inlined_call_operand.vmem [shape: f32[32,96], index: 13, kind: input, shape index: {}]   ;;  %s5640_s14 = inlined_call_operand.vmem [shape: f32[1,96], index: 14, kind: input, shape index: {}]   ;;  %s5641_s15 = inlined_call_operand.vmem [shape: f32[32,32], index: 15, kind: input, shape index: {}]   ;;  %s5642_s16 = inlined_call_operand.vmem [shape: f32[1,32], index: 16, kind: input, shape index: {}]   ;;  %s5643_s17 = inlined_call_operand.hbm [shape: f32[4,8,32], index: 17, kind: output, shape index: {}]  }
   0x1   :  { %5668 = sst [smem:[#allocation11_spill]] %s5626_s0 }
   0x2   :  { %5669 = sst [smem:[#allocation12_spill]] %s5627_s1 }
   0x3   :  { %5670 = sst [smem:[#allocation13_spill]] %s5628_s2 }
   0x4   :  { %5671 = sst [smem:[#allocation14_spill]] %s5629_s3 }
   0x5   :  { %5672 = sst [smem:[#allocation15_spill]] %s5630_s4 }
   0x6   :  { %5673 = sst [smem:[#allocation16_spill]] %s5631_s5 }
   0x7   :  { %5674 = sst [smem:[#allocation17_spill]] %s5632_s6 }
   0x8   :  { %5675 = sst [smem:[#allocation18_spill]] %s5633_s7 }
   0x9   :  { %22 = vsyncpa [#allocation3], 0 }
   0xa   :  { %24 = vsyncpa [#allocation3 + $0x1], 0  ;;  %s4493_s24 = smov 0   ;;  %s4495_s25 = smov 0  }
   0xb   :  { %s4497_s26 = smov 0   ;;  %s4499_s27 = smov 0  }
   0xc LB: > { %5676 = sst [smem:[#allocation5_spill]] %s4373_s24  ;;  %s4514_s28 = sadd.s32 4294967295, %s4385_s27   ;;  %s4385_s27 = sphi %s4499_s27, %s5705_s27   ;;  %s4381_s26 = sphi %s4497_s26, %s5707_s26   ;;  %s4377_s25 = sphi %s4495_s25, %s5709_s25   ;;  %s4373_s24 = sphi %s4493_s24, %s5708_s24  }
   0xd   : > { %5677 = sst [smem:[#allocation6_spill]] %s4381_s26  ;;  %s4005_s29 = sadd.s32 4294967294, %s4385_s27  }
   0xe   : > { %5678 = sst [smem:[#allocation7_spill]] %s4385_s27  ;;  %s4518_s0 = sadd.s32 1, %s4385_s27  }
   0xf   : > { %5679 = sst [smem:[#allocation8_spill]] %s4518_s0  ;;  %s409_s30 = sadd.s32 1, %s4381_s26 }
  0x10   : > { %s406_s18 = ssub.s32 %s4385_s27, %s4518_s0  ;;  %p419_p0 = scmp.ne.s32.totalorder %s4381_s26, %s4377_s25 }
  0x11   : > { %p407_p1 = scmp.eq.s32.totalorder %s406_s18, 0  ;;  %p420_p2 = scmp.eq.s32.totalorder %s4514_s28, 3 }
  0x12   : > { %p425_p3 = scmp.ne.s32.totalorder %s4377_s25, %s4373_s24  ;;  %p426_p4 = scmp.eq.s32.totalorder %s4005_s29, 3 }
  0x13   : > { %s4529_s19 = scalar_select %p407_p1, %s4381_s26, %s409_s30  }
  0x14   : > { %p4531_p5 = por %p420_p2, %p419_p0  ;;  %p4535_p6 = por %p426_p4, %p425_p3 }
  0x15   : > { %5680 = sst [smem:[#allocation9_spill]] %s4529_s19  ;;  %p4008_p7 = scmp.ge.s32.totalorder %s4385_s27, 1 }
  0x16   : > { %s5682_s20 = scalar_select %p4535_p6, 1, 0 }
  0x17   : > { %p508_p8 = scmp.lt.s32.totalorder %s4385_s27, 5 }
  0x18   : > { %5683 = sst [smem:[#allocation10_spill]] %s5682_s20 }
  0x19   : > { %p509_p9 = pnand %p4008_p7, %p508_p8 }
  0x1a   : > { %s5684_s3 = sld [smem:[#allocation14_spill]] (!%p509_p9)  ;;  %p568_p10 = scmp.lt.s32.totalorder (!%p509_p9), %s4514_s28, 3 }
  0x1b   : > { %512 = sbr.rel (%p509_p9) target bundleno = 6257 (0x1871), region = 88  ;;  %s5685_s5 = sld [smem:[#allocation16_spill]] (!%p509_p9) }
  0x1c   : > { %s5687_s2 = sld [smem:[#allocation13_spill]] (!%p509_p9)  ;;  %s5648_s23 = smov (!%p509_p9), 96  }
  0x1d   : > { %s5688_s4 = sld [smem:[#allocation15_spill]] (!%p509_p9)  ;;  %s5694_s18 = smov (!%p509_p9), 32  }
  0x1e   : > { %s5689_s6 = sld [smem:[#allocation17_spill]] (!%p509_p9)  ;;  %s565_s20 = sand.u32 (!%p509_p9), 1, %s4377_s25  }
  0x1f   : > { %s5693_s7 = sld [smem:[#allocation18_spill]] (!%p509_p9)  ;;  %s4009_s24 = sshll.u32 (!%p509_p9), %s565_s20, 3 }
  0x20   : > { %v594_v0 = vld [vmem:[%s5684_s3 + $0x8] sm:$0x1]  ;;  %vm609_vm0 = vcmask 1040384   ;;  %v593_v1 = vld [vmem:[%s5684_s3] sm:$0xff]  ;;  %vm658_vm1 = vcmask 1042432   ;;  %s4553_s19 = scalar_select %p568_p10, %s4514_s28, 3 }
  0x21   : > { %v596_v2 = vld [vmem:[%s5685_s5] sm:$0x7]  ;;  %4014 = vmatpush.msk.msra.mxu0 %vm609_vm0, %v594_v0  ;;  %vm605_vm2 = vcmask 72704   ;;  %s5686_s3 = sld [smem:[#allocation11_spill]]  ;;  %vm633_vm3 = vcmask 23552   ;;  %vm826_vm12 = vcmask 261120  }
  0x22   : > { %4016 = vmatpush.msk.msra.mxu1 %vm658_vm1, %v596_v2  ;;  %s5647_s21 = sshll.u32 %s4553_s19, 3  ;;  %s4151_s22 = sshll.u32 %s4553_s19, 6  ;;  %vm999_vm14 = vcmask 1041409   ;;  %vm1001_vm15 = vcmask 1042434   ;;  %vm1003_vm0 = vcmask 1043459  }
  0x23   : > { %628 = vmatpush.msra.mxu0 %v593_v1  ;;  %s4565_s26 = scalar_lea.vmem %s5687_s2, %s4151_s22  ;;  %v4226_v12 = vld [vmem:[%s5688_s4] ss:$0 sm:$0xff]  ;;  %s5645_s22 = smov 32  }
  0x24   : > { %v4568_v4 = vld [vmem:[%s4565_s26] sm:$0xff]  ;;  %v4573_v5 = vld [vmem:[%s4565_s26 + $0x8] sm:$0xff]  ;;  %v4578_v6 = vld [vmem:[%s4565_s26 + $0x10] sm:$0xff]  ;;  %s5692_s2 = smov 96   ;;  %s5662_s4 = smov 104  }
  0x25   : > { %4017 = vmatmul.msk.f32.vlgmr.msra.gmra.mxu1 %vm633_vm3, %v4568_v4  ;;  %v4583_v7 = vld [vmem:[%s4565_s26 + $0x18] sm:$0xff]  ;;  %v4588_v8 = vld [vmem:[%s4565_s26 + $0x20] sm:$0xff]  ;;  %v4593_v9 = vld [vmem:[%s4565_s26 + $0x28] sm:$0xff]  ;;  %s5696_s5 = smov 120   ;;  %s4148_s27 = sshll.u32 %s4514_s28, 3 }
  0x26   : > { %v4598_v10 = vld [vmem:[%s4565_s26 + $0x30] sm:$0xff]  ;;  %v4603_v11 = vld [vmem:[%s4565_s26 + $0x38] sm:$0xff]  ;;  %s3907_s28 = scalar_lea.sflag [#allocation3], %s565_s20 }
  0x27   : > { %s571_s30 = scalar_lea.vmem %s5686_s3, %s5647_s21  ;;  %s5656_s21 = smov 72  }
  0x28   : > { %v592_v3 = vld [vmem:[%s571_s30] sm:$0xff]  ;;  %s5691_s30 = sld [smem:[#allocation12_spill]] }
  0x29   : > { %4015 = vmatmul.msk.f32.vlgmr.msra.gmra.mxu0 %vm605_vm2, %v592_v3  ;;  %vm1005_vm2 = vcmask 1044484  }
  0x2d   : > { %4018 = vmatmul.msk.f32.gmra.mxu1 %vm633_vm3, %v4573_v5 }
  0x35   : > { %4019 = vmatmul.msk.f32.gmra.mxu1 %vm633_vm3, %v4578_v6 }
  0x3d   : > { %4020 = vmatmul.msk.f32.gmra.mxu1 %vm633_vm3, %v4583_v7 }
  0x45   : > { %4021 = vmatmul.msk.f32.gmra.mxu1 %vm633_vm3, %v4588_v8 }
  0x4d   : > { %4022 = vmatmul.msk.f32.gmra.mxu1 %vm633_vm3, %v4593_v9 }
  0x55   : > { %4023 = vmatmul.msk.f32.gmra.mxu1 %vm633_vm3, %v4598_v10 }
  0x5d   : > { %4024 = vmatmul.msk.f32.gmra.mxu1 %vm633_vm3, %v4603_v11 }
  0xa2   : > { %v679_v15 = vpop.f32.mrf.mxu1 }
  0xa6   : > { %v630_v13 = vpop.f32.mrf.mxu0 }
  0xa7   : > { %v4610_v14 = vadd.f32 %v4226_v12, %v630_v13 }
  0xa9   : > { %1186 = vst [vmem:[#allocation1] ss:$9 sm:$0xff] %v4610_v14  ;;  %727 = vrot.lane.b32.xlu0 %v4610_v14, %s5645_s22  ;;  %v704_v16 = vrot.slane %v4610_v14, 1  ;;  %v705_v17 = vrot.slane %v4610_v14, 2  ;;  %v706_v18 = vrot.slane %v4610_v14, 3  ;;  %v707_v19 = vrot.slane %v4610_v14, 4 }
  0xaa   : > { %v708_v20 = vrot.slane %v4610_v14, 5  ;;  %v709_v21 = vrot.slane %v4610_v14, 6  ;;  %v710_v22 = vrot.slane %v4610_v14, 7  ;;  %v682_v23 = vpop.f32.mrf.mxu1  ;;  %v711_v35 = vperm.slane %v4610_v14, 0  ;;  %v598_v14 = vld [vmem:[%s5689_s6 + $0x8] sm:$0xff] }
  0xab   : > { %1188 = vst [vmem:[#allocation1 + $0x1] ss:$9 sm:$0xff] %v704_v16  ;;  %748 = vrot.lane.b32.xlu1 %v682_v23, %s5645_s22  ;;  %v712_v33 = vperm.slane %v704_v16, 0  ;;  %v714_v37 = vperm.slane %v706_v18, 0  ;;  %v713_v47 = vperm.slane %v705_v17, 0  ;;  %v715_v55 = vperm.slane %v707_v19, 0 }
  0xac   : > { %1190 = vst [vmem:[#allocation1 + $0x2] ss:$9 sm:$0xff] %v705_v17  ;;  %v718_v31 = vperm.slane %v710_v22, 0  ;;  %v717_v61 = vperm.slane %v709_v21, 0  ;;  %v599_v23 = vld [vmem:[%s5689_s6 + $0x10] sm:$0xff] }
  0xad   : > { %1192 = vst [vmem:[#allocation1 + $0x3] ss:$9 sm:$0xff] %v706_v18 }
  0xae   : > { %1194 = vst [vmem:[#allocation1 + $0x4] ss:$9 sm:$0xff] %v707_v19 }
  0xaf   : > { %1196 = vst [vmem:[#allocation1 + $0x5] ss:$9 sm:$0xff] %v708_v20 }
  0xb0   : > { %1198 = vst [vmem:[#allocation1 + $0x6] ss:$9 sm:$0xff] %v709_v21 }
  0xb1   : > { %746 = vrot.lane.b32.xlu0 %v679_v15, %s5645_s22  ;;  %1200 = vst [vmem:[#allocation1 + $0x7] ss:$9 sm:$0xff] %v710_v22  ;;  %v716_v15 = vperm.slane %v708_v20, 0  ;;  %v600_v22 = vld [vmem:[%s5689_s6 + $0x18] sm:$0xff]  ;;  %v597_v20 = vld [vmem:[%s5689_s6] sm:$0xff]  ;;  %s5701_s6 = smov 80  }
  0xb2   : > { %v685_v24 = vpop.f32.mrf.mxu1  ;;  %855 = vmatpush.msra.mxu2 %v600_v22 }
  0xb3   : > { %750 = vrot.lane.b32.xlu1 %v685_v24, %s5645_s22 }
  0xb4   : > { %856 = vmatpush.msra.mxu2 %v599_v23 }
  0xb6   : > { %857 = vmatpush.msra.mxu2 %v598_v14 }
  0xb8   : > { %v1201_v25 = vld [vmem:[#allocation1] sm:$0xff]  ;;  %858 = vmatpush.msra.mxu2 %v597_v20 }
  0xb9   : > { %1220 = vmatpush.msra.mxu3 %v1201_v25  ;;  %v886_v25 = vlaneseq }
  0xba   : > { %v688_v26 = vpop.f32.mrf.mxu1 }
  0xbb   : > { %752 = vrot.lane.b32.xlu2 %v688_v26, %s5645_s22  ;;  %v887_v26 = vshrl.u32 %v886_v25, 7  ;;  %v4704_v23 = vand.u32 127, %v886_v25 }
  0xbd   : > { %4209 = vset.pattern.permute.xlu0 %v887_v26  ;;  %4210 = vset.pattern.permute.xlu1 %v887_v26 }
  0xbe   : > { %4208 = vset.pattern.permute.xlu2 %v887_v26 }
  0xc2   : > { %v691_v27 = vpop.f32.mrf.mxu1 }
  0xc3   : > { %754 = vrot.lane.b32.xlu2 %v691_v27, %s5645_s22  ;;  %v4389_v27 = vmov -1e+30  }
  0xca   : > { %v694_v28 = vpop.f32.mrf.mxu1 }
  0xcb   : > { %756 = vrot.lane.b32.xlu0 %v694_v28, %s5645_s22 }
  0xd2   : > { %v697_v29 = vpop.f32.mrf.mxu1 }
  0xd3   : > { %758 = vrot.lane.b32.xlu2 %v697_v29, %s5645_s22 }
  0xda   : > { %v700_v58 = vpop.f32.mrf.mxu1 }
 0x115   : > { %v753_v34 = vpop.permute.xlu2 %752 }
 0x11b   : > { %v728_v30 = vpop.permute.xlu0 %727 }
 0x11c   : > { %v4631_v32 = vadd.f32 %v728_v30, %v718_v31  ;;  %v731_v36 = vadd.f32 %v728_v30, %v712_v33  ;;  %v730_v39 = vadd.f32 %v728_v30, %v711_v35  ;;  %v733_v42 = vadd.f32 %v728_v30, %v714_v37 }
 0x11d   : > { %v749_v38 = vpop.permute.xlu1 %748  ;;  %v732_v50 = vadd.f32 %v728_v30, %v713_v47  ;;  %v755_v51 = vpop.permute.xlu2 %754  ;;  %v734_v57 = vadd.f32 %v728_v30, %v715_v55  ;;  %v736_v63 = vadd.f32 %v728_v30, %v717_v61  ;;  %v735_v16 = vadd.f32 %v728_v30, %v716_v15 }
 0x11e   : > { %v771_v40 = vadd.f32 %v749_v38, %v731_v36  ;;  %v773_v48 = vadd.f32 %v753_v34, %v733_v42 }
 0x11f   : > { %v774_v62 = vadd.f32 %v755_v51, %v734_v57 }
 0x120   : > { %v787_v44 = vmul.f32 0.2, %v771_v40  ;;  %vm779_vm4 = vcmp.gt.f32.partialorder %v771_v40, 0.0  ;;  %v789_v54 = vmul.f32 0.2, %v773_v48  ;;  %vm781_vm6 = vcmp.gt.f32.partialorder %v773_v48, 0.0 }
 0x121   : > { %v790_v2 = vmul.f32 0.2, %v774_v62  ;;  %vm782_vm9 = vcmp.gt.f32.partialorder %v774_v62, 0.0 }
 0x122   : > { %v795_v46 = vsel %vm779_vm4, %v771_v40, %v787_v44  ;;  %v797_v60 = vsel %vm781_vm6, %v773_v48, %v789_v54  ;;  %v4390_v48 = vmov 0   ;;  %vm1007_vm4 = vcmask 1045509  }
 0x123   : > { %v747_v41 = vpop.permute.xlu0 %746  ;;  %812 = vrot.lane.b32.xlu0 %v795_v46, %s5648_s23  ;;  %v798_v13 = vsel %vm782_vm9, %v774_v62, %v790_v2  ;;  %vm1011_vm6 = vcmask 1047559  }
 0x124   : > { %v770_v43 = vadd.f32 %v747_v41, %v730_v39 }
 0x125   : > { %v751_v52 = vpop.permute.xlu1 %750 }
 0x126   : > { %v786_v45 = vmul.f32 0.2, %v770_v43  ;;  %vm778_vm5 = vcmp.gt.f32.partialorder %v770_v43, 0.0  ;;  %v772_v53 = vadd.f32 %v751_v52, %v732_v50 }
 0x128   : > { %v794_v49 = vsel %vm778_vm5, %v770_v43, %v786_v45  ;;  %v788_v56 = vmul.f32 0.2, %v772_v53  ;;  %vm780_vm7 = vcmp.gt.f32.partialorder %v772_v53, 0.0  ;;  %vm1009_vm5 = vcmask 1046534  }
 0x129   : > { %810 = vrot.lane.b32.xlu1 %v794_v49, %s5648_s23 }
 0x12a   : > { %v796_v59 = vsel %vm780_vm7, %v772_v53, %v788_v56  ;;  %vm1014_vm7 = vcmask 64512  }
 0x12b   : > { %814 = vrot.lane.b32.xlu2 %v796_v59, %s5648_s23  ;;  %816 = vrot.lane.b32.xlu0 %v797_v60, %s5648_s23 }
 0x12d   : > { %v759_v0 = vpop.permute.xlu2 %758 }
 0x12e   : > { %v776_v1 = vadd.f32 %v759_v0, %v736_v63 }
 0x130   : > { %v792_v3 = vmul.f32 0.2, %v776_v1  ;;  %vm784_vm8 = vcmp.gt.f32.partialorder %v776_v1, 0.0 }
 0x131   : > { %760 = vrot.lane.b32.xlu1 %v700_v58, %s5645_s22  ;;  %s5664_s22 = smov 80  }
 0x132   : > { %v800_v12 = vsel %vm784_vm8, %v776_v1, %v792_v3 }
 0x133   : > { %822 = vrot.lane.b32.xlu0 %v800_v12, %s5648_s23 }
 0x139   : > { %818 = vrot.lane.b32.xlu1 %v798_v13, %s5648_s23 }
 0x13d   : > { %v757_v17 = vpop.permute.xlu0 %756 }
 0x13e   : > { %v775_v18 = vadd.f32 %v757_v17, %v735_v16 }
 0x140   : > { %v791_v19 = vmul.f32 0.2, %v775_v18  ;;  %vm783_vm10 = vcmp.gt.f32.partialorder %v775_v18, 0.0 }
 0x142   : > { %v799_v21 = vsel %vm783_vm10, %v775_v18, %v791_v19 }
 0x143   : > { %820 = vrot.lane.b32.xlu2 %v799_v21, %s5648_s23  ;;  %s5690_s23 = sshll.u32 %s4553_s19, 3  ;;  %s5658_s19 = smov 112  }
 0x144   : > { %s575_s0 = scalar_lea.vmem %s5691_s30, %s5690_s23  ;;  %s5660_s30 = smov 120  }
 0x145   : > { %v589_v24 = vld [vmem:[%s575_s0] sm:$0xff]  ;;  %s5654_s0 = smov 88   ;;  %s5652_s23 = smov 64  }
 0x146   : > { %vm590_vm11 = vcmp.gt.f32.partialorder %v589_v24, 0.0 }
 0x147   : > { %v4662_v28 = vsel %vm590_vm11, 0.0, %v4389_v27 }
 0x148   : > { %v892_v29 = vperm.slane %v4662_v28, 1  ;;  %v885_v35 = vperm.slane %v4662_v28, 0  ;;  %v906_v39 = vperm.slane %v4662_v28, 3  ;;  %v927_v40 = vperm.slane %v4662_v28, 6 }
 0x149   : > { %v899_v41 = vperm.slane %v4662_v28, 2  ;;  %v913_v43 = vperm.slane %v4662_v28, 4  ;;  %v934_v47 = vperm.slane %v4662_v28, 7 }
 0x14a   : > { %897 = vperm.xlu0 %4209, %v892_v29  }
 0x14b   : > { %890 = vperm.xlu2 %4208, %v885_v35  }
 0x152   : > { %932 = vperm.xlu0 %4209, %v927_v40  }
 0x153   : > { %911 = vperm.xlu2 %4208, %v906_v39  }
 0x15a   : > { %4212 = vset.pattern.permute.xlu0 %v4390_v48 }
 0x185   : > { %v815_v38 = vpop.permute.xlu2 %814 }
 0x195   : > { %v813_v31 = vpop.permute.xlu0 %812 }
 0x19b   : > { %v811_v30 = vpop.permute.xlu1 %810 }
 0x19c   : > { %4025 = vmatmul.msk.f32.vlgmr.msra.gmra.mxu2 %vm826_vm12, %v811_v30 }
 0x19d   : > { %v817_v42 = vpop.permute.xlu0 %816  ;;  %v821_v45 = vpop.permute.xlu2 %820 }
 0x1a3   : > { %v761_v33 = vpop.permute.xlu1 %760 }
 0x1a4   : > { %v777_v34 = vadd.f32 %v761_v33, %v4631_v32  ;;  %4026 = vmatmul.msk.f32.gmra.mxu2 %vm826_vm12, %v813_v31  ;;  %v920_v32 = vperm.slane %v4662_v28, 5 }
 0x1a5   : > { %v823_v46 = vpop.permute.xlu0 %822  ;;  %v891_v50 = vpop.permute.xlu2 %890 }
 0x1a6   : > { %v793_v36 = vmul.f32 0.2, %v777_v34  ;;  %vm785_vm13 = vcmp.gt.f32.partialorder %v777_v34, 0.0  ;;  %925 = vperm.xlu2 %4208, %v920_v32  }
 0x1a8   : > { %v801_v37 = vsel %vm785_vm13, %v777_v34, %v793_v36 }
 0x1a9   : > { %824 = vrot.lane.b32.xlu1 %v801_v37, %s5692_s2 }
 0x1ab   : > { %v819_v44 = vpop.permute.xlu1 %818 }
 0x1ac   : > { %4027 = vmatmul.msk.f32.gmra.mxu2 %vm826_vm12, %v815_v38 }
 0x1ad   : > { %v912_v59 = vpop.permute.xlu2 %911 }
 0x1ae   : > { %4211 = vset.pattern.permute.xlu2 %v4390_v48 }
 0x1b1   : > { %904 = vperm.xlu1 %4210, %v899_v41  }
 0x1b4   : > { %4028 = vmatmul.msk.f32.gmra.mxu2 %vm826_vm12, %v817_v42 }
 0x1b9   : > { %918 = vperm.xlu1 %4210, %v913_v43  }
 0x1bc   : > { %4029 = vmatmul.msk.f32.gmra.mxu2 %vm826_vm12, %v819_v44  ;;  %v898_v53 = vpop.permute.xlu0 %897 }
 0x1c1   : > { %939 = vperm.xlu1 %4210, %v934_v47  }
 0x1c4   : > { %4030 = vmatmul.msk.f32.gmra.mxu2 %vm826_vm12, %v821_v45  ;;  %v933_v12 = vpop.permute.xlu0 %932 }
 0x1c9   : > { %4213 = vset.pattern.permute.xlu1 %v4390_v48 }
 0x1cc   : > { %4031 = vmatmul.msk.f32.gmra.mxu2 %vm826_vm12, %v823_v46 }
 0x200   : > { %v926_v1 = vpop.permute.xlu2 %925 }
 0x21b   : > { %v825_v49 = vpop.permute.xlu1 %824 }
 0x21c   : > { %4032 = vmatmul.msk.f32.gmra.mxu2 %vm826_vm12, %v825_v49 }
 0x21f   : > { %v860_v51 = vpop.f32.mrf.mxu2 }
 0x220   : > { %v4682_v52 = vadd.f32 %v891_v50, %v860_v51 }
 0x222   : > { %966 = vperm.xlu2 %4211, %v4682_v52  }
 0x223   : > { %v905_v56 = vpop.permute.xlu1 %904 }
 0x227   : > { %v863_v54 = vpop.f32.mrf.mxu2 }
 0x228   : > { %v4685_v55 = vadd.f32 %v898_v53, %v863_v54 }
 0x22a   : > { %969 = vperm.xlu0 %4212, %v4685_v55  }
 0x22b   : > { %v919_v62 = vpop.permute.xlu1 %918 }
 0x22f   : > { %v866_v57 = vpop.f32.mrf.mxu2 }
 0x230   : > { %v4688_v58 = vadd.f32 %v905_v56, %v866_v57 }
 0x232   : > { %972 = vperm.xlu1 %4213, %v4688_v58  }
 0x233   : > { %v940_v16 = vpop.permute.xlu1 %939 }
 0x237   : > { %v869_v60 = vpop.f32.mrf.mxu2 }
 0x238   : > { %v952_v61 = vadd.f32 %v912_v59, %v869_v60 }
 0x23a   : > { %975 = vperm.xlu2 %4211, %v952_v61  }
 0x23f   : > { %v872_v63 = vpop.f32.mrf.mxu2 }
 0x240   : > { %v4691_v0 = vadd.f32 %v919_v62, %v872_v63 }
 0x242   : > { %978 = vperm.xlu1 %4213, %v4691_v0  }
 0x247   : > { %v875_v2 = vpop.f32.mrf.mxu2 }
 0x248   : > { %v4694_v3 = vadd.f32 %v926_v1, %v875_v2 }
 0x24a   : > { %981 = vperm.xlu2 %4211, %v4694_v3  }
 0x24f   : > { %v878_v13 = vpop.f32.mrf.mxu2 }
 0x250   : > { %v4697_v15 = vadd.f32 %v933_v12, %v878_v13 }
 0x252   : > { %984 = vperm.xlu0 %4212, %v4697_v15  }
 0x27c   : > { %v967_v19 = vpop.permute.xlu2 %966 }
 0x27d   : > { %v991_v26 = vperm.slane %v967_v19, %v4704_v23 }
 0x294   : > { %v976_v14 = vpop.permute.xlu2 %975 }
 0x295   : > { %v994_v25 = vperm.slane %v976_v14, %v4704_v23 }
 0x29c   : > { %v970_v22 = vpop.permute.xlu0 %969 }
 0x29d   : > { %v992_v20 = vperm.slane %v970_v22, %v4704_v23 }
 0x29f   : > { %v881_v17 = vpop.f32.mrf.mxu2  ;;  %v1000_v29 = vsel %vm999_vm14, %v992_v20, %v991_v26 }
 0x2a0   : > { %v4700_v18 = vadd.f32 %v940_v16, %v881_v17 }
 0x2a2   : > { %987 = vperm.xlu1 %4213, %v4700_v18  }
 0x2a4   : > { %v973_v21 = vpop.permute.xlu1 %972  ;;  %v982_v34 = vpop.permute.xlu2 %981 }
 0x2a5   : > { %v993_v24 = vperm.slane %v973_v21, %v4704_v23  ;;  %v996_v38 = vperm.slane %v982_v34, %v4704_v23 }
 0x2a7   : > { %v1002_v30 = vsel %vm1001_vm15, %v993_v24, %v1000_v29 }
 0x2a8   : > { %v1004_v35 = vsel %vm1003_vm0, %v994_v25, %v1002_v30 }
 0x2b4   : > { %v979_v27 = vpop.permute.xlu1 %978 }
 0x2b5   : > { %v995_v31 = vperm.slane %v979_v27, %v4704_v23 }
 0x2b7   : > { %v1006_v36 = vsel %vm1005_vm2, %v995_v31, %v1004_v35 }
 0x2b8   : > { %v1008_v41 = vsel %vm1007_vm4, %v996_v38, %v1006_v36 }
 0x2c4   : > { %v985_v33 = vpop.permute.xlu0 %984 }
 0x2c5   : > { %v997_v37 = vperm.slane %v985_v33, %v4704_v23 }
 0x2c7   : > { %v1010_v32 = vsel %vm1009_vm5, %v997_v37, %v1008_v41 }
 0x314   : > { %v988_v39 = vpop.permute.xlu1 %987 }
 0x315   : > { %v998_v40 = vperm.slane %v988_v39, %v4704_v23 }
 0x317   : > { %v1012_v42 = vsel %vm1011_vm6, %v998_v40, %v1010_v32 }
 0x318   : > { %v1015_v43 = vsel %vm1014_vm7, %v1012_v42, -inf }
 0x319   : > { %1016 = vmax.xlane.f32.xlu2 %v1015_v43 }
 0x38c   : > { %v1017_v44 = vpop.xlane.xlu2 %1016 }
 0x38d   : > { %v1020_v45 = vperm.slane %v1017_v44, 1  ;;  %v1019_v46 = vperm.slane %v1017_v44, 0  ;;  %v1022_v49 = vperm.slane %v1017_v44, 3  ;;  %v1021_v50 = vperm.slane %v1017_v44, 2 }
 0x38e   : > { %v1024_v59 = vperm.slane %v1017_v44, 5  ;;  %v1023_v62 = vperm.slane %v1017_v44, 4  ;;  %v1026_v12 = vperm.slane %v1017_v44, 7  ;;  %v1025_v13 = vperm.slane %v1017_v44, 6 }
 0x38f   : > { %v1036_v47 = vsub.f32 %v4685_v55, %v1020_v45  ;;  %v1035_v48 = vsub.f32 %v4682_v52, %v1019_v46  ;;  %v1038_v54 = vsub.f32 %v952_v61, %v1022_v49  ;;  %v1037_v56 = vsub.f32 %v4688_v58, %v1021_v50 }
 0x390   : > { %v1040_v52 = vsub.f32 %v4694_v3, %v1024_v59  ;;  %v1039_v55 = vsub.f32 %v4691_v0, %v1023_v62  ;;  %v1042_v17 = vsub.f32 %v4700_v18, %v1026_v12  ;;  %v1041_v19 = vsub.f32 %v4697_v15, %v1025_v13  ;;  %v1231_v13 = vld [vmem:[%s5634_s8 + $0x30] sm:$0xff] }
 0x391   : > { %v1045_v51 = vmul.f32 1.442695, %v1036_v47  ;;  %v1043_v53 = vmul.f32 1.442695, %v1035_v48  ;;  %v1049_v57 = vmul.f32 1.442695, %v1038_v54  ;;  %1273 = vmatpush.msrb.mxu3 %v1231_v13 }
 0x392   : > { %v1047_v60 = vmul.f32 1.442695, %v1037_v56  ;;  %v1053_v2 = vmul.f32 1.442695, %v1040_v52  ;;  %v1051_v61 = vmul.f32 1.442695, %v1039_v55 }
 0x393   : > { %4233 = vpow2.f32 %v1045_v51  ;;  %v1057_v3 = vmul.f32 1.442695, %v1042_v17  ;;  %v1055_v21 = vmul.f32 1.442695, %v1041_v19 }
 0x394   : > { %4235 = vpow2.f32 %v1043_v53 }
 0x395   : > { %4237 = vpow2.f32 %v1049_v57 }
 0x396   : > { %4239 = vpow2.f32 %v1047_v60 }
 0x397   : > { %4241 = vpow2.f32 %v1053_v2 }
 0x398   : > { %4243 = vpow2.f32 %v1051_v61 }
 0x399   : > { %v4234_v63 = vpop.eup %4233  ;;  %4245 = vpow2.f32 %v1057_v3 }
 0x39a   : > { %v4236_v1 = vpop.eup %4235  ;;  %1071 = vperm.xlu1 %4213, %v4234_v63   ;;  %4247 = vpow2.f32 %v1055_v21 }
 0x39b   : > { %1068 = vperm.xlu0 %4212, %v4236_v1   ;;  %v4727_v16 = vpop.eup %4237 }
 0x39c   : > { %v4240_v58 = vpop.eup %4239 }
 0x39d   : > { %v4242_v22 = vpop.eup %4241 }
 0x39e   : > { %v4244_v0 = vpop.eup %4243 }
 0x39f   : > { %v4246_v14 = vpop.eup %4245 }
 0x3a0   : > { %v4248_v20 = vpop.eup %4247 }
 0x3a2   : > { %1077 = vperm.xlu1 %4213, %v4727_v16  }
 0x3a3   : > { %1074 = vperm.xlu0 %4212, %v4240_v58  }
 0x3aa   : > { %1083 = vperm.xlu1 %4213, %v4242_v22  }
 0x3ab   : > { %1080 = vperm.xlu0 %4212, %v4244_v0  }
 0x3b2   : > { %1089 = vperm.xlu1 %4213, %v4246_v14  }
 0x3b3   : > { %1086 = vperm.xlu0 %4212, %v4248_v20  }
 0x40c   : > { %v1072_v24 = vpop.permute.xlu1 %1071 }
 0x40d   : > { %v1069_v26 = vpop.permute.xlu0 %1068  ;;  %v1092_v18 = vperm.slane %v1072_v24, %v4704_v23 }
 0x40e   : > { %v1091_v15 = vperm.slane %v1069_v26, %v4704_v23 }
 0x410   : > { %v1099_v33 = vsel %vm999_vm14, %v1092_v18, %v1091_v15 }
 0x414   : > { %v1078_v27 = vpop.permute.xlu1 %1077 }
 0x415   : > { %v1075_v29 = vpop.permute.xlu0 %1074  ;;  %v1094_v34 = vperm.slane %v1078_v27, %v4704_v23 }
 0x416   : > { %v1093_v30 = vperm.slane %v1075_v29, %v4704_v23 }
 0x418   : > { %v1100_v35 = vsel %vm1001_vm15, %v1093_v30, %v1099_v33 }
 0x419   : > { %v1101_v38 = vsel %vm1003_vm0, %v1094_v34, %v1100_v35 }
 0x41c   : > { %v1084_v31 = vpop.permute.xlu1 %1083 }
 0x41d   : > { %v1081_v25 = vpop.permute.xlu0 %1080  ;;  %v1096_v37 = vperm.slane %v1084_v31, %v4704_v23 }
 0x41e   : > { %v1095_v36 = vperm.slane %v1081_v25, %v4704_v23 }
 0x420   : > { %v1102_v39 = vsel %vm1005_vm2, %v1095_v36, %v1101_v38  ;;  %v1230_v38 = vld [vmem:[%s5634_s8 + $0x28] sm:$0xff] }
 0x421   : > { %v1103_v43 = vsel %vm1007_vm4, %v1096_v37, %v1102_v39  ;;  %v1229_v37 = vld [vmem:[%s5634_s8 + $0x20] sm:$0xff]  ;;  %v1228_v39 = vld [vmem:[%s5634_s8 + $0x18] sm:$0xff] }
 0x422   : > { %1274 = vmatpush.msrb.mxu3 %v1229_v37 }
 0x424   : > { %v1090_v40 = vpop.permute.xlu1 %1089 }
 0x425   : > { %v1098_v41 = vperm.slane %v1090_v40, %v4704_v23  ;;  %v1087_v32 = vpop.permute.xlu0 %1086  ;;  %v1225_v40 = vld [vmem:[%s5634_s8] sm:$0xff] }
 0x426   : > { %v1097_v42 = vperm.slane %v1087_v32, %v4704_v23  ;;  %v1234_v32 = vld [vmem:[%s5636_s10] sm:$0x7] }
 0x428   : > { %v1104_v44 = vsel %vm1009_vm5, %v1097_v42, %v1103_v43  ;;  %v4227_v42 = vld [vmem:[%s5693_s7] ss:$0 sm:$0xff] }
 0x429   : > { %v1105_v45 = vsel %vm1011_vm6, %v1098_v41, %v1104_v44  ;;  %v1226_v41 = vld [vmem:[%s5634_s8 + $0x8] sm:$0xff] }
 0x42a   : > { %v1107_v46 = vsel %vm1014_vm7, %v1105_v45, 0.0 }
 0x42b   : > { %1108 = vadd.xlane.f32.xlu0 %v1107_v46  ;;  %v1250_v46 = vld [vmem:[%s5637_s11 + $0x78] sm:$0xff] }
 0x49e   : > { %v1109_v47 = vpop.xlane.xlu0 %1108 }
 0x49f   : > { %4249 = vrcp.f32 %v1109_v47  ;;  %v1249_v47 = vld [vmem:[%s5637_s11 + $0x70] sm:$0xff] }
 0x4a5   : > { %v4250_v48 = vpop.eup %4249 }
 0x4a6   : > { %v1113_v49 = vperm.slane %v4250_v48, 1  ;;  %v1112_v50 = vperm.slane %v4250_v48, 0  ;;  %v1117_v54 = vperm.slane %v4250_v48, 5  ;;  %v1114_v56 = vperm.slane %v4250_v48, 2 }
 0x4a7   : > { %v1119_v60 = vperm.slane %v4250_v48, 7  ;;  %v1115_v62 = vperm.slane %v4250_v48, 3  ;;  %v1116_v2 = vperm.slane %v4250_v48, 4 }
 0x4a8   : > { %v1129_v51 = vmul.f32 %v4234_v63, %v1113_v49  ;;  %v1128_v53 = vmul.f32 %v4236_v1, %v1112_v50  ;;  %v1133_v57 = vmul.f32 %v4242_v22, %v1117_v54  ;;  %v1130_v59 = vmul.f32 %v4240_v58, %v1114_v56  ;;  %v1232_v58 = vld [vmem:[%s5634_s8 + $0x38] sm:$0xff]  ;;  %v1235_v54 = vld [vmem:[%s5637_s11] sm:$0xff] }
 0x4a9   : > { %v1135_v52 = vmul.f32 %v4246_v14, %v1119_v60  ;;  %v1131_v55 = vmul.f32 %v4727_v16, %v1115_v62  ;;  %v1132_v12 = vmul.f32 %v4244_v0, %v1116_v2  ;;  %v1118_v63 = vperm.slane %v4250_v48, 6  ;;  %1293 = vmatpush.msrb.mxu0 %v1232_v58  ;;  %v1244_v48 = vld [vmem:[%s5637_s11 + $0x48] sm:$0xff]  ;;  %v1242_v49 = vld [vmem:[%s5637_s11 + $0x38] sm:$0xff]  ;;  %v1233_v56 = vld [vmem:[%s5635_s9] sm:$0x3] }
 0x4aa   : > { %1151 = vperm.xlu2 %4211, %v1129_v51   ;;  %1148 = vperm.xlu1 %4213, %v1128_v53   ;;  %v1238_v50 = vld [vmem:[%s5637_s11 + $0x18] sm:$0xff]  ;;  %v1237_v51 = vld [vmem:[%s5637_s11 + $0x10] sm:$0xff]  ;;  %v1236_v53 = vld [vmem:[%s5637_s11 + $0x8] sm:$0xff]  ;;  %v1254_v60 = vperm.slane %v1233_v56, 0 }
 0x4ab   : > { %v1134_v1 = vmul.f32 %v4248_v20, %v1118_v63  ;;  %1294 = vmatpush.msrb.mxu0 %v1230_v38 }
 0x4ad   : > { %1295 = vmatpush.msrb.mxu0 %v1228_v39 }
 0x4af   : > { %1296 = vmatpush.msrb.mxu0 %v1226_v41 }
 0x4b1   : > { %1409 = vmatpush.msra.mxu0 %v1250_v46 }
 0x4b2   : > { %1163 = vperm.xlu2 %4211, %v1133_v57   ;;  %1154 = vperm.xlu1 %4213, %v1130_v59   ;;  %v1255_v57 = vperm.slane %v1233_v56, 1 }
 0x4b3   : > { %1410 = vmatpush.msra.mxu0 %v1249_v47 }
 0x4ba   : > { %1169 = vperm.xlu2 %4211, %v1135_v52   ;;  %1157 = vperm.xlu1 %4213, %v1131_v55  }
 0x4c2   : > { %1160 = vperm.xlu1 %4213, %v1132_v12  }
 0x4ca   : > { %1166 = vperm.xlu1 %4213, %v1134_v1  }
 0x504   : > { %v1152_v17 = vpop.permute.xlu2 %1151 }
 0x505   : > { %v1172_v14 = vperm.slane %v1152_v17, %v4704_v23 }
 0x50c   : > { %v1164_v3 = vpop.permute.xlu2 %1163 }
 0x50d   : > { %v1176_v30 = vperm.slane %v1164_v3, %v4704_v23 }
 0x514   : > { %v1170_v18 = vpop.permute.xlu2 %1169 }
 0x515   : > { %v1178_v33 = vperm.slane %v1170_v18, %v4704_v23 }
 0x51c   : > { %v1149_v61 = vpop.permute.xlu1 %1148 }
 0x51d   : > { %v1171_v21 = vperm.slane %v1149_v61, %v4704_v23 }
 0x51f   : > { %v1179_v26 = vsel %vm999_vm14, %v1172_v14, %v1171_v21 }
 0x524   : > { %v1155_v16 = vpop.permute.xlu1 %1154 }
 0x525   : > { %v1173_v0 = vperm.slane %v1155_v16, %v4704_v23 }
 0x527   : > { %v1180_v27 = vsel %vm1001_vm15, %v1173_v0, %v1179_v26 }
 0x52c   : > { %v1158_v19 = vpop.permute.xlu1 %1157 }
 0x52d   : > { %v1174_v20 = vperm.slane %v1158_v19, %v4704_v23 }
 0x52f   : > { %v1181_v29 = vsel %vm1003_vm0, %v1174_v20, %v1180_v27 }
 0x534   : > { %v1161_v22 = vpop.permute.xlu1 %1160 }
 0x535   : > { %v1175_v24 = vperm.slane %v1161_v22, %v4704_v23 }
 0x537   : > { %v1182_v15 = vsel %vm1005_vm2, %v1175_v24, %v1181_v29  ;;  %vm1505_vm2 = vcmask 1047556  }
 0x538   : > { %v1183_v34 = vsel %vm1007_vm4, %v1176_v30, %v1182_v15 }
 0x53c   : > { %v1167_v31 = vpop.permute.xlu1 %1166 }
 0x53d   : > { %v1177_v25 = vperm.slane %v1167_v31, %v4704_v23  ;;  %v1227_v23 = vld [vmem:[%s5634_s8 + $0x10] sm:$0xff] }
 0x53e   : > { %1275 = vmatpush.msrb.mxu3 %v1227_v23 }
 0x53f   : > { %v1184_v35 = vsel %vm1009_vm5, %v1177_v25, %v1183_v34 }
 0x540   : > { %v1185_v36 = vsel %vm1011_vm6, %v1178_v33, %v1184_v35  ;;  %1276 = vmatpush.msrb.mxu3 %v1225_v40 }
 0x541   : > { %4033 = vmatmul.msk.f32.vlgmr.msra.gmra.mxu3 %vm1014_vm7, %v1185_v36 }
 0x542   : > { %4036 = vmatpush.msk.msra.mxu3 %vm658_vm1, %v1234_v32 }
 0x5c4   : > { %v1222_v43 = vpop.f32.mrf.mxu3 }
 0x5c5   : > { %v4796_v44 = vadd.f32 %v4227_v42, %v1222_v43 }
 0x5c7   : > { %v1252_v45 = vmax.f32 %v4796_v44, 0.0 }
 0x5c9   : > { %4034 = vmatmul.msk.f32.vlgmr.msrb.gmra.mxu3 %vm826_vm12, %v1252_v45  ;;  %4035 = vmatmul.msk.f32.vlgmr.msrb.gmra.mxu0 %vm826_vm12, %v1252_v45 }
 0x5d1   : > { %4037 = vmatmul.msk.f32.vlgmr.msra.gmra.mxu3 %vm633_vm3, %v4568_v4  ;;  %v1248_v4 = vld [vmem:[%s5637_s11 + $0x68] sm:$0xff] }
 0x5d2   : > { %1411 = vmatpush.msra.mxu0 %v1248_v4 }
 0x5d9   : > { %4038 = vmatmul.msk.f32.gmra.mxu3 %vm633_vm3, %v4573_v5  ;;  %v1247_v5 = vld [vmem:[%s5637_s11 + $0x60] sm:$0xff] }
 0x5da   : > { %1412 = vmatpush.msra.mxu0 %v1247_v5 }
 0x5e1   : > { %4039 = vmatmul.msk.f32.gmra.mxu3 %vm633_vm3, %v4578_v6  ;;  %v1246_v6 = vld [vmem:[%s5637_s11 + $0x58] sm:$0xff] }
 0x5e2   : > { %1413 = vmatpush.msra.mxu0 %v1246_v6 }
 0x5e9   : > { %4040 = vmatmul.msk.f32.gmra.mxu3 %vm633_vm3, %v4583_v7  ;;  %v1245_v7 = vld [vmem:[%s5637_s11 + $0x50] sm:$0xff] }
 0x5ea   : > { %1414 = vmatpush.msra.mxu0 %v1245_v7 }
 0x5ec   : > { %1415 = vmatpush.msra.mxu0 %v1244_v48 }
 0x5f1   : > { %4041 = vmatmul.msk.f32.gmra.mxu3 %vm633_vm3, %v4588_v8  ;;  %v1243_v8 = vld [vmem:[%s5637_s11 + $0x40] sm:$0xff] }
 0x5f2   : > { %1416 = vmatpush.msra.mxu0 %v1243_v8 }
 0x5f4   : > { %1417 = vmatpush.msra.mxu0 %v1242_v49 }
 0x5f9   : > { %4042 = vmatmul.msk.f32.gmra.mxu3 %vm633_vm3, %v4593_v9  ;;  %v1241_v9 = vld [vmem:[%s5637_s11 + $0x30] sm:$0xff] }
 0x5fa   : > { %1418 = vmatpush.msra.mxu0 %v1241_v9 }
 0x601   : > { %4043 = vmatmul.msk.f32.gmra.mxu3 %vm633_vm3, %v4598_v10  ;;  %v1240_v10 = vld [vmem:[%s5637_s11 + $0x28] sm:$0xff] }
 0x602   : > { %1419 = vmatpush.msra.mxu0 %v1240_v10 }
 0x609   : > { %4044 = vmatmul.msk.f32.gmra.mxu3 %vm633_vm3, %v4603_v11  ;;  %v1239_v11 = vld [vmem:[%s5637_s11 + $0x20] sm:$0xff] }
 0x60a   : > { %1420 = vmatpush.msra.mxu0 %v1239_v11 }
 0x60c   : > { %1421 = vmatpush.msra.mxu0 %v1238_v50 }
 0x60e   : > { %1422 = vmatpush.msra.mxu0 %v1237_v51 }
 0x610   : > { %1423 = vmatpush.msra.mxu0 %v1236_v53 }
 0x612   : > { %1424 = vmatpush.msra.mxu0 %v1235_v54 }
 0x646   : > { %v1298_v59 = vpop.f32.mrf.mxu0 }
 0x647   : > { %v4868_v52 = vadd.f32 %v1298_v59, %v1255_v57 }
 0x649   : > { %v1353_v2 = vperm.slane %v4868_v52, 0  ;;  %v1346_v61 = vrot.slane %v4868_v52, 1  ;;  %v1347_v21 = vrot.slane %v4868_v52, 2  ;;  %v1348_v27 = vrot.slane %v4868_v52, 3 }
 0x64a   : > { %v1349_v33 = vrot.slane %v4868_v52, 4  ;;  %v1350_v39 = vrot.slane %v4868_v52, 5  ;;  %v1351_v46 = vrot.slane %v4868_v52, 6  ;;  %v1352_v8 = vrot.slane %v4868_v52, 7 }
 0x64b   : > { %v1354_v16 = vperm.slane %v1346_v61, 0  ;;  %v1355_v14 = vperm.slane %v1347_v21, 0  ;;  %v1356_v15 = vperm.slane %v1348_v27, 0  ;;  %v4399_v27 = vmov 1934713408  }
 0x64c   : > { %v1278_v62 = vpop.f32.mrf.mxu3  ;;  %v1357_v36 = vperm.slane %v1349_v33, 0  ;;  %v1358_v32 = vperm.slane %v1350_v39, 0  ;;  %v1359_v5 = vperm.slane %v1351_v46, 0  ;;  %v1360_v10 = vperm.slane %v1352_v8, 0 }
 0x64d   : > { %v4870_v55 = vadd.f32 %v1278_v62, %v1254_v60 }
 0x64f   : > { %v1369_v12 = vadd.f32 %v1353_v2, %v4870_v55  ;;  %v1370_v17 = vadd.f32 %v1354_v16, %v4870_v55  ;;  %v1371_v20 = vadd.f32 %v1355_v14, %v4870_v55  ;;  %v1372_v30 = vadd.f32 %v1356_v15, %v4870_v55 }
 0x650   : > { %v1373_v37 = vadd.f32 %v1357_v36, %v4870_v55  ;;  %v1374_v42 = vadd.f32 %v1358_v32, %v4870_v55  ;;  %v1375_v6 = vadd.f32 %v1359_v5, %v4870_v55  ;;  %v1376_v11 = vadd.f32 %v1360_v10, %v4870_v55 }
 0x654   : > { %v1321_v63 = vpop.f32.mrf.mxu3 }
 0x655   : > { %v1377_v1 = vadd.f32 %v1369_v12, %v1321_v63 }
 0x657   : > { %vm1385_vm8 = vcmp.gt.f32.partialorder %v1377_v1, 0.0  ;;  %v1393_v13 = vmul.f32 0.2, %v1377_v1 }
 0x659   : > { %v1401_v58 = vsel %vm1385_vm8, %v1377_v1, %v1393_v13  ;;  %v4398_v13 = vmov 1983009808  }
 0x65a   : > { %1425 = vmatmul.f32.vlgmr.msra.gmra.mxu0 %v1401_v58  ;;  %v1508_v58 = vunpack.c.l.s4 %v4398_v13 }
 0x65c   : > { %v1324_v19 = vpop.f32.mrf.mxu3  ;;  %v4898_v21 = vunpack.c.0.s8 %v1508_v58 }
 0x65d   : > { %v1378_v3 = vadd.f32 %v1370_v17, %v1324_v19 }
 0x65f   : > { %vm1386_vm9 = vcmp.gt.f32.partialorder %v1378_v3, 0.0  ;;  %v1394_v22 = vmul.f32 0.2, %v1378_v3 }
 0x661   : > { %v1402_v0 = vsel %vm1386_vm9, %v1378_v3, %v1394_v22 }
 0x662   : > { %1428 = vmatmul.f32.gmra.mxu0 %v1402_v0 }
 0x664   : > { %v1327_v24 = vpop.f32.mrf.mxu3 }
 0x665   : > { %v1379_v26 = vadd.f32 %v1371_v20, %v1327_v24 }
 0x667   : > { %vm1387_vm10 = vcmp.gt.f32.partialorder %v1379_v26, 0.0  ;;  %v1395_v29 = vmul.f32 0.2, %v1379_v26 }
 0x669   : > { %v1403_v18 = vsel %vm1387_vm10, %v1379_v26, %v1395_v29  ;;  %v1534_v29 = vunpack.c.l.s4 %v4399_v27 }
 0x66a   : > { %1431 = vmatmul.f32.gmra.mxu0 %v1403_v18 }
 0x66b   : > { %v4906_v33 = vunpack.c.0.s8 %v1534_v29 }
 0x66c   : > { %v1330_v31 = vpop.f32.mrf.mxu3 }
 0x66d   : > { %v1380_v25 = vadd.f32 %v1372_v30, %v1330_v31 }
 0x66f   : > { %vm1388_vm11 = vcmp.gt.f32.partialorder %v1380_v25, 0.0  ;;  %v1396_v34 = vmul.f32 0.2, %v1380_v25 }
 0x671   : > { %v1404_v35 = vsel %vm1388_vm11, %v1380_v25, %v1396_v34 }
 0x672   : > { %1434 = vmatmul.f32.gmra.mxu0 %v1404_v35 }
 0x674   : > { %v1333_v38 = vpop.f32.mrf.mxu3 }
 0x675   : > { %v1381_v23 = vadd.f32 %v1373_v37, %v1333_v38 }
 0x677   : > { %vm1389_vm13 = vcmp.gt.f32.partialorder %v1381_v23, 0.0  ;;  %v1397_v40 = vmul.f32 0.2, %v1381_v23 }
 0x679   : > { %v1405_v41 = vsel %vm1389_vm13, %v1381_v23, %v1397_v40 }
 0x67a   : > { %1437 = vmatmul.f32.gmra.mxu0 %v1405_v41 }
 0x67c   : > { %v1336_v43 = vpop.f32.mrf.mxu3 }
 0x67d   : > { %v1382_v45 = vadd.f32 %v1374_v42, %v1336_v43 }
 0x67f   : > { %vm1390_vm14 = vcmp.gt.f32.partialorder %v1382_v45, 0.0  ;;  %v1398_v47 = vmul.f32 0.2, %v1382_v45 }
 0x681   : > { %v1406_v4 = vsel %vm1390_vm14, %v1382_v45, %v1398_v47 }
 0x682   : > { %1440 = vmatmul.f32.gmra.mxu0 %v1406_v4 }
 0x684   : > { %v1339_v7 = vpop.f32.mrf.mxu3 }
 0x685   : > { %v1383_v48 = vadd.f32 %v1375_v6, %v1339_v7 }
 0x687   : > { %vm1391_vm15 = vcmp.gt.f32.partialorder %v1383_v48, 0.0  ;;  %v1399_v49 = vmul.f32 0.2, %v1383_v48 }
 0x689   : > { %v1407_v9 = vsel %vm1391_vm15, %v1383_v48, %v1399_v49 }
 0x68a   : > { %1443 = vmatmul.f32.gmra.mxu0 %v1407_v9 }
 0x68c   : > { %v1342_v50 = vpop.f32.mrf.mxu3 }
 0x68d   : > { %v1384_v51 = vadd.f32 %v1376_v11, %v1342_v50 }
 0x68f   : > { %vm1392_vm0 = vcmp.gt.f32.partialorder %v1384_v51, 0.0  ;;  %v1400_v53 = vmul.f32 0.2, %v1384_v51 }
 0x691   : > { %v1408_v54 = vsel %vm1392_vm0, %v1384_v51, %v1400_v53 }
 0x692   : > { %1446 = vmatmul.f32.gmra.mxu0 %v1408_v54 }
 0x6d7   : > { %v1426_v56 = vpop.f32.mrf.mxu0 }
 0x6d8   : > { %1450 = vxpose.xlu1.b32.start [1/8] (short) (narrow) %v1426_v56, 8 }
 0x6df   : > { %v1429_v57 = vpop.f32.mrf.mxu0 }
 0x6e0   : > { %1451 = vxpose.xlu1.b32.cont [2/8] (short) (narrow) %v1429_v57, 8 }
 0x6e7   : > { %v1432_v59 = vpop.f32.mrf.mxu0 }
 0x6e8   : > { %1452 = vxpose.xlu1.b32.cont [3/8] (short) (narrow) %v1432_v59, 8 }
 0x6ef   : > { %v1435_v60 = vpop.f32.mrf.mxu0 }
 0x6f0   : > { %1453 = vxpose.xlu1.b32.cont [4/8] (short) (narrow) %v1435_v60, 8 }
 0x6f7   : > { %v1438_v62 = vpop.f32.mrf.mxu0 }
 0x6f8   : > { %1454 = vxpose.xlu1.b32.cont [5/8] (short) (narrow) %v1438_v62, 8 }
 0x6ff   : > { %v1441_v52 = vpop.f32.mrf.mxu0 }
 0x700   : > { %1455 = vxpose.xlu1.b32.cont [6/8] (short) (narrow) %v1441_v52, 8 }
 0x707   : > { %v1444_v2 = vpop.f32.mrf.mxu0 }
 0x708   : > { %1456 = vxpose.xlu1.b32.cont [7/8] (short) (narrow) %v1444_v2, 8 }
 0x70f   : > { %v1447_v12 = vpop.f32.mrf.mxu0 }
 0x710   : > { %1457 = vxpose.xlu1.b32.end [8/8] (short) (narrow) %v1447_v12, 8 }
 0x77c   : > { %v1466_v63 = vpop.trf.xlu1 }
 0x77d   : > { %1483 = vrot.lane.b32.xlu0 %v1466_v63, %s5660_s30  ;;  %1489 = vrot.lane.b32.xlu2 %v1466_v63, %s5662_s4  ;;  %s5699_s30 = smov 88   ;;  %s5700_s4 = smov 64  }
 0x785   : > { %1495 = vrot.lane.b32.xlu0 %v1466_v63, %s5654_s0  ;;  %1486 = vrot.lane.b32.xlu2 %v1466_v63, %s5658_s19  ;;  %s5697_s0 = smov 112  }
 0x78d   : > { %1492 = vrot.lane.b32.xlu0 %v1466_v63, %s5692_s2  ;;  %1501 = vrot.lane.b32.xlu2 %v1466_v63, %s5656_s21  ;;  %s5698_s21 = smov 72  }
 0x795   : > { %1498 = vrot.lane.b32.xlu2 %v1466_v63, %s5664_s22 }
 0x79d   : > { %1613 = vrot.lane.b32.xlu2 %v4870_v55, %s5652_s23  ;;  %s5695_s23 = smov 104  }
 0x7d7   : > { %v1490_v1 = vpop.permute.xlu2 %1489 }
 0x7d8   : > { %v1511_v17 = vrot.slane %v1490_v1, 4 }
 0x7df   : > { %v1487_v61 = vpop.permute.xlu2 %1486 }
 0x7e0   : > { %v1504_v22 = vrot.slane %v1487_v61, 4 }
 0x7e2   : > { %v1506_v20 = vsel %vm1505_vm2, %v1504_v22, %v1466_v63 }
 0x7e3   : > { %v1510_v15 = vperm.slane %v1506_v20, %v4898_v21 }
 0x7e5   : > { %v1531_v35 = vrot.slane %v1510_v15, 4 }
 0x7e7   : > { %v1502_v19 = vpop.permute.xlu2 %1501 }
 0x7e8   : > { %v1523_v24 = vrot.slane %v1502_v19, 4 }
 0x7ef   : > { %v1484_v16 = vpop.permute.xlu0 %1483  ;;  %v1499_v30 = vpop.permute.xlu2 %1498 }
 0x7f0   : > { %v1512_v3 = vsel %vm1505_vm2, %v1511_v17, %v1484_v16  ;;  %v1517_v34 = vrot.slane %v1499_v30, 4 }
 0x7f1   : > { %v1516_v0 = vperm.slane %v1512_v3, %v4898_v21 }
 0x7f3   : > { %v1529_v26 = vrot.slane %v1516_v0, 4  ;;  %v1532_v23 = vsel %vm1505_vm2, %v1516_v0, %v1531_v35 }
 0x7f4   : > { %v1540_v42 = vperm.slane %v1532_v23, %v4906_v33 }
 0x7f5   : > { %v1530_v31 = vsel %vm1505_vm2, %v1529_v26, %v1510_v15 }
 0x7f6   : > { %v1536_v38 = vperm.slane %v1530_v31, %v4906_v33  ;;  %v1559_v48 = vrot.slane %v1540_v42, 4 }
 0x7f7   : > { %v1496_v14 = vpop.permute.xlu0 %1495  ;;  %v1614_v57 = vpop.permute.xlu2 %1613 }
 0x7f8   : > { %v1524_v18 = vsel %vm1505_vm2, %v1523_v24, %v1496_v14  ;;  %v1555_v45 = vrot.slane %v1536_v38, 4  ;;  %v1621_v24 = vrot.slane %v4870_v55, 4  ;;  %v1619_v26 = vrot.slane %v1614_v57, 4 }
 0x7f9   : > { %v1528_v25 = vperm.slane %v1524_v18, %v4898_v21 }
 0x7fa   : > { %v1622_v29 = vsel %vm1505_vm2, %v1614_v57, %v1621_v24  ;;  %v1620_v15 = vsel %vm1505_vm2, %v1619_v26, %v4870_v55 }
 0x7fb   : > { %v1541_v39 = vrot.slane %v1528_v25, 4  ;;  %v1630_v30 = vperm.slane %v1622_v29, %v4898_v21 }
 0x7ff   : > { %v1493_v36 = vpop.permute.xlu0 %1492 }
 0x800   : > { %v1518_v37 = vsel %vm1505_vm2, %v1517_v34, %v1493_v36 }
 0x801   : > { %v1522_v40 = vperm.slane %v1518_v37, %v4898_v21  ;;  %v1657_v37 = vrot.slane %v1630_v30, 4 }
 0x803   : > { %v1542_v41 = vsel %vm1505_vm2, %v1541_v39, %v1522_v40  ;;  %v1543_v32 = vrot.slane %v1522_v40, 4 }
 0x804   : > { %v1548_v43 = vperm.slane %v1542_v41, %v4906_v33 }
 0x805   : > { %v1544_v46 = vsel %vm1505_vm2, %v1528_v25, %v1543_v32  ;;  %v1626_v25 = vperm.slane %v1620_v15, %v4898_v21 }
 0x806   : > { %v1556_v47 = vsel %vm1505_vm2, %v1548_v43, %v1555_v45  ;;  %v1553_v4 = vrot.slane %v1548_v43, 4  ;;  %v1552_v5 = vperm.slane %v1544_v46, %v4906_v33 }
 0x807   : > { %v1562_v6 = vadd.f32 %v1556_v47, %v4662_v28  ;;  %v1645_v39 = vrot.slane %v1626_v25, 4 }
 0x808   : > { %v1554_v7 = vsel %vm1505_vm2, %v1553_v4, %v1536_v38  ;;  %v1557_v8 = vrot.slane %v1552_v5, 4  ;;  %v1560_v10 = vsel %vm1505_vm2, %v1552_v5, %v1559_v48 }
 0x809   : > { %v1568_v49 = vsel %vm1014_vm7, %v1562_v6, -inf  ;;  %v1561_v9 = vadd.f32 %v1554_v7, %v4662_v28  ;;  %v1564_v51 = vadd.f32 %v1560_v10, %v4662_v28 }
 0x80a   : > { %1569 = vmax.xlane.f32.xlu2 %v1568_v49  ;;  %v1558_v50 = vsel %vm1505_vm2, %v1557_v8, %v1540_v42 }
 0x80b   : > { %v1565_v11 = vsel %vm1014_vm7, %v1561_v9, -inf  ;;  %v1563_v53 = vadd.f32 %v1558_v50, %v4662_v28  ;;  %v1574_v54 = vsel %vm1014_vm7, %v1564_v51, -inf }
 0x80c   : > { %1566 = vmax.xlane.f32.xlu0 %v1565_v11 }
 0x80d   : > { %v1571_v56 = vsel %vm1014_vm7, %v1563_v53, -inf }
 0x812   : > { %1575 = vmax.xlane.f32.xlu2 %v1574_v54 }
 0x814   : > { %1572 = vmax.xlane.f32.xlu0 %v1571_v56 }
 0x828   : > { %1616 = vrot.lane.b32.xlu0 %v4870_v55, %s5694_s18 }
 0x82a   : > { %1610 = vrot.lane.b32.xlu2 %v4870_v55, %s5692_s2 }
 0x87d   : > { %v1570_v59 = vpop.xlane.xlu2 %1569 }
 0x87e   : > { %v1578_v60 = vsub.f32 %v1562_v6, %v1570_v59 }
 0x87f   : > { %v1567_v62 = vpop.xlane.xlu0 %1566 }
 0x880   : > { %v1583_v52 = vmul.f32 1.442695, %v1578_v60  ;;  %v1577_v2 = vsub.f32 %v1561_v9, %v1567_v62 }
 0x882   : > { %4251 = vpow2.f32 %v1583_v52  ;;  %v1581_v12 = vmul.f32 1.442695, %v1577_v2 }
 0x884   : > { %4253 = vpow2.f32 %v1581_v12 }
 0x885   : > { %v1576_v63 = vpop.xlane.xlu2 %1575 }
 0x886   : > { %v1580_v1 = vsub.f32 %v1564_v51, %v1576_v63 }
 0x887   : > { %v1573_v61 = vpop.xlane.xlu0 %1572 }
 0x888   : > { %v4933_v13 = vpop.eup %4251  ;;  %v1587_v58 = vmul.f32 1.442695, %v1580_v1  ;;  %v1579_v16 = vsub.f32 %v1563_v53, %v1573_v61 }
 0x889   : > { %v1592_v17 = vsel %vm1014_vm7, %v4933_v13, 0.0 }
 0x88a   : > { %v4937_v19 = vpop.eup %4253  ;;  %4255 = vpow2.f32 %v1587_v58  ;;  %v1585_v3 = vmul.f32 1.442695, %v1579_v16  ;;  %1593 = vadd.xlane.f32.xlu0 %v1592_v17 }
 0x88b   : > { %v1589_v22 = vsel %vm1014_vm7, %v4937_v19, 0.0 }
 0x88c   : > { %4257 = vpow2.f32 %v1585_v3  ;;  %1590 = vadd.xlane.f32.xlu1 %v1589_v22 }
 0x88d   : > { %v1611_v18 = vpop.permute.xlu2 %1610 }
 0x88e   : > { %v1633_v31 = vrot.slane %v1611_v18, 4 }
 0x890   : > { %v4941_v0 = vpop.eup %4255 }
 0x891   : > { %v1598_v14 = vsel %vm1014_vm7, %v4941_v0, 0.0 }
 0x892   : > { %v4945_v20 = vpop.eup %4257  ;;  %1599 = vadd.xlane.f32.xlu2 %v1598_v14 }
 0x893   : > { %v1595_v27 = vsel %vm1014_vm7, %v4945_v20, 0.0 }
 0x894   : > { %1596 = vadd.xlane.f32.xlu0 %v1595_v27 }
 0x89a   : > { %v1617_v34 = vpop.permute.xlu0 %1616 }
 0x89b   : > { %v1631_v35 = vrot.slane %v1617_v34, 4  ;;  %v1634_v36 = vsel %vm1505_vm2, %v1617_v34, %v1633_v31 }
 0x89c   : > { %v1642_v38 = vperm.slane %v1634_v36, %v4898_v21 }
 0x89d   : > { %v1632_v23 = vsel %vm1505_vm2, %v1631_v35, %v1611_v18 }
 0x89e   : > { %v1638_v40 = vperm.slane %v1632_v23, %v4898_v21  ;;  %v1655_v41 = vrot.slane %v1642_v38, 4  ;;  %v1658_v55 = vsel %vm1505_vm2, %v1642_v38, %v1657_v37  ;;  %v4058_v23 = vld [vmem:[%s5636_s10 + $0x4] sm:$0x7] }
 0x89f   : > { %v1666_v32 = vperm.slane %v1658_v55, %v4906_v33 }
 0x8a0   : > { %v1643_v42 = vrot.slane %v1638_v40, 4  ;;  %v1646_v43 = vsel %vm1505_vm2, %v1638_v40, %v1645_v39  ;;  %v1656_v45 = vsel %vm1505_vm2, %v1655_v41, %v1630_v30 }
 0x8a1   : > { %v1654_v46 = vperm.slane %v1646_v43, %v4906_v33  ;;  %v1662_v47 = vperm.slane %v1656_v45, %v4906_v33  ;;  %v1673_v4 = vrot.slane %v1666_v32, 4  ;;  %v5009_v43 = vld [vmem:[%s4565_s26 + $0x8] sm:$0xff]  ;;  %v5024_v45 = vld [vmem:[%s4565_s26 + $0x20] sm:$0xff] }
 0x8a2   : > { %v1644_v5 = vsel %vm1505_vm2, %v1643_v42, %v1626_v25 }
 0x8a3   : > { %v1650_v6 = vperm.slane %v1644_v5, %v4906_v33  ;;  %v1669_v7 = vrot.slane %v1654_v46, 4  ;;  %v1671_v48 = vrot.slane %v1662_v47, 4  ;;  %v1674_v8 = vsel %vm1505_vm2, 0.0, %v1673_v4  ;;  %v5029_v46 = vld [vmem:[%s4565_s26 + $0x28] sm:$0xff]  ;;  %v4055_v5 = vld [vmem:[%s5634_s8 + $0x70] sm:$0xff] }
 0x8a4   : > { %v1686_v49 = vsel %vm1505_vm2, %v1673_v4, %v1662_v47  ;;  %v1691_v9 = vrot.slane %v1674_v8, 4  ;;  %v5034_v47 = vld [vmem:[%s4565_s26 + $0x30] sm:$0xff]  ;;  %v5039_v4 = vld [vmem:[%s4565_s26 + $0x38] sm:$0xff] }
 0x8a5   : > { %v1667_v10 = vrot.slane %v1650_v6, 4  ;;  %v1670_v11 = vsel %vm1505_vm2, 0.0, %v1669_v7  ;;  %v1672_v50 = vsel %vm1505_vm2, 0.0, %v1671_v48  ;;  %v1675_v51 = vsel %vm1505_vm2, %v1669_v7, %v1650_v6  ;;  %v4056_v6 = vld [vmem:[%s5634_s8 + $0x78] sm:$0xff]  ;;  %v4053_v7 = vld [vmem:[%s5634_s8 + $0x60] sm:$0xff]  ;;  %v4054_v48 = vld [vmem:[%s5634_s8 + $0x68] sm:$0xff] }
 0x8a6   : > { %v1680_v53 = vrot.slane %v1670_v11, 4  ;;  %v1679_v54 = vperm.slane %v1675_v51, %v4898_v21  ;;  %v1690_v56 = vperm.slane %v1686_v49, %v4898_v21  ;;  %v1692_v57 = vsel %vm1505_vm2, %v1691_v9, %v1672_v50  ;;  %1908 = vmatpush.msrb.mxu3 %v4056_v6  ;;  %v4051_v8 = vld [vmem:[%s5634_s8 + $0x50] sm:$0xff]  ;;  %v4052_v49 = vld [vmem:[%s5634_s8 + $0x58] sm:$0xff]  ;;  %v4049_v9 = vld [vmem:[%s5634_s8 + $0x40] sm:$0xff] }
 0x8a7   : > { %v1668_v59 = vsel %vm1505_vm2, 0.0, %v1667_v10  ;;  %v1696_v60 = vperm.slane %v1692_v57, %v4898_v21  ;;  %v4050_v10 = vld [vmem:[%s5634_s8 + $0x48] sm:$0xff] }
 0x8a8   : > { %v1681_v62 = vsel %vm1505_vm2, %v1680_v53, %v1668_v59  ;;  %v1699_v52 = vrot.slane %v1679_v54, 4  ;;  %v1711_v2 = vrot.slane %v1690_v56, 4  ;;  %1909 = vmatpush.msrb.mxu3 %v4054_v48 }
 0x8a9   : > { %v1685_v12 = vperm.slane %v1681_v62, %v4898_v21  ;;  %v1709_v63 = vrot.slane %v1696_v60, 4  ;;  %v4074_v62 = vld [vmem:[%s5637_s11 + $0xf8] sm:$0xff] }
 0x8aa   : > { %v1712_v1 = vsel %vm1505_vm2, %v1696_v60, %v1711_v2  ;;  %1910 = vmatpush.msrb.mxu3 %v4052_v49  ;;  %2024 = vmatpush.msrb.mxu0 %v4074_v62 }
 0x8ab   : > { %v1697_v61 = vrot.slane %v1685_v12, 4  ;;  %v1710_v58 = vsel %vm1505_vm2, %v1709_v63, %v1690_v56  ;;  %v1700_v16 = vsel %vm1505_vm2, %v1685_v12, %v1699_v52  ;;  %v1720_v17 = vperm.slane %v1712_v1, %v4906_v33  ;;  %v4073_v52 = vld [vmem:[%s5637_s11 + $0xf0] sm:$0xff]  ;;  %v4228_v63 = vld [vmem:[%s5638_s12] ss:$0 sm:$0xff] }
 0x8ac   : > { %v1716_v3 = vperm.slane %v1710_v58, %v4906_v33  ;;  %v1708_v22 = vperm.slane %v1700_v16, %v4906_v33  ;;  %1911 = vmatpush.msrb.mxu3 %v4050_v10  ;;  %2025 = vmatpush.msrb.mxu0 %v4073_v52  ;;  %v4072_v16 = vld [vmem:[%s5637_s11 + $0xe8] sm:$0xff] }
 0x8ad   : > { %v1698_v14 = vsel %vm1505_vm2, %v1697_v61, %v1679_v54  ;;  %v1725_v24 = vrot.slane %v1720_v17, 4 }
 0x8ae   : > { %v1704_v26 = vperm.slane %v1698_v14, %v4906_v33  ;;  %v1721_v27 = vrot.slane %v1716_v3, 4  ;;  %v1727_v29 = vrot.slane %v1708_v22, 4  ;;  %2026 = vmatpush.msrb.mxu0 %v4072_v16 }
 0x8af   : > { %v1726_v30 = vsel %vm1505_vm2, %v1725_v24, %v1708_v22  ;;  %v4070_v22 = vld [vmem:[%s5637_s11 + $0xd8] sm:$0xff]  ;;  %v4068_v24 = vld [vmem:[%s5637_s11 + $0xc8] sm:$0xff] }
 0x8b0   : > { %v1722_v18 = vsel %vm1505_vm2, %v1721_v27, %v1704_v26  ;;  %v1723_v15 = vrot.slane %v1704_v26, 4  ;;  %v1728_v25 = vsel %vm1505_vm2, %v1720_v17, %v1727_v29  ;;  %v4071_v17 = vld [vmem:[%s5637_s11 + $0xe0] sm:$0xff]  ;;  %v4066_v27 = vld [vmem:[%s5637_s11 + $0xb8] sm:$0xff]  ;;  %v4065_v29 = vld [vmem:[%s5637_s11 + $0xb0] sm:$0xff] }
 0x8b1   : > { %1747 = vmatpush.msrb.mxu1 %v1722_v18  ;;  %2027 = vmatpush.msrb.mxu0 %v4071_v17  ;;  %v4067_v26 = vld [vmem:[%s5637_s11 + $0xc0] sm:$0xff]  ;;  %v4064_v18 = vld [vmem:[%s5637_s11 + $0xa8] sm:$0xff] }
 0x8b2   : > { %v1724_v31 = vsel %vm1505_vm2, %v1716_v3, %v1723_v15  ;;  %v4063_v15 = vld [vmem:[%s5637_s11 + $0xa0] sm:$0xff] }
 0x8b3   : > { %1793 = vmatpush.msra.mxu1 %v1726_v30  ;;  %1770 = vmatpush.msrb.mxu2 %v1724_v31  ;;  %v4062_v30 = vld [vmem:[%s5637_s11 + $0x98] sm:$0xff]  ;;  %v4061_v31 = vld [vmem:[%s5637_s11 + $0x90] sm:$0xff] }
 0x8b4   : > { %2028 = vmatpush.msrb.mxu0 %v4070_v22 }
 0x8b5   : > { %1816 = vmatpush.msra.mxu2 %v1728_v25  ;;  %v4060_v25 = vld [vmem:[%s5637_s11 + $0x88] sm:$0xff] }
 0x8fd   : > { %v1594_v34 = vpop.xlane.xlu0 %1593 }
 0x8fe   : > { %4259 = vrcp.f32 %v1594_v34  ;;  %v4059_v34 = vld [vmem:[%s5637_s11 + $0x80] sm:$0xff] }
 0x8ff   : > { %v1591_v35 = vpop.xlane.xlu1 %1590 }
 0x900   : > { %4261 = vrcp.f32 %v1591_v35 }
 0x904   : > { %v4260_v36 = vpop.eup %4259 }
 0x905   : > { %v1600_v37 = vpop.xlane.xlu2 %1599  ;;  %v1606_v38 = vmul.f32 %v4260_v36, %v4933_v13 }
 0x906   : > { %v4262_v39 = vpop.eup %4261  ;;  %4263 = vrcp.f32 %v1600_v37  ;;  %v4057_v37 = vld [vmem:[%s5635_s9 + $0x2] sm:$0x3] }
 0x907   : > { %v1597_v40 = vpop.xlane.xlu0 %1596  ;;  %4046 = vmatmul.msk.f32.vlgmr.msrb.gmra.mxu2 %vm1014_vm7, %v1606_v38  ;;  %v1605_v41 = vmul.f32 %v4262_v39, %v4937_v19  ;;  %v5004_v19 = vld [vmem:[%s4565_s26] sm:$0xff]  ;;  %v1870_v38 = vperm.slane %v4057_v37, 1 }
 0x908   : > { %4265 = vrcp.f32 %v1597_v40  ;;  %4078 = vmatpush.msk.msrb.mxu2 %vm658_vm1, %v4058_v23  ;;  %v1869_v23 = vperm.slane %v4057_v37, 0 }
 0x909   : > { %4045 = vmatmul.msk.f32.vlgmr.msrb.gmra.mxu1 %vm1014_vm7, %v1605_v41 }
 0x90a   : > { %1888 = vmatpush.msrb.mxu1 %v4055_v5 }
 0x90c   : > { %v4264_v13 = vpop.eup %4263  ;;  %1889 = vmatpush.msrb.mxu1 %v4053_v7 }
 0x90d   : > { %v1608_v55 = vmul.f32 %v4264_v13, %v4941_v0  ;;  %v5014_v0 = vld [vmem:[%s4565_s26 + $0x10] sm:$0xff] }
 0x90e   : > { %v4266_v32 = vpop.eup %4265  ;;  %1890 = vmatpush.msrb.mxu1 %v4051_v8 }
 0x90f   : > { %v1607_v42 = vmul.f32 %v4266_v32, %v4945_v20  ;;  %4048 = vmatmul.msk.f32.vlgmr.msra.gmra.mxu2 %vm1014_vm7, %v1608_v55  ;;  %v5019_v20 = vld [vmem:[%s4565_s26 + $0x18] sm:$0xff] }
 0x910   : > { %1891 = vmatpush.msrb.mxu1 %v4049_v9 }
 0x911   : > { %4047 = vmatmul.msk.f32.vlgmr.msra.gmra.mxu1 %vm1014_vm7, %v1607_v42 }
 0x917   : > { %4079 = vmatmul.msk.f32.vlgmr.msrb.gmra.mxu2 %vm633_vm3, %v5004_v19 }
 0x91f   : > { %4080 = vmatmul.msk.f32.gmra.mxu2 %vm633_vm3, %v5009_v43 }
 0x927   : > { %4081 = vmatmul.msk.f32.gmra.mxu2 %vm633_vm3, %v5014_v0 }
 0x92f   : > { %4082 = vmatmul.msk.f32.gmra.mxu2 %vm633_vm3, %v5019_v20 }
 0x937   : > { %4083 = vmatmul.msk.f32.gmra.mxu2 %vm633_vm3, %v5024_v45 }
 0x93f   : > { %4084 = vmatmul.msk.f32.gmra.mxu2 %vm633_vm3, %v5029_v46 }
 0x947   : > { %4085 = vmatmul.msk.f32.gmra.mxu2 %vm633_vm3, %v5034_v47 }
 0x94f   : > { %4086 = vmatmul.msk.f32.gmra.mxu2 %vm633_vm3, %v5039_v4 }
 0x986   : > { %v1749_v11 = vpop.f32.mrf.mxu1 }
 0x987   : > { %v1821_v54 = vsel %vm826_vm12, %v1749_v11, 0.0 }
 0x98a   : > { %v1772_v50 = vpop.f32.mrf.mxu2 }
 0x98b   : > { %v1822_v51 = vsel %vm826_vm12, %v1772_v50, 0.0 }
 0x98c   : > { %v1823_v57 = vadd.f32 %v1822_v51, %v1821_v54 }
 0x98e   : > { %v1795_v53 = vpop.f32.mrf.mxu1 }
 0x98f   : > { %v1824_v56 = vsel %vm826_vm12, %v1795_v53, 0.0 }
 0x990   : > { %v1825_v59 = vadd.f32 %v1824_v56, %v1823_v57 }
 0x992   : > { %v1818_v60 = vpop.f32.mrf.mxu2 }
 0x993   : > { %v1826_v2 = vsel %vm826_vm12, %v1818_v60, 0.0 }
 0x994   : > { %v1827_v12 = vadd.f32 %v1826_v2, %v1825_v59 }
 0x996   : > { %v1828_v1 = vmul.f32 0.25, %v1827_v12 }
 0x998   : > { %v1832_v61 = vadd.f32 %v4228_v63, %v1828_v1 }
 0x99a   : > { %v1833_v58 = vadd.f32 %v1832_v61, %v4796_v44  ;;  %v4069_v44 = vld [vmem:[%s5637_s11 + $0xd0] sm:$0xff]  ;;  %v1936_v35 = vpop.f32.mrf.mxu2 }
 0x99b   : > { %2029 = vmatpush.msrb.mxu0 %v4069_v44 }
 0x99c   : > { %v5087_v3 = vmul.f32 0.5, %v1833_v58 }
 0x99d   : > { %2030 = vmatpush.msrb.mxu0 %v4068_v24 }
 0x99e   : > { %v1867_v14 = vmax.f32 %v5087_v3, 0.0 }
 0x99f   : > { %2031 = vmatpush.msrb.mxu0 %v4067_v26 }
 0x9a0   : > { %4076 = vmatmul.msk.f32.vlgmr.msrb.gmra.mxu1 %vm826_vm12, %v1867_v14  ;;  %4077 = vmatmul.msk.f32.vlgmr.msrb.gmra.mxu3 %vm826_vm12, %v1867_v14 }
 0x9a1   : > { %2032 = vmatpush.msrb.mxu0 %v4066_v27 }
 0x9a2   : > { %v1939_v36 = vpop.f32.mrf.mxu2 }
 0x9a3   : > { %2033 = vmatpush.msrb.mxu0 %v4065_v29 }
 0x9a5   : > { %2034 = vmatpush.msrb.mxu0 %v4064_v18 }
 0x9a7   : > { %2035 = vmatpush.msrb.mxu0 %v4063_v15 }
 0x9a9   : > { %2036 = vmatpush.msrb.mxu0 %v4062_v30 }
 0x9aa   : > { %v1942_v6 = vpop.f32.mrf.mxu2 }
 0x9ab   : > { %2037 = vmatpush.msrb.mxu0 %v4061_v31 }
 0x9ad   : > { %2038 = vmatpush.msrb.mxu0 %v4060_v25 }
 0x9af   : > { %2039 = vmatpush.msrb.mxu0 %v4059_v34 }
 0x9b2   : > { %v1945_v54 = vpop.f32.mrf.mxu2 }
 0x9ba   : > { %v1948_v2 = vpop.f32.mrf.mxu2 }
 0x9c2   : > { %v1951_v44 = vpop.f32.mrf.mxu2 }
 0x9ca   : > { %v1954_v30 = vpop.f32.mrf.mxu2 }
 0xa1d   : > { %v1893_v39 = vpop.f32.mrf.mxu1 }
 0xa1e   : > { %v5131_v13 = vadd.f32 %v1893_v39, %v1869_v23  ;;  %v1957_v39 = vpop.f32.mrf.mxu2 }
 0xa23   : > { %v1913_v40 = vpop.f32.mrf.mxu3 }
 0xa24   : > { %v1914_v41 = vadd.f32 %v1913_v40, %v1870_v38 }
 0xa26   : > { %v1968_v55 = vperm.slane %v1914_v41, 0  ;;  %v1961_v32 = vrot.slane %v1914_v41, 1  ;;  %v1962_v8 = vrot.slane %v1914_v41, 2  ;;  %v1963_v53 = vrot.slane %v1914_v41, 3 }
 0xa27   : > { %v1964_v52 = vrot.slane %v1914_v41, 4  ;;  %v1965_v16 = vrot.slane %v1914_v41, 5  ;;  %v1966_v24 = vrot.slane %v1914_v41, 6  ;;  %v1967_v25 = vrot.slane %v1914_v41, 7 }
 0xa28   : > { %v1984_v42 = vadd.f32 %v1968_v55, %v5131_v13  ;;  %v1969_v5 = vperm.slane %v1961_v32, 0  ;;  %v1970_v11 = vperm.slane %v1962_v8, 0  ;;  %v1971_v59 = vperm.slane %v1963_v53, 0 }
 0xa29   : > { %v1972_v1 = vperm.slane %v1964_v52, 0  ;;  %v1973_v14 = vperm.slane %v1965_v16, 0  ;;  %v1974_v29 = vperm.slane %v1966_v24, 0 }
 0xa2a   : > { %v1992_v7 = vadd.f32 %v1984_v42, %v1936_v35  ;;  %v1985_v48 = vadd.f32 %v1969_v5, %v5131_v13  ;;  %v1986_v51 = vadd.f32 %v1970_v11, %v5131_v13  ;;  %v1987_v62 = vadd.f32 %v1971_v59, %v5131_v13 }
 0xa2b   : > { %v1988_v58 = vadd.f32 %v1972_v1, %v5131_v13  ;;  %v1989_v27 = vadd.f32 %v1973_v14, %v5131_v13  ;;  %v1990_v31 = vadd.f32 %v1974_v29, %v5131_v13 }
 0xa2c   : > { %vm2000_vm4 = vcmp.gt.f32.partialorder %v1992_v7, 0.0  ;;  %v2008_v49 = vmul.f32 0.2, %v1992_v7  ;;  %v1993_v10 = vadd.f32 %v1985_v48, %v1939_v36  ;;  %v1994_v57 = vadd.f32 %v1986_v51, %v1942_v6 }
 0xa2d   : > { %v1995_v63 = vadd.f32 %v1987_v62, %v1945_v54  ;;  %v1996_v22 = vadd.f32 %v1988_v58, %v1948_v2  ;;  %v1997_v15 = vadd.f32 %v1989_v27, %v1951_v44  ;;  %v1998_v35 = vadd.f32 %v1990_v31, %v1954_v30 }
 0xa2e   : > { %v2016_v9 = vsel %vm2000_vm4, %v1992_v7, %v2008_v49  ;;  %v2009_v50 = vmul.f32 0.2, %v1993_v10  ;;  %vm2001_vm5 = vcmp.gt.f32.partialorder %v1993_v10, 0.0  ;;  %v2010_v60 = vmul.f32 0.2, %v1994_v57 }
 0xa2f   : > { %2040 = vmatmul.f32.vlgmr.msrb.gmra.mxu0 %v2016_v9  ;;  %vm2002_vm6 = vcmp.gt.f32.partialorder %v1994_v57, 0.0  ;;  %v2011_v61 = vmul.f32 0.2, %v1995_v63  ;;  %vm2003_vm8 = vcmp.gt.f32.partialorder %v1995_v63, 0.0  ;;  %v2012_v26 = vmul.f32 0.2, %v1996_v22 }
 0xa30   : > { %v2017_v56 = vsel %vm2001_vm5, %v1993_v10, %v2009_v50  ;;  %v2018_v12 = vsel %vm2002_vm6, %v1994_v57, %v2010_v60  ;;  %vm2004_vm9 = vcmp.gt.f32.partialorder %v1996_v22, 0.0  ;;  %v2013_v34 = vmul.f32 0.2, %v1997_v15 }
 0xa31   : > { %v2019_v17 = vsel %vm2003_vm8, %v1995_v63, %v2011_v61  ;;  %v2020_v18 = vsel %vm2004_vm9, %v1996_v22, %v2012_v26  ;;  %vm2005_vm10 = vcmp.gt.f32.partialorder %v1997_v15, 0.0  ;;  %v1975_v36 = vperm.slane %v1967_v25, 0 }
 0xa32   : > { %v2021_v37 = vsel %vm2005_vm10, %v1997_v15, %v2013_v34  ;;  %v2014_v23 = vmul.f32 0.2, %v1998_v35  ;;  %vm2006_vm11 = vcmp.gt.f32.partialorder %v1998_v35, 0.0  ;;  %vm3873_vm8 = vcmask 130048  }
 0xa33   : > { %v1991_v38 = vadd.f32 %v1975_v36, %v5131_v13  ;;  %vm3875_vm9 = vcmask 195584  }
 0xa34   : > { %v2022_v55 = vsel %vm2006_vm11, %v1998_v35, %v2014_v23 }
 0xa35   : > { %v1999_v40 = vadd.f32 %v1991_v38, %v1957_v39 }
 0xa37   : > { %2043 = vmatmul.f32.gmra.mxu0 %v2017_v56  ;;  %v2015_v32 = vmul.f32 0.2, %v1999_v40  ;;  %vm2007_vm13 = vcmp.gt.f32.partialorder %v1999_v40, 0.0 }
 0xa39   : > { %v2023_v42 = vsel %vm2007_vm13, %v1999_v40, %v2015_v32 }
 0xa3f   : > { %2046 = vmatmul.f32.gmra.mxu0 %v2018_v12 }
 0xa47   : > { %2049 = vmatmul.f32.gmra.mxu0 %v2019_v17 }
 0xa4f   : > { %2052 = vmatmul.f32.gmra.mxu0 %v2020_v18 }
 0xa57   : > { %2055 = vmatmul.f32.gmra.mxu0 %v2021_v37 }
 0xa5f   : > { %2058 = vmatmul.f32.gmra.mxu0 %v2022_v55 }
 0xa67   : > { %2061 = vmatmul.f32.gmra.mxu0 %v2023_v42 }
 0xaac   : > { %v2041_v5 = vpop.f32.mrf.mxu0 }
 0xaad   : > { %2065 = vxpose.xlu2.b32.start [1/8] (short) (narrow) %v2041_v5, 8 }
 0xab4   : > { %v2044_v41 = vpop.f32.mrf.mxu0 }
 0xab5   : > { %2066 = vxpose.xlu2.b32.cont [2/8] (short) (narrow) %v2044_v41, 8 }
 0xabc   : > { %v2047_v6 = vpop.f32.mrf.mxu0 }
 0xabd   : > { %2067 = vxpose.xlu2.b32.cont [3/8] (short) (narrow) %v2047_v6, 8 }
 0xac4   : > { %v2050_v7 = vpop.f32.mrf.mxu0 }
 0xac5   : > { %2068 = vxpose.xlu2.b32.cont [4/8] (short) (narrow) %v2050_v7, 8 }
 0xacc   : > { %v2053_v48 = vpop.f32.mrf.mxu0 }
 0xacd   : > { %2069 = vxpose.xlu2.b32.cont [5/8] (short) (narrow) %v2053_v48, 8 }
 0xad4   : > { %v2056_v8 = vpop.f32.mrf.mxu0 }
 0xad5   : > { %2070 = vxpose.xlu2.b32.cont [6/8] (short) (narrow) %v2056_v8, 8 }
 0xadc   : > { %v2059_v49 = vpop.f32.mrf.mxu0 }
 0xadd   : > { %2071 = vxpose.xlu2.b32.cont [7/8] (short) (narrow) %v2059_v49, 8 }
 0xae4   : > { %v2062_v9 = vpop.f32.mrf.mxu0 }
 0xae5   : > { %2072 = vxpose.xlu2.b32.end [8/8] (short) (narrow) %v2062_v9, 8 }
 0xb46   : > { %v2081_v10 = vpop.trf.xlu2 }
 0xb47   : > { %2113 = vrot.lane.b32.xlu1 %v2081_v10, %s5664_s22  ;;  %2104 = vrot.lane.b32.xlu0 %v2081_v10, %s5695_s23 }
 0xb4f   : > { %2098 = vrot.lane.b32.xlu0 %v2081_v10, %s5696_s5 }
 0xb57   : > { %2101 = vrot.lane.b32.xlu0 %v2081_v10, %s5697_s0 }
 0xb5f   : > { %2116 = vrot.lane.b32.xlu0 %v2081_v10, %s5698_s21 }
 0xb67   : > { %2110 = vrot.lane.b32.xlu0 %v2081_v10, %s5699_s30 }
 0xb6f   : > { %2107 = vrot.lane.b32.xlu0 %v2081_v10, %s5692_s2 }
 0xbb9   : > { %v2105_v11 = vpop.permute.xlu0 %2104  ;;  %v2114_v63 = vpop.permute.xlu1 %2113 }
 0xbba   : > { %v2125_v56 = vrot.slane %v2105_v11, 4  ;;  %v2131_v17 = vrot.slane %v2114_v63, 4 }
 0xbc1   : > { %v2099_v50 = vpop.permute.xlu0 %2098 }
 0xbc2   : > { %v2126_v57 = vsel %vm1505_vm2, %v2125_v56, %v2099_v50 }
 0xbc3   : > { %v2130_v60 = vperm.slane %v2126_v57, %v4898_v21 }
 0xbc5   : > { %v2143_v1 = vrot.slane %v2130_v60, 4 }
 0xbc9   : > { %v2102_v51 = vpop.permute.xlu0 %2101 }
 0xbca   : > { %v2119_v54 = vrot.slane %v2102_v51, 4 }
 0xbcc   : > { %v2120_v59 = vsel %vm1505_vm2, %v2119_v54, %v2081_v10 }
 0xbcd   : > { %v2124_v62 = vperm.slane %v2120_v59, %v4898_v21 }
 0xbcf   : > { %v2145_v61 = vrot.slane %v2124_v62, 4  ;;  %v2144_v58 = vsel %vm1505_vm2, %v2143_v1, %v2124_v62 }
 0xbd0   : > { %v2150_v24 = vperm.slane %v2144_v58, %v4906_v33 }
 0xbd1   : > { %v2117_v53 = vpop.permute.xlu0 %2116  ;;  %v2146_v14 = vsel %vm1505_vm2, %v2130_v60, %v2145_v61 }
 0xbd2   : > { %v2137_v2 = vrot.slane %v2117_v53, 4  ;;  %v2154_v29 = vperm.slane %v2146_v14, %v4906_v33  ;;  %v2169_v31 = vrot.slane %v2150_v24, 4 }
 0xbd4   : > { %v2173_v36 = vrot.slane %v2154_v29, 4 }
 0xbd9   : > { %v2111_v52 = vpop.permute.xlu0 %2110 }
 0xbda   : > { %v2138_v12 = vsel %vm1505_vm2, %v2137_v2, %v2111_v52 }
 0xbdb   : > { %v2142_v16 = vperm.slane %v2138_v12, %v4898_v21 }
 0xbdd   : > { %v2155_v26 = vrot.slane %v2142_v16, 4 }
 0xbe1   : > { %v2108_v22 = vpop.permute.xlu0 %2107 }
 0xbe2   : > { %v2132_v44 = vsel %vm1505_vm2, %v2131_v17, %v2108_v22  ;;  %v2235_v17 = vrot.slane %v5131_v13, 4 }
 0xbe3   : > { %v2136_v27 = vperm.slane %v2132_v44, %v4898_v21 }
 0xbe5   : > { %v2156_v18 = vsel %vm1505_vm2, %v2155_v26, %v2136_v27  ;;  %v2157_v15 = vrot.slane %v2136_v27, 4 }
 0xbe6   : > { %v2162_v30 = vperm.slane %v2156_v18, %v4906_v33 }
 0xbe7   : > { %v2158_v25 = vsel %vm1505_vm2, %v2142_v16, %v2157_v15 }
 0xbe8   : > { %v2170_v34 = vsel %vm1505_vm2, %v2162_v30, %v2169_v31  ;;  %v2166_v35 = vperm.slane %v2158_v25, %v4906_v33  ;;  %v2167_v37 = vrot.slane %v2162_v30, 4 }
 0xbe9   : > { %v2176_v38 = vadd.f32 %v2170_v34, %v4662_v28 }
 0xbea   : > { %v2174_v23 = vsel %vm1505_vm2, %v2166_v35, %v2173_v36  ;;  %v2168_v39 = vsel %vm1505_vm2, %v2167_v37, %v2150_v24  ;;  %v2171_v41 = vrot.slane %v2166_v35, 4 }
 0xbeb   : > { %v2182_v40 = vsel %vm1014_vm7, %v2176_v38, -inf  ;;  %v2178_v55 = vadd.f32 %v2174_v23, %v4662_v28  ;;  %v2175_v32 = vadd.f32 %v2168_v39, %v4662_v28 }
 0xbec   : > { %2183 = vmax.xlane.f32.xlu0 %v2182_v40  ;;  %v2172_v6 = vsel %vm1505_vm2, %v2171_v41, %v2154_v29 }
 0xbed   : > { %v2188_v42 = vsel %vm1014_vm7, %v2178_v55, -inf  ;;  %v2179_v5 = vsel %vm1014_vm7, %v2175_v32, -inf  ;;  %v2177_v7 = vadd.f32 %v2172_v6, %v4662_v28 }
 0xbee   : > { %2189 = vmax.xlane.f32.xlu2 %v2188_v42  ;;  %2180 = vmax.xlane.f32.xlu1 %v2179_v5 }
 0xbef   : > { %v2185_v48 = vsel %vm1014_vm7, %v2177_v7, -inf }
 0xc00   : > { %2227 = vrot.lane.b32.xlu0 %v5131_v13, %s5700_s4 }
 0xc07   : > { %2230 = vrot.lane.b32.xlu1 %v5131_v13, %s5694_s18 }
 0xc2a   : > { %2186 = vmax.xlane.f32.xlu0 %v2185_v48 }
 0xc3e   : > { %2224 = vrot.lane.b32.xlu0 %v5131_v13, %s5692_s2 }
 0xc5f   : > { %v2184_v8 = vpop.xlane.xlu0 %2183 }
 0xc60   : > { %v2192_v49 = vsub.f32 %v2176_v38, %v2184_v8 }
 0xc61   : > { %v2190_v9 = vpop.xlane.xlu2 %2189  ;;  %v2181_v10 = vpop.xlane.xlu1 %2180 }
 0xc62   : > { %v2197_v11 = vmul.f32 1.442695, %v2192_v49  ;;  %v2194_v50 = vsub.f32 %v2178_v55, %v2190_v9  ;;  %v2191_v51 = vsub.f32 %v2175_v32, %v2181_v10 }
 0xc64   : > { %4267 = vpow2.f32 %v2197_v11  ;;  %v2195_v53 = vmul.f32 1.442695, %v2191_v51  ;;  %v2201_v54 = vmul.f32 1.442695, %v2194_v50 }
 0xc66   : > { %4269 = vpow2.f32 %v2195_v53 }
 0xc67   : > { %4271 = vpow2.f32 %v2201_v54 }
 0xc6a   : > { %v5182_v56 = vpop.eup %4267 }
 0xc6b   : > { %v2206_v57 = vsel %vm1014_vm7, %v5182_v56, 0.0 }
 0xc6c   : > { %2207 = vadd.xlane.f32.xlu0 %v2206_v57  ;;  %v5186_v59 = vpop.eup %4269 }
 0xc6d   : > { %v2203_v60 = vsel %vm1014_vm7, %v5186_v59, 0.0  ;;  %v5190_v62 = vpop.eup %4271 }
 0xc6e   : > { %2204 = vadd.xlane.f32.xlu1 %v2203_v60  ;;  %v2212_v52 = vsel %vm1014_vm7, %v5190_v62, 0.0 }
 0xc72   : > { %v2228_v2 = vpop.permute.xlu0 %2227 }
 0xc73   : > { %v2233_v61 = vrot.slane %v2228_v2, 4  ;;  %v2236_v44 = vsel %vm1505_vm2, %v2228_v2, %v2235_v17 }
 0xc74   : > { %2213 = vadd.xlane.f32.xlu0 %v2212_v52  ;;  %v2244_v27 = vperm.slane %v2236_v44, %v4898_v21 }
 0xc75   : > { %v2234_v22 = vsel %vm1505_vm2, %v2233_v61, %v5131_v13 }
 0xc76   : > { %v2240_v24 = vperm.slane %v2234_v22, %v4898_v21  ;;  %v2271_v34 = vrot.slane %v2244_v27, 4 }
 0xc78   : > { %v2259_v30 = vrot.slane %v2240_v24, 4 }
 0xc79   : > { %v2231_v14 = vpop.permute.xlu1 %2230 }
 0xc7a   : > { %v2245_v26 = vrot.slane %v2231_v14, 4 }
 0xc9d   : > { %v2187_v12 = vpop.xlane.xlu0 %2186 }
 0xc9e   : > { %v2193_v63 = vsub.f32 %v2177_v7, %v2187_v12 }
 0xca0   : > { %v2199_v1 = vmul.f32 1.442695, %v2193_v63 }
 0xca2   : > { %4273 = vpow2.f32 %v2199_v1 }
 0xca8   : > { %v5194_v58 = vpop.eup %4273 }
 0xca9   : > { %v2209_v16 = vsel %vm1014_vm7, %v5194_v58, 0.0 }
 0xcaa   : > { %2210 = vadd.xlane.f32.xlu1 %v2209_v16 }
 0xcb0   : > { %v2225_v29 = vpop.permute.xlu0 %2224 }
 0xcb1   : > { %v2246_v18 = vsel %vm1505_vm2, %v2245_v26, %v2225_v29  ;;  %v2247_v15 = vrot.slane %v2225_v29, 4 }
 0xcb2   : > { %v2252_v31 = vperm.slane %v2246_v18, %v4898_v21 }
 0xcb3   : > { %v2248_v25 = vsel %vm1505_vm2, %v2231_v14, %v2247_v15 }
 0xcb4   : > { %v2256_v13 = vperm.slane %v2248_v25, %v4898_v21  ;;  %v2257_v35 = vrot.slane %v2252_v31, 4  ;;  %v2260_v36 = vsel %vm1505_vm2, %v2252_v31, %v2259_v30 }
 0xcb5   : > { %v2268_v37 = vperm.slane %v2260_v36, %v4906_v33 }
 0xcb6   : > { %v2258_v38 = vsel %vm1505_vm2, %v2257_v35, %v2240_v24  ;;  %v2269_v23 = vrot.slane %v2256_v13, 4  ;;  %v2272_v39 = vsel %vm1505_vm2, %v2256_v13, %v2271_v34 }
 0xcb7   : > { %v2264_v40 = vperm.slane %v2258_v38, %v4906_v33  ;;  %v2280_v55 = vperm.slane %v2272_v39, %v4906_v33  ;;  %v2283_v32 = vrot.slane %v2268_v37, 4 }
 0xcb8   : > { %v2270_v42 = vsel %vm1505_vm2, %v2269_v23, %v2244_v27 }
 0xcb9   : > { %v2276_v5 = vperm.slane %v2270_v42, %v4906_v33  ;;  %v2281_v41 = vrot.slane %v2264_v40, 4  ;;  %v2284_v6 = vsel %vm1505_vm2, 0.0, %v2283_v32  ;;  %v2287_v7 = vrot.slane %v2280_v55, 4 }
 0xcba   : > { %v2289_v48 = vsel %vm1505_vm2, %v2283_v32, %v2264_v40  ;;  %v2294_v8 = vrot.slane %v2284_v6, 4  ;;  %v4093_v6 = vld [vmem:[%s5634_s8 + $0x90] sm:$0xff] }
 0xcbb   : > { %v2282_v49 = vsel %vm1505_vm2, 0.0, %v2281_v41  ;;  %v2285_v9 = vrot.slane %v2276_v5, 4  ;;  %v2288_v10 = vsel %vm1505_vm2, 0.0, %v2287_v7  ;;  %v2293_v11 = vperm.slane %v2289_v48, %v4898_v21  ;;  %v4091_v48 = vld [vmem:[%s5634_s8 + $0x80] sm:$0xff] }
 0xcbc   : > { %v2295_v50 = vsel %vm1505_vm2, %v2294_v8, %v2282_v49  ;;  %v2305_v51 = vrot.slane %v2288_v10, 4  ;;  %v2300_v53 = vsel %vm1505_vm2, %v2287_v7, %v2276_v5  ;;  %v4094_v7 = vld [vmem:[%s5634_s8 + $0x98] sm:$0xff]  ;;  %v4092_v8 = vld [vmem:[%s5634_s8 + $0x88] sm:$0xff] }
 0xcbd   : > { %v2299_v54 = vperm.slane %v2295_v50, %v4898_v21  ;;  %v2286_v57 = vsel %vm1505_vm2, 0.0, %v2285_v9  ;;  %v2304_v60 = vperm.slane %v2300_v53, %v4898_v21  ;;  %v2313_v52 = vrot.slane %v2293_v11, 4  ;;  %v4100_v49 = vld [vmem:[%s5636_s10 + $0x8] sm:$0x7] }
 0xcbe   : > { %v2306_v2 = vsel %vm1505_vm2, %v2305_v51, %v2286_v57 }
 0xcbf   : > { %v2310_v12 = vperm.slane %v2306_v2, %v4898_v21  ;;  %v2311_v63 = vrot.slane %v2299_v54, 4  ;;  %v2314_v1 = vsel %vm1505_vm2, %v2299_v54, %v2313_v52  ;;  %v2325_v61 = vrot.slane %v2304_v60, 4 }
 0xcc0   : > { %v2322_v16 = vperm.slane %v2314_v1, %v4906_v33 }
 0xcc1   : > { %v2312_v17 = vsel %vm1505_vm2, %v2311_v63, %v2293_v11  ;;  %v2323_v22 = vrot.slane %v2310_v12, 4  ;;  %v2326_v14 = vsel %vm1505_vm2, %v2310_v12, %v2325_v61  ;;  %v4229_v12 = vld [vmem:[%s5638_s12 + $0x1] ss:$0 sm:$0xff] }
 0xcc2   : > { %v2318_v44 = vperm.slane %v2312_v17, %v4906_v33  ;;  %v2334_v24 = vperm.slane %v2326_v14, %v4906_v33  ;;  %v2341_v27 = vrot.slane %v2322_v16, 4  ;;  %v4110_v14 = vld [vmem:[%s5637_s11 + $0x148] sm:$0xff] }
 0xcc3   : > { %v2324_v26 = vsel %vm1505_vm2, %v2323_v22, %v2304_v60  ;;  %v4115_v22 = vld [vmem:[%s5637_s11 + $0x170] sm:$0xff] }
 0xcc4   : > { %v2330_v29 = vperm.slane %v2324_v26, %v4906_v33  ;;  %v2337_v18 = vrot.slane %v2318_v44, 4  ;;  %v2339_v15 = vrot.slane %v2334_v24, 4  ;;  %v2342_v25 = vsel %vm1505_vm2, %v2334_v24, %v2341_v27  ;;  %v4107_v24 = vld [vmem:[%s5637_s11 + $0x130] sm:$0xff]  ;;  %v4102_v27 = vld [vmem:[%s5637_s11 + $0x108] sm:$0xff] }
 0xcc5   : > { %v4103_v26 = vld [vmem:[%s5637_s11 + $0x110] sm:$0xff] }
 0xcc6   : > { %v2338_v30 = vsel %vm1505_vm2, %v2330_v29, %v2337_v18  ;;  %v2335_v31 = vrot.slane %v2330_v29, 4  ;;  %v2340_v13 = vsel %vm1505_vm2, %v2339_v15, %v2322_v16  ;;  %v4101_v29 = vld [vmem:[%s5637_s11 + $0x100] sm:$0xff] }
 0xcc7   : > { %2384 = vmatpush.msra.mxu3 %v2338_v30  ;;  %v4099_v15 = vld [vmem:[%s5635_s9 + $0x4] sm:$0x3] }
 0xcc8   : > { %v2336_v34 = vsel %vm1505_vm2, %v2335_v31, %v2318_v44  ;;  %v4108_v44 = vld [vmem:[%s5637_s11 + $0x138] sm:$0xff]  ;;  %v2484_v30 = vperm.slane %v4099_v15, 1  ;;  %v2483_v31 = vperm.slane %v4099_v15, 0 }
 0xcc9   : > { %2430 = vmatpush.msrb.mxu3 %v2342_v25  ;;  %2361 = vmatpush.msra.mxu1 %v2336_v34 }
 0xccb   : > { %2407 = vmatpush.msrb.mxu1 %v2340_v13 }
 0xcdf   : > { %v2208_v35 = vpop.xlane.xlu0 %2207 }
 0xce0   : > { %4275 = vrcp.f32 %v2208_v35 }
 0xce1   : > { %v2205_v36 = vpop.xlane.xlu1 %2204 }
 0xce2   : > { %4277 = vrcp.f32 %v2205_v36 }
 0xce6   : > { %v4276_v37 = vpop.eup %4275 }
 0xce7   : > { %v2220_v38 = vmul.f32 %v4276_v37, %v5182_v56  ;;  %v2214_v23 = vpop.xlane.xlu0 %2213  ;;  %v4097_v56 = vld [vmem:[%s5634_s8 + $0xb0] sm:$0xff] }
 0xce8   : > { %4279 = vrcp.f32 %v2214_v23  ;;  %v4278_v39 = vpop.eup %4277 }
 0xce9   : > { %4088 = vmatmul.msk.f32.vlgmr.msra.gmra.mxu3 %vm1014_vm7, %v2220_v38  ;;  %v2219_v40 = vmul.f32 %v4278_v39, %v5186_v59  ;;  %v4098_v59 = vld [vmem:[%s5634_s8 + $0xb8] sm:$0xff] }
 0xcea   : > { %2522 = vmatpush.msra.mxu3 %v4098_v59 }
 0xceb   : > { %4087 = vmatmul.msk.f32.vlgmr.msra.gmra.mxu1 %vm1014_vm7, %v2219_v40 }
 0xcec   : > { %2502 = vmatpush.msra.mxu1 %v4097_v56 }
 0xcee   : > { %v4280_v55 = vpop.eup %4279 }
 0xcef   : > { %v2222_v32 = vmul.f32 %v4280_v55, %v5190_v62  ;;  %v4095_v62 = vld [vmem:[%s5634_s8 + $0xa0] sm:$0xff] }
 0xcf0   : > { %2503 = vmatpush.msra.mxu1 %v4095_v62 }
 0xcf1   : > { %4090 = vmatmul.msk.f32.vlgmr.msrb.gmra.mxu3 %vm1014_vm7, %v2222_v32 }
 0xcf2   : > { %2504 = vmatpush.msra.mxu1 %v4093_v6 }
 0xcf4   : > { %2505 = vmatpush.msra.mxu1 %v4091_v48 }
 0xd1d   : > { %v2211_v42 = vpop.xlane.xlu1 %2210 }
 0xd1e   : > { %4281 = vrcp.f32 %v2211_v42 }
 0xd24   : > { %v4282_v5 = vpop.eup %4281 }
 0xd25   : > { %v2221_v41 = vmul.f32 %v4282_v5, %v5194_v58  ;;  %v4096_v58 = vld [vmem:[%s5634_s8 + $0xa8] sm:$0xff] }
 0xd26   : > { %2523 = vmatpush.msra.mxu3 %v4096_v58 }
 0xd27   : > { %4089 = vmatmul.msk.f32.vlgmr.msrb.gmra.mxu1 %vm1014_vm7, %v2221_v41 }
 0xd28   : > { %2524 = vmatpush.msra.mxu3 %v4094_v7  ;;  %4120 = vmatpush.msk.msrb.mxu1 %vm658_vm1, %v4100_v49 }
 0xd2a   : > { %2525 = vmatpush.msra.mxu3 %v4092_v8 }
 0xd68   : > { %v2363_v10 = vpop.f32.mrf.mxu1 }
 0xd69   : > { %v2435_v50 = vsel %vm826_vm12, %v2363_v10, 0.0 }
 0xd6c   : > { %v2386_v9 = vpop.f32.mrf.mxu3 }
 0xd6d   : > { %v2436_v11 = vsel %vm826_vm12, %v2386_v9, 0.0 }
 0xd6e   : > { %v2437_v51 = vadd.f32 %v2436_v11, %v2435_v50 }
 0xd74   : > { %v2432_v53 = vpop.f32.mrf.mxu3 }
 0xd75   : > { %v2440_v52 = vsel %vm826_vm12, %v2432_v53, 0.0 }
 0xda4   : > { %v2409_v54 = vpop.f32.mrf.mxu1 }
 0xda5   : > { %v2438_v57 = vsel %vm826_vm12, %v2409_v54, 0.0 }
 0xda6   : > { %v2439_v60 = vadd.f32 %v2438_v57, %v2437_v51 }
 0xda8   : > { %v2441_v2 = vadd.f32 %v2440_v52, %v2439_v60 }
 0xdaa   : > { %v2442_v63 = vmul.f32 0.25, %v2441_v2 }
 0xdac   : > { %v2446_v1 = vadd.f32 %v4229_v12, %v2442_v63 }
 0xdae   : > { %v2447_v61 = vadd.f32 %v2446_v1, %v5087_v3  ;;  %v4116_v3 = vld [vmem:[%s5637_s11 + $0x178] sm:$0xff] }
 0xdaf   : > { %2638 = vmatpush.msrb.mxu3 %v4116_v3 }
 0xdb0   : > { %v5284_v16 = vmul.f32 0.5, %v2447_v61 }
 0xdb1   : > { %2639 = vmatpush.msrb.mxu3 %v4115_v22 }
 0xdb2   : > { %v2481_v17 = vmax.f32 %v5284_v16, 0.0 }
 0xdb4   : > { %4118 = vmatmul.msk.f32.vlgmr.msra.gmra.mxu1 %vm826_vm12, %v2481_v17  ;;  %4119 = vmatmul.msk.f32.vlgmr.msra.gmra.mxu3 %vm826_vm12, %v2481_v17 }
 0xdbc   : > { %4121 = vmatmul.msk.f32.vlgmr.msrb.gmra.mxu1 %vm633_vm3, %v5004_v19  ;;  %v4114_v19 = vld [vmem:[%s5637_s11 + $0x168] sm:$0xff] }
 0xdbd   : > { %2640 = vmatpush.msrb.mxu3 %v4114_v19 }
 0xdc4   : > { %4122 = vmatmul.msk.f32.gmra.mxu1 %vm633_vm3, %v5009_v43  ;;  %v4113_v43 = vld [vmem:[%s5637_s11 + $0x160] sm:$0xff] }
 0xdc5   : > { %2641 = vmatpush.msrb.mxu3 %v4113_v43 }
 0xdcc   : > { %4123 = vmatmul.msk.f32.gmra.mxu1 %vm633_vm3, %v5014_v0  ;;  %v4112_v0 = vld [vmem:[%s5637_s11 + $0x158] sm:$0xff] }
 0xdcd   : > { %2642 = vmatpush.msrb.mxu3 %v4112_v0 }
 0xdd4   : > { %4124 = vmatmul.msk.f32.gmra.mxu1 %vm633_vm3, %v5019_v20  ;;  %v4111_v20 = vld [vmem:[%s5637_s11 + $0x150] sm:$0xff] }
 0xdd5   : > { %2643 = vmatpush.msrb.mxu3 %v4111_v20 }
 0xdd7   : > { %2644 = vmatpush.msrb.mxu3 %v4110_v14 }
 0xddc   : > { %4125 = vmatmul.msk.f32.gmra.mxu1 %vm633_vm3, %v5024_v45  ;;  %v4109_v45 = vld [vmem:[%s5637_s11 + $0x140] sm:$0xff] }
 0xddd   : > { %2645 = vmatpush.msrb.mxu3 %v4109_v45 }
 0xddf   : > { %2646 = vmatpush.msrb.mxu3 %v4108_v44 }
 0xde1   : > { %2647 = vmatpush.msrb.mxu3 %v4107_v24 }
 0xde4   : > { %4126 = vmatmul.msk.f32.gmra.mxu1 %vm633_vm3, %v5029_v46  ;;  %v4106_v46 = vld [vmem:[%s5637_s11 + $0x128] sm:$0xff] }
 0xde5   : > { %2648 = vmatpush.msrb.mxu3 %v4106_v46 }
 0xdec   : > { %4127 = vmatmul.msk.f32.gmra.mxu1 %vm633_vm3, %v5034_v47  ;;  %v4105_v47 = vld [vmem:[%s5637_s11 + $0x120] sm:$0xff] }
 0xded   : > { %2649 = vmatpush.msrb.mxu3 %v4105_v47 }
 0xdf4   : > { %4128 = vmatmul.msk.f32.gmra.mxu1 %vm633_vm3, %v5039_v4  ;;  %v4104_v4 = vld [vmem:[%s5637_s11 + $0x118] sm:$0xff] }
 0xdf5   : > { %2650 = vmatpush.msrb.mxu3 %v4104_v4 }
 0xdf7   : > { %2651 = vmatpush.msrb.mxu3 %v4103_v26 }
 0xdf9   : > { %2652 = vmatpush.msrb.mxu3 %v4102_v27 }
 0xdfb   : > { %2653 = vmatpush.msrb.mxu3 %v4101_v29 }
 0xe31   : > { %v2507_v18 = vpop.f32.mrf.mxu1 }
 0xe32   : > { %v5356_v35 = vadd.f32 %v2507_v18, %v2483_v31 }
 0xe37   : > { %v2527_v25 = vpop.f32.mrf.mxu3 }
 0xe38   : > { %v2528_v34 = vadd.f32 %v2527_v25, %v2484_v30 }
 0xe39   : > { %v2550_v13 = vpop.f32.mrf.mxu1 }
 0xe3a   : > { %v2582_v36 = vperm.slane %v2528_v34, 0  ;;  %v2575_v37 = vrot.slane %v2528_v34, 1  ;;  %v2576_v32 = vrot.slane %v2528_v34, 2  ;;  %v2577_v58 = vrot.slane %v2528_v34, 3 }
 0xe3b   : > { %v2578_v10 = vrot.slane %v2528_v34, 4  ;;  %v2579_v60 = vrot.slane %v2528_v34, 5  ;;  %v2580_v17 = vrot.slane %v2528_v34, 6  ;;  %v2581_v14 = vrot.slane %v2528_v34, 7 }
 0xe3c   : > { %v2598_v38 = vadd.f32 %v2582_v36, %v5356_v35  ;;  %v2583_v23 = vperm.slane %v2575_v37, 0  ;;  %v2584_v56 = vperm.slane %v2576_v32, 0  ;;  %v2585_v8 = vperm.slane %v2577_v58, 0 }
 0xe3d   : > { %v2586_v53 = vperm.slane %v2578_v10, 0  ;;  %v2587_v63 = vperm.slane %v2579_v60, 0  ;;  %v2588_v43 = vperm.slane %v2580_v17, 0  ;;  %v2589_v46 = vperm.slane %v2581_v14, 0 }
 0xe3e   : > { %v2606_v39 = vadd.f32 %v2598_v38, %v2550_v13  ;;  %v2599_v55 = vadd.f32 %v2583_v23, %v5356_v35  ;;  %v2600_v62 = vadd.f32 %v2584_v56, %v5356_v35  ;;  %v2601_v9 = vadd.f32 %v2585_v8, %v5356_v35 }
 0xe3f   : > { %v2602_v57 = vadd.f32 %v2586_v53, %v5356_v35  ;;  %v2603_v61 = vadd.f32 %v2587_v63, %v5356_v35  ;;  %v2604_v20 = vadd.f32 %v2588_v43, %v5356_v35  ;;  %v2605_v4 = vadd.f32 %v2589_v46, %v5356_v35 }
 0xe40   : > { %vm2614_vm1 = vcmp.gt.f32.partialorder %v2606_v39, 0.0  ;;  %v2622_v40 = vmul.f32 0.2, %v2606_v39 }
 0xe41   : > { %v2553_v42 = vpop.f32.mrf.mxu1 }
 0xe42   : > { %v2607_v5 = vadd.f32 %v2599_v55, %v2553_v42  ;;  %v2630_v41 = vsel %vm2614_vm1, %v2606_v39, %v2622_v40 }
 0xe43   : > { %2654 = vmatmul.f32.vlgmr.msrb.gmra.mxu3 %v2630_v41 }
 0xe44   : > { %v2623_v59 = vmul.f32 0.2, %v2607_v5  ;;  %vm2615_vm3 = vcmp.gt.f32.partialorder %v2607_v5, 0.0 }
 0xe46   : > { %v2631_v48 = vsel %vm2615_vm3, %v2607_v5, %v2623_v59 }
 0xe49   : > { %v2556_v6 = vpop.f32.mrf.mxu1 }
 0xe4a   : > { %v2608_v7 = vadd.f32 %v2600_v62, %v2556_v6 }
 0xe4b   : > { %2657 = vmatmul.f32.gmra.mxu3 %v2631_v48 }
 0xe4c   : > { %v2624_v49 = vmul.f32 0.2, %v2608_v7  ;;  %vm2616_vm14 = vcmp.gt.f32.partialorder %v2608_v7, 0.0 }
 0xe4e   : > { %v2632_v51 = vsel %vm2616_vm14, %v2608_v7, %v2624_v49 }
 0xe51   : > { %v2559_v11 = vpop.f32.mrf.mxu1 }
 0xe52   : > { %v2609_v50 = vadd.f32 %v2601_v9, %v2559_v11 }
 0xe53   : > { %2660 = vmatmul.f32.gmra.mxu3 %v2632_v51 }
 0xe54   : > { %v2625_v54 = vmul.f32 0.2, %v2609_v50  ;;  %vm2617_vm15 = vcmp.gt.f32.partialorder %v2609_v50, 0.0 }
 0xe56   : > { %v2633_v12 = vsel %vm2617_vm15, %v2609_v50, %v2625_v54 }
 0xe59   : > { %v2562_v52 = vpop.f32.mrf.mxu1 }
 0xe5a   : > { %v2610_v2 = vadd.f32 %v2602_v57, %v2562_v52 }
 0xe5b   : > { %2663 = vmatmul.f32.gmra.mxu3 %v2633_v12 }
 0xe5c   : > { %v2626_v1 = vmul.f32 0.2, %v2610_v2  ;;  %vm2618_vm0 = vcmp.gt.f32.partialorder %v2610_v2, 0.0 }
 0xe5e   : > { %v2634_v19 = vsel %vm2618_vm0, %v2610_v2, %v2626_v1 }
 0xe61   : > { %v2565_v3 = vpop.f32.mrf.mxu1 }
 0xe62   : > { %v2611_v22 = vadd.f32 %v2603_v61, %v2565_v3 }
 0xe63   : > { %2666 = vmatmul.f32.gmra.mxu3 %v2634_v19 }
 0xe64   : > { %v2627_v0 = vmul.f32 0.2, %v2611_v22  ;;  %vm2619_vm4 = vcmp.gt.f32.partialorder %v2611_v22, 0.0 }
 0xe66   : > { %v2635_v24 = vsel %vm2619_vm4, %v2611_v22, %v2627_v0 }
 0xe69   : > { %v2568_v45 = vpop.f32.mrf.mxu1 }
 0xe6a   : > { %v2612_v44 = vadd.f32 %v2604_v20, %v2568_v45 }
 0xe6b   : > { %2669 = vmatmul.f32.gmra.mxu3 %v2635_v24 }
 0xe6c   : > { %v2628_v47 = vmul.f32 0.2, %v2612_v44  ;;  %vm2620_vm5 = vcmp.gt.f32.partialorder %v2612_v44, 0.0 }
 0xe6e   : > { %v2636_v29 = vsel %vm2620_vm5, %v2612_v44, %v2628_v47 }
 0xe71   : > { %v2571_v26 = vpop.f32.mrf.mxu1 }
 0xe72   : > { %v2613_v27 = vadd.f32 %v2605_v4, %v2571_v26 }
 0xe73   : > { %2672 = vmatmul.f32.gmra.mxu3 %v2636_v29 }
 0xe74   : > { %v2629_v18 = vmul.f32 0.2, %v2613_v27  ;;  %vm2621_vm6 = vcmp.gt.f32.partialorder %v2613_v27, 0.0 }
 0xe76   : > { %v2637_v15 = vsel %vm2621_vm6, %v2613_v27, %v2629_v18 }
 0xe7b   : > { %2675 = vmatmul.f32.gmra.mxu3 %v2637_v15 }
 0xec6   : > { %v2655_v30 = vpop.f32.mrf.mxu3 }
 0xec7   : > { %2679 = vxpose.xlu0.b32.start [1/8] (short) (narrow) %v2655_v30, 8 }
 0xece   : > { %v2658_v31 = vpop.f32.mrf.mxu3 }
 0xecf   : > { %2680 = vxpose.xlu0.b32.cont [2/8] (short) (narrow) %v2658_v31, 8 }
 0xed6   : > { %v2661_v25 = vpop.f32.mrf.mxu3 }
 0xed7   : > { %2681 = vxpose.xlu0.b32.cont [3/8] (short) (narrow) %v2661_v25, 8 }
 0xede   : > { %v2664_v34 = vpop.f32.mrf.mxu3 }
 0xedf   : > { %2682 = vxpose.xlu0.b32.cont [4/8] (short) (narrow) %v2664_v34, 8 }
 0xee6   : > { %v2667_v13 = vpop.f32.mrf.mxu3 }
 0xee7   : > { %2683 = vxpose.xlu0.b32.cont [5/8] (short) (narrow) %v2667_v13, 8 }
 0xeee   : > { %v2670_v36 = vpop.f32.mrf.mxu3 }
 0xeef   : > { %2684 = vxpose.xlu0.b32.cont [6/8] (short) (narrow) %v2670_v36, 8 }
 0xef6   : > { %v2673_v37 = vpop.f32.mrf.mxu3 }
 0xef7   : > { %2685 = vxpose.xlu0.b32.cont [7/8] (short) (narrow) %v2673_v37, 8 }
 0xefe   : > { %v2676_v38 = vpop.f32.mrf.mxu3 }
 0xeff   : > { %2686 = vxpose.xlu0.b32.end [8/8] (short) (narrow) %v2676_v38, 8 }
 0xf6b   : > { %v2695_v23 = vpop.trf.xlu0 }
 0xf6c   : > { %2718 = vrot.lane.b32.xlu2 %v2695_v23, %s5695_s23  ;;  %2730 = vrot.lane.b32.xlu1 %v2695_v23, %s5698_s21 }
 0xf74   : > { %2715 = vrot.lane.b32.xlu2 %v2695_v23, %s5697_s0  ;;  %2724 = vrot.lane.b32.xlu1 %v2695_v23, %s5699_s30  ;;  %s4343_s30 = scalar_lea.hbm %s5643_s17, 32 }
 0xf7c   : > { %2727 = vrot.lane.b32.xlu1 %v2695_v23, %s5701_s6  ;;  %s4401_s6 = smov 8  }
 0xf84   : > { %2712 = vrot.lane.b32.xlu1 %v2695_v23, %s5696_s5 }
 0xf8c   : > { %2721 = vrot.lane.b32.xlu1 %v2695_v23, %s5692_s2 }
 0xfc6   : > { %v2719_v40 = vpop.permute.xlu2 %2718 }
 0xfc7   : > { %v2739_v41 = vrot.slane %v2719_v40, 4 }
 0xfce   : > { %v2716_v32 = vpop.permute.xlu2 %2715 }
 0xfcf   : > { %v2733_v5 = vrot.slane %v2716_v32, 4 }
 0xfd1   : > { %v2734_v56 = vsel %vm1505_vm2, %v2733_v5, %v2695_v23  ;;  %v2849_v5 = vrot.slane %v5356_v35, 4 }
 0xfd2   : > { %v2738_v6 = vperm.slane %v2734_v56, %v4898_v21 }
 0xfd4   : > { %v2759_v49 = vrot.slane %v2738_v6, 4 }
 0xfde   : > { %v2731_v39 = vpop.permute.xlu1 %2730 }
 0xfdf   : > { %v2751_v62 = vrot.slane %v2731_v39, 4 }
 0xfe6   : > { %v2725_v55 = vpop.permute.xlu1 %2724 }
 0xfe7   : > { %v2752_v48 = vsel %vm1505_vm2, %v2751_v62, %v2725_v55 }
 0xfe8   : > { %v2756_v9 = vperm.slane %v2752_v48, %v4898_v21 }
 0xfea   : > { %v2769_v57 = vrot.slane %v2756_v9, 4 }
 0xfee   : > { %v2728_v42 = vpop.permute.xlu1 %2727 }
 0xfef   : > { %v2745_v11 = vrot.slane %v2728_v42, 4 }
 0xff6   : > { %v2713_v59 = vpop.permute.xlu1 %2712 }
 0xff7   : > { %v2740_v58 = vsel %vm1505_vm2, %v2739_v41, %v2713_v59 }
 0xff8   : > { %v2744_v7 = vperm.slane %v2740_v58, %v4898_v21 }
 0xffa   : > { %v2757_v8 = vrot.slane %v2744_v7, 4  ;;  %v2760_v50 = vsel %vm1505_vm2, %v2744_v7, %v2759_v49 }
 0xffb   : > { %v2768_v52 = vperm.slane %v2760_v50, %v4906_v33 }
 0xffc   : > { %v2758_v10 = vsel %vm1505_vm2, %v2757_v8, %v2738_v6 }
 0xffd   : > { %v2764_v54 = vperm.slane %v2758_v10, %v4906_v33  ;;  %v2787_v22 = vrot.slane %v2768_v52, 4 }
 0xffe   : > { %v2722_v51 = vpop.permute.xlu1 %2721 }
 0xfff   : > { %v2746_v53 = vsel %vm1505_vm2, %v2745_v11, %v2722_v51  ;;  %v2783_v1 = vrot.slane %v2764_v54, 4 }
0x1000   : > { %v2750_v60 = vperm.slane %v2746_v53, %v4898_v21 }
0x1002   : > { %v2770_v2 = vsel %vm1505_vm2, %v2769_v57, %v2750_v60  ;;  %v2771_v12 = vrot.slane %v2750_v60, 4 }
0x1003   : > { %v2776_v63 = vperm.slane %v2770_v2, %v4906_v33 }
0x1004   : > { %v2772_v61 = vsel %vm1505_vm2, %v2756_v9, %v2771_v12 }
0x1005   : > { %v2784_v17 = vsel %vm1505_vm2, %v2776_v63, %v2783_v1  ;;  %v2780_v3 = vperm.slane %v2772_v61, %v4906_v33  ;;  %v2781_v19 = vrot.slane %v2776_v63, 4 }
0x1006   : > { %v2790_v43 = vadd.f32 %v2784_v17, %v4662_v28 }
0x1007   : > { %v2788_v0 = vsel %vm1505_vm2, %v2780_v3, %v2787_v22  ;;  %v2782_v20 = vsel %vm1505_vm2, %v2781_v19, %v2764_v54  ;;  %v2785_v14 = vrot.slane %v2780_v3, 4 }
0x1008   : > { %v2796_v45 = vsel %vm1014_vm7, %v2790_v43, -inf  ;;  %v2792_v44 = vadd.f32 %v2788_v0, %v4662_v28  ;;  %v2789_v24 = vadd.f32 %v2782_v20, %v4662_v28 }
0x1009   : > { %2797 = vmax.xlane.f32.xlu1 %v2796_v45  ;;  %v2786_v4 = vsel %vm1505_vm2, %v2785_v14, %v2768_v52 }
0x100a   : > { %v2802_v46 = vsel %vm1014_vm7, %v2792_v44, -inf  ;;  %v2793_v47 = vsel %vm1014_vm7, %v2789_v24, -inf  ;;  %v2791_v26 = vadd.f32 %v2786_v4, %v4662_v28 }
0x100b   : > { %2803 = vmax.xlane.f32.xlu0 %v2802_v46  ;;  %2794 = vmax.xlane.f32.xlu2 %v2793_v47 }
0x100c   : > { %v2799_v27 = vsel %vm1014_vm7, %v2791_v26, -inf }
0x1013   : > { %2800 = vmax.xlane.f32.xlu2 %v2799_v27 }
0x1022   : > { %2838 = vrot.lane.b32.xlu1 %v5356_v35, %s5692_s2 }
0x102b   : > { %2841 = vrot.lane.b32.xlu2 %v5356_v35, %s5700_s4 }
0x1033   : > { %2844 = vrot.lane.b32.xlu2 %v5356_v35, %s5694_s18  ;;  %s4402_s18 = smov 16  }
0x107c   : > { %v2798_v29 = vpop.xlane.xlu1 %2797 }
0x107d   : > { %v2806_v18 = vsub.f32 %v2790_v43, %v2798_v29 }
0x107e   : > { %v2804_v15 = vpop.xlane.xlu0 %2803  ;;  %v2795_v30 = vpop.xlane.xlu2 %2794 }
0x107f   : > { %v2811_v31 = vmul.f32 1.442695, %v2806_v18  ;;  %v2808_v25 = vsub.f32 %v2792_v44, %v2804_v15  ;;  %v2805_v34 = vsub.f32 %v2789_v24, %v2795_v30 }
0x1081   : > { %4283 = vpow2.f32 %v2811_v31  ;;  %v2809_v28 = vmul.f32 1.442695, %v2805_v34  ;;  %v2815_v13 = vmul.f32 1.442695, %v2808_v25 }
0x1083   : > { %4285 = vpow2.f32 %v2809_v28 }
0x1084   : > { %4287 = vpow2.f32 %v2815_v13 }
0x1086   : > { %v2801_v36 = vpop.xlane.xlu2 %2800 }
0x1087   : > { %v5407_v37 = vpop.eup %4283  ;;  %v2807_v38 = vsub.f32 %v2791_v26, %v2801_v36 }
0x1088   : > { %v2820_v23 = vsel %vm1014_vm7, %v5407_v37, 0.0 }
0x1089   : > { %v2813_v39 = vmul.f32 1.442695, %v2807_v38  ;;  %2821 = vadd.xlane.f32.xlu2 %v2820_v23  ;;  %v5411_v40 = vpop.eup %4285 }
0x108a   : > { %v2817_v55 = vsel %vm1014_vm7, %v5411_v40, 0.0  ;;  %v5415_v32 = vpop.eup %4287 }
0x108b   : > { %4289 = vpow2.f32 %v2813_v39  ;;  %2818 = vadd.xlane.f32.xlu1 %v2817_v55  ;;  %v2826_v56 = vsel %vm1014_vm7, %v5415_v32, 0.0 }
0x108e   : > { %v2842_v42 = vpop.permute.xlu2 %2841 }
0x108f   : > { %v2847_v41 = vrot.slane %v2842_v42, 4  ;;  %v2850_v62 = vsel %vm1505_vm2, %v2842_v42, %v2849_v5 }
0x1090   : > { %v2858_v7 = vperm.slane %v2850_v62, %v4898_v21 }
0x1091   : > { %v5420_v59 = vpop.eup %4289  ;;  %2827 = vadd.xlane.f32.xlu2 %v2826_v56  ;;  %v2848_v6 = vsel %vm1505_vm2, %v2847_v41, %v5356_v35 }
0x1092   : > { %v2823_v58 = vsel %vm1014_vm7, %v5420_v59, 0.0  ;;  %v2854_v49 = vperm.slane %v2848_v6, %v4898_v21  ;;  %v2885_v50 = vrot.slane %v2858_v7, 4 }
0x1093   : > { %2824 = vadd.xlane.f32.xlu1 %v2823_v58 }
0x1094   : > { %v2839_v48 = vpop.permute.xlu1 %2838  ;;  %v2873_v54 = vrot.slane %v2854_v49, 4 }
0x1095   : > { %v2861_v8 = vrot.slane %v2839_v48, 4 }
0x1096   : > { %v2845_v9 = vpop.permute.xlu2 %2844 }
0x1097   : > { %v2859_v10 = vrot.slane %v2845_v9, 4  ;;  %v2862_v11 = vsel %vm1505_vm2, %v2845_v9, %v2861_v8 }
0x1098   : > { %v2870_v51 = vperm.slane %v2862_v11, %v4898_v21 }
0x1099   : > { %v2860_v53 = vsel %vm1505_vm2, %v2859_v10, %v2839_v48 }
0x109a   : > { %v2866_v57 = vperm.slane %v2860_v53, %v4898_v21  ;;  %v2883_v35 = vrot.slane %v2870_v51, 4  ;;  %v2886_v60 = vsel %vm1505_vm2, %v2870_v51, %v2885_v50 }
0x109b   : > { %v2894_v52 = vperm.slane %v2886_v60, %v4906_v33 }
0x109c   : > { %v2871_v2 = vrot.slane %v2866_v57, 4  ;;  %v2874_v12 = vsel %vm1505_vm2, %v2866_v57, %v2873_v54  ;;  %v2884_v63 = vsel %vm1505_vm2, %v2883_v35, %v2858_v7 }
0x109d   : > { %v2882_v1 = vperm.slane %v2874_v12, %v4906_v33  ;;  %v2890_v61 = vperm.slane %v2884_v63, %v4906_v33  ;;  %v2901_v17 = vrot.slane %v2894_v52, 4 }
0x109e   : > { %v2872_v3 = vsel %vm1505_vm2, %v2871_v2, %v2854_v49 }
0x109f   : > { %v2878_v22 = vperm.slane %v2872_v3, %v4906_v33  ;;  %v2897_v19 = vrot.slane %v2882_v1, 4  ;;  %v2899_v43 = vrot.slane %v2890_v61, 4  ;;  %v2902_v0 = vsel %vm1505_vm2, 0.0, %v2901_v17 }
0x10a0   : > { %v2914_v20 = vsel %vm1505_vm2, %v2901_v17, %v2890_v61  ;;  %v2919_v14 = vrot.slane %v2902_v0, 4 }
0x10a1   : > { %v2895_v45 = vrot.slane %v2878_v22, 4  ;;  %v2898_v44 = vsel %vm1505_vm2, 0.0, %v2897_v19  ;;  %v2900_v24 = vsel %vm1505_vm2, 0.0, %v2899_v43  ;;  %v2918_v46 = vperm.slane %v2914_v20, %v4898_v21  ;;  %v4230_v20 = vld [vmem:[%s5638_s12 + $0x2] ss:$0 sm:$0xff] }
0x10a2   : > { %v2908_v47 = vrot.slane %v2898_v44, 4  ;;  %v2920_v4 = vsel %vm1505_vm2, %v2919_v14, %v2900_v24  ;;  %v2903_v26 = vsel %vm1505_vm2, %v2897_v19, %v2878_v22 }
0x10a3   : > { %v2924_v27 = vperm.slane %v2920_v4, %v4898_v21  ;;  %v2896_v29 = vsel %vm1505_vm2, 0.0, %v2895_v45  ;;  %v2907_v18 = vperm.slane %v2903_v26, %v4898_v21  ;;  %v2939_v15 = vrot.slane %v2918_v46, 4 }
0x10a4   : > { %v2909_v30 = vsel %vm1505_vm2, %v2908_v47, %v2896_v29 }
0x10a5   : > { %v2913_v31 = vperm.slane %v2909_v30, %v4898_v21  ;;  %v2937_v25 = vrot.slane %v2924_v27, 4  ;;  %v2927_v34 = vrot.slane %v2907_v18, 4  ;;  %v2940_v28 = vsel %vm1505_vm2, %v2924_v27, %v2939_v15 }
0x10a6   : > { %v2948_v13 = vperm.slane %v2940_v28, %v4906_v33 }
0x10a7   : > { %v2925_v36 = vrot.slane %v2913_v31, 4  ;;  %v2938_v38 = vsel %vm1505_vm2, %v2937_v25, %v2918_v46  ;;  %v2928_v23 = vsel %vm1505_vm2, %v2913_v31, %v2927_v34  ;;  %v4231_v46 = vld [vmem:[%s5640_s14] ss:$0 sm:$0xff] }
0x10a8   : > { %v2944_v39 = vperm.slane %v2938_v38, %v4906_v33  ;;  %v2936_v55 = vperm.slane %v2928_v23, %v4906_v33  ;;  %v2953_v42 = vrot.slane %v2948_v13, 4 }
0x10a9   : > { %v2926_v5 = vsel %vm1505_vm2, %v2925_v36, %v2907_v18 }
0x10aa   : > { %v2932_v41 = vperm.slane %v2926_v5, %v4906_v33  ;;  %v2949_v56 = vrot.slane %v2944_v39, 4  ;;  %v2955_v62 = vrot.slane %v2936_v55, 4  ;;  %v2954_v58 = vsel %vm1505_vm2, %v2953_v42, %v2936_v55 }
0x10ac   : > { %v2950_v6 = vsel %vm1505_vm2, %v2949_v56, %v2932_v41  ;;  %v2956_v7 = vsel %vm1505_vm2, %v2948_v13, %v2955_v62  ;;  %v2951_v48 = vrot.slane %v2932_v41, 4 }
0x10ad   : > { %2975 = vmatpush.msra.mxu2 %v2950_v6  ;;  %3044 = vmatpush.msra.mxu0 %v2956_v7 }
0x10ae   : > { %v2952_v8 = vsel %vm1505_vm2, %v2944_v39, %v2951_v48 }
0x10af   : > { %2998 = vmatpush.msrb.mxu2 %v2952_v8 }
0x10fc   : > { %v2822_v49 = vpop.xlane.xlu2 %2821 }
0x10fe   : > { %v2819_v9 = vpop.xlane.xlu1 %2818 }
0x10ff   : > { %4291 = vrcp.f32 %v2819_v9 }
0x1104   : > { %v2828_v10 = vpop.xlane.xlu2 %2827 }
0x1105   : > { %4293 = vrcp.f32 %v2828_v10  ;;  %v4292_v11 = vpop.eup %4291 }
0x1106   : > { %4295 = vrcp.f32 %v2822_v49  ;;  %v2833_v50 = vmul.f32 %v4292_v11, %v5411_v40  ;;  %v2825_v53 = vpop.xlane.xlu1 %2824  ;;  %v3066_v40 = vld [vmem:[%s5639_s13 + $0x18] sm:$0xff] }
0x1107   : > { %4297 = vrcp.f32 %v2825_v53 }
0x1108   : > { %4129 = vmatmul.msk.f32.vlgmr.msra.gmra.mxu2 %vm1014_vm7, %v2833_v50 }
0x1109   : > { %3021 = vmatpush.msra.mxu2 %v2954_v58 }
0x110b   : > { %v4294_v51 = vpop.eup %4293 }
0x110c   : > { %v4296_v54 = vpop.eup %4295  ;;  %v2836_v57 = vmul.f32 %v4294_v51, %v5415_v32  ;;  %v3065_v32 = vld [vmem:[%s5639_s13 + $0x10] sm:$0xff] }
0x110d   : > { %v2834_v35 = vmul.f32 %v4296_v54, %v5407_v37  ;;  %v4298_v60 = vpop.eup %4297  ;;  %v3064_v37 = vld [vmem:[%s5639_s13 + $0x8] sm:$0xff] }
0x110e   : > { %4132 = vmatmul.msk.f32.vlgmr.msra.gmra.mxu0 %vm1014_vm7, %v2836_v57  ;;  %v2835_v52 = vmul.f32 %v4298_v60, %v5420_v59  ;;  %v3063_v59 = vld [vmem:[%s5639_s13] sm:$0xff] }
0x1110   : > { %4130 = vmatmul.msk.f32.vlgmr.msrb.gmra.mxu2 %vm1014_vm7, %v2834_v35 }
0x1111   : > { %3091 = vmatpush.msrb.mxu2 %v3066_v40 }
0x1113   : > { %3092 = vmatpush.msrb.mxu2 %v3065_v32 }
0x1115   : > { %3093 = vmatpush.msrb.mxu2 %v3064_v37 }
0x1117   : > { %3094 = vmatpush.msrb.mxu2 %v3063_v59 }
0x1118   : > { %4131 = vmatmul.msk.f32.vlgmr.msra.gmra.mxu2 %vm1014_vm7, %v2835_v52 }
0x118b   : > { %v2977_v2 = vpop.f32.mrf.mxu2  ;;  %v3046_v61 = vpop.f32.mrf.mxu0 }
0x118c   : > { %v3049_v1 = vsel %vm826_vm12, %v2977_v2, 0.0  ;;  %v3054_v43 = vsel %vm826_vm12, %v3046_v61, 0.0 }
0x1193   : > { %v3000_v12 = vpop.f32.mrf.mxu2 }
0x1194   : > { %v3050_v63 = vsel %vm826_vm12, %v3000_v12, 0.0 }
0x1195   : > { %v3051_v17 = vadd.f32 %v3050_v63, %v3049_v1 }
0x119b   : > { %v3023_v3 = vpop.f32.mrf.mxu2 }
0x119c   : > { %v3052_v22 = vsel %vm826_vm12, %v3023_v3, 0.0 }
0x119d   : > { %v3053_v19 = vadd.f32 %v3052_v22, %v3051_v17 }
0x119f   : > { %v3055_v0 = vadd.f32 %v3054_v43, %v3053_v19 }
0x11a1   : > { %v3056_v14 = vmul.f32 0.25, %v3055_v0 }
0x11a3   : > { %v3060_v45 = vadd.f32 %v4230_v20, %v3056_v14 }
0x11a5   : > { %v3061_v44 = vadd.f32 %v3060_v45, %v5284_v16 }
0x11a7   : > { %v5493_v24 = vmul.f32 0.5, %v3061_v44 }
0x11a9   : > { %4133 = vmatmul.msk.f32.vlgmr.msrb.gmra.mxu2 %vm826_vm12, %v5493_v24 }
0x122c   : > { %v3096_v47 = vpop.f32.mrf.mxu2 }
0x122d   : > { %v3097_v4 = vadd.f32 %v4231_v46, %v3096_v47 }
0x122f   : > { %3100 = vrot.lane.b32.xlu2 %v3097_v4, %s5696_s5  ;;  %3102 = vrot.lane.b32.xlu1 %v3097_v4, %s5697_s0 }
0x1237   : > { %3104 = vrot.lane.b32.xlu1 %v3097_v4, %s5695_s23  ;;  %s567_s23 = scalar_lea.vmem [#allocation2], %s4009_s24 }
0x1238   : > { %s3919_s5 = sshll.u32 %s567_s23, 4  ;;  %s3920_s5 = int_to_ptr.vmem [resolvable:$true] %s3919_s5 }
0x1289   : > { %v3101_v26 = vpop.permute.xlu2 %3100 }
0x128a   : > { %3108 = vrot.lane.b32.xlu1 %v3101_v26, %s5692_s2 }
0x12a1   : > { %v5504_v16 = vpop.permute.xlu1 %3102 }
0x12a2   : > { %v4214_v27 = vpack.i.bf16 %v5504_v16, %v3097_v4 }
0x12a4   : > { %4215 = vrot.lane.b32.xlu2 %v4214_v27, %s5692_s2 }
0x12a9   : > { %v3105_v29 = vpop.permute.xlu1 %3104 }
0x12aa   : > { %3112 = vrot.lane.b32.xlu0 %v3105_v29, %s5692_s2  ;;  %s3917_s2 = scalar_lea.hbm %s5643_s17, %s4148_s27 }
0x12ab   : > { %s3921_s0 = sshll.u32 %s3917_s2, 4  ;;  %s3922_s0 = int_to_ptr.hbm [resolvable:$true] %s3921_s0 }
0x12fc   : > { %v3109_v18 = vpop.permute.xlu1 %3108 }
0x12fd   : > { %3150 = vxpose.xlu1.b32.start.end [1/1] (short) (narrow) %v3109_v18, 8  ;;  %v3071_v18 = vld [vmem:[%s5641_s15 + $0x18] sm:$0xff] }
0x12fe   : > { %v4216_v15 = vpop.permute.xlu2 %4215 }
0x12ff   : > { %4220 = vxpose.xlu2.b32.start.end [1/1] (short) (narrow) %v4216_v15, 8  ;;  %v3070_v15 = vld [vmem:[%s5641_s15 + $0x10] sm:$0xff] }
0x131c   : > { %v3113_v30 = vpop.permute.xlu0 %3112 }
0x131d   : > { %3214 = vxpose.xlu0.b32.start.end [1/1] (short) (narrow) %v3113_v30, 8 }
0x1398   : > { %v4221_v31 = vpop.trf.xlu2 }
0x1399   : > { %v4225_v25 = vunpack.i.h.bf16 %v4221_v31  ;;  %v4222_v34 = vunpack.i.l.bf16 %v4221_v31 }
0x139b   : > { %3263 = vmatpush.msra.mxu1 %v4222_v34  ;;  %3307 = vmatpush.msra.mxu2 %v4225_v25 }
0x139c   : > { %4134 = vmatmul.msk.f32.vlgmr.msra.gmra.mxu1 %vm1014_vm7, %v3097_v4  ;;  %4136 = vmatmul.msk.f32.vlgmr.msra.gmra.mxu2 %vm1014_vm7, %v5504_v16 }
0x13a1   : > { %v3166_v28 = vpop.trf.xlu1 }
0x13a2   : > { %3285 = vmatpush.msrb.mxu0 %v3166_v28 }
0x13a3   : > { %4135 = vmatmul.msk.f32.vlgmr.msrb.gmra.mxu0 %vm1014_vm7, %v3101_v26 }
0x13c1   : > { %v3230_v13 = vpop.trf.xlu0 }
0x13c2   : > { %3329 = vmatpush.msrb.mxu1 %v3230_v13 }
0x13c3   : > { %4137 = vmatmul.msk.f32.vlgmr.msrb.gmra.mxu1 %vm1014_vm7, %v3105_v29 }
0x1419   : > { %v3265_v36 = vpop.f32.mrf.mxu1 }
0x141a   : > { %v3334_v38 = vsel %vm1014_vm7, %v3265_v36, -inf }
0x141b   : > { %3335 = vmax.xlane.f32.xlu2 %v3334_v38 }
0x141f   : > { %v3309_v55 = vpop.f32.mrf.mxu2 }
0x1420   : > { %v3287_v23 = vpop.f32.mrf.mxu0  ;;  %v3340_v42 = vsel %vm1014_vm7, %v3309_v55, -inf }
0x1421   : > { %v3337_v39 = vsel %vm1014_vm7, %v3287_v23, -inf  ;;  %3341 = vmax.xlane.f32.xlu1 %v3340_v42 }
0x1422   : > { %3338 = vmax.xlane.f32.xlu0 %v3337_v39 }
0x1436   : > { %3380 = vrot.lane.b32.xlu0 %v3101_v26, %s5700_s4 }
0x143a   : > { %3378 = vrot.lane.b32.xlu1 %v3097_v4, %s5700_s4 }
0x143e   : > { %3384 = vrot.lane.b32.xlu0 %v3105_v29, %s5700_s4 }
0x1440   : > { %v3331_v5 = vpop.f32.mrf.mxu1 }
0x1441   : > { %v3343_v41 = vsel %vm1014_vm7, %v3331_v5, -inf }
0x1442   : > { %3344 = vmax.xlane.f32.xlu2 %v3343_v41 }
0x148e   : > { %v3336_v56 = vpop.xlane.xlu2 %3335 }
0x148f   : > { %v3346_v62 = vsub.f32 %v3265_v36, %v3336_v56 }
0x1491   : > { %v3350_v58 = vmul.f32 1.442695, %v3346_v62 }
0x1493   : > { %4299 = vpow2.f32 %v3350_v58 }
0x1494   : > { %v3342_v35 = vpop.xlane.xlu1 %3341 }
0x1495   : > { %v3339_v6 = vpop.xlane.xlu0 %3338  ;;  %v3348_v17 = vsub.f32 %v3309_v55, %v3342_v35 }
0x1496   : > { %v3347_v7 = vsub.f32 %v3287_v23, %v3339_v6 }
0x1497   : > { %v3354_v3 = vmul.f32 1.442695, %v3348_v17 }
0x1498   : > { %v3352_v48 = vmul.f32 1.442695, %v3347_v7 }
0x1499   : > { %v4300_v8 = vpop.eup %4299 }
0x149a   : > { %4301 = vpow2.f32 %v3352_v48  ;;  %v3358_v49 = vsel %vm1014_vm7, %v4300_v8, 0.0 }
0x149b   : > { %3359 = vadd.xlane.f32.xlu2 %v3358_v49 }
0x14a0   : > { %v4302_v9 = vpop.eup %4301 }
0x14a1   : > { %v3361_v10 = vsel %vm1014_vm7, %v4302_v9, 0.0 }
0x14a2   : > { %3362 = vadd.xlane.f32.xlu1 %v3361_v10 }
0x14a8   : > { %v3381_v57 = vpop.permute.xlu0 %3380 }
0x14ac   : > { %v3379_v60 = vpop.permute.xlu1 %3378 }
0x14b0   : > { %v3385_v12 = vpop.permute.xlu0 %3384 }
0x14b5   : > { %v3345_v11 = vpop.xlane.xlu2 %3344 }
0x14b6   : > { %v3349_v50 = vsub.f32 %v3331_v5, %v3345_v11 }
0x14b8   : > { %v3356_v51 = vmul.f32 1.442695, %v3349_v50 }
0x14ba   : > { %4303 = vpow2.f32 %v3356_v51 }
0x14c0   : > { %v4304_v53 = vpop.eup %4303 }
0x14c1   : > { %v3367_v54 = vsel %vm1014_vm7, %v4304_v53, 0.0 }
0x14c2   : > { %3368 = vadd.xlane.f32.xlu0 %v3367_v54 }
0x14c4   : > { %3422 = vxpose.xlu2.b32.start.end [1/1] (short) (narrow) %v3381_v57, 8 }
0x14dc   : > { %3390 = vxpose.xlu1.b32.start.end [1/1] (short) (narrow) %v3379_v60, 8 }
0x150e   : > { %v3360_v52 = vpop.xlane.xlu2 %3359 }
0x150f   : > { %4305 = vrcp.f32 %v3360_v52 }
0x1515   : > { %v3363_v40 = vpop.xlane.xlu1 %3362  ;;  %v4306_v32 = vpop.eup %4305 }
0x1516   : > { %4307 = vrcp.f32 %v3363_v40  ;;  %v3374_v37 = vmul.f32 %v4306_v32, %v4300_v8 }
0x1518   : > { %4138 = vmatpush.xpose.msk.msra.mxu0 %vm1014_vm7, %v3374_v37 }
0x151c   : > { %v4308_v59 = vpop.eup %4307 }
0x151d   : > { %v3375_v2 = vmul.f32 %v4308_v59, %v4302_v9 }
0x151f   : > { %4140 = vmatpush.xpose.msk.msrb.mxu2 %vm1014_vm7, %v3375_v2 }
0x1523   : > { %3895 = vmatpush.msra.mxu2 %v3071_v18 }
0x1525   : > { %3896 = vmatpush.msra.mxu2 %v3070_v15 }
0x152d   : > { %3382 = vrot.lane.b32.xlu2 %v5504_v16, %s5700_s4  ;;  %s4400_s4 = smov 24  }
0x1535   : > { %v3369_v63 = vpop.xlane.xlu0 %3368 }
0x1536   : > { %4309 = vrcp.f32 %v3369_v63 }
0x1537   : > { %4311 = vpow2.f32 %v3354_v3 }
0x153c   : > { %v4310_v1 = vpop.eup %4309 }
0x153d   : > { %v3377_v61 = vmul.f32 %v4310_v1, %v4304_v53  ;;  %v4312_v22 = vpop.eup %4311 }
0x153e   : > { %v3364_v19 = vsel %vm1014_vm7, %v4312_v22, 0.0 }
0x153f   : > { %4144 = vmatpush.xpose.msk.msrb.mxu0 %vm1014_vm7, %v3377_v61 }
0x1556   : > { %3365 = vadd.xlane.f32.xlu2 %v3364_v19 }
0x155d   : > { %v3438_v43 = vpop.trf.xlu2 }
0x155e   : > { %4141 = vmatmul.msk.f32.vlgmr.msrb.gmra.mxu2 %vm1014_vm7, %v3438_v43 }
0x157f   : > { %3486 = vxpose.xlu2.b32.start.end [1/1] (short) (narrow) %v3385_v12, 8 }
0x1580   : > { %v3406_v44 = vpop.trf.xlu1 }
0x1581   : > { %4139 = vmatmul.msk.f32.vlgmr.msra.gmra.mxu0 %vm1014_vm7, %v3406_v44 }
0x1587   : > { %v3383_v0 = vpop.permute.xlu2 %3382 }
0x1588   : > { %3454 = vxpose.xlu0.b32.start.end [1/1] (short) (narrow) %v3383_v0, 8 }
0x15c9   : > { %v3366_v20 = vpop.xlane.xlu2 %3365 }
0x15ca   : > { %4313 = vrcp.f32 %v3366_v20 }
0x15d0   : > { %v4314_v14 = vpop.eup %4313 }
0x15d1   : > { %v3376_v45 = vmul.f32 %v4314_v14, %v4312_v22 }
0x15d3   : > { %4142 = vmatpush.xpose.msk.msra.mxu1 %vm1014_vm7, %v3376_v45 }
0x15e1   : > { %v3567_v27 = vpop.f32.mrf.mxu2 }
0x15fe   : > { %v3541_v4 = vpop.f32.mrf.mxu0 }
0x15ff   : > { %3622 = vxpose.xlu1.b32.start.end [1/1] (short) (narrow) %v3541_v4, 8 }
0x1618   : > { %v3502_v46 = vpop.trf.xlu2 }
0x1619   : > { %4145 = vmatmul.msk.f32.vlgmr.msrb.gmra.mxu0 %vm1014_vm7, %v3502_v46 }
0x162c   : > { %v3470_v47 = vpop.trf.xlu0 }
0x162d   : > { %4143 = vmatmul.msk.f32.vlgmr.msra.gmra.mxu1 %vm1014_vm7, %v3470_v47 }
0x1696   : > { %v3619_v26 = vpop.f32.mrf.mxu0 }
0x1697   : > { %3718 = vxpose.xlu2.b32.start.end [1/1] (short) (narrow) %v3619_v26, 8 }
0x16a3   : > { %v3638_v29 = vpop.trf.xlu1 }
0x16a4   : > { %v3752_v25 = vrot.slane %v3638_v29, 4 }
0x16aa   : > { %v3593_v16 = vpop.f32.mrf.mxu1 }
0x16ab   : > { %3686 = vxpose.xlu0.b32.start.end [1/1] (short) (narrow) %v3593_v16, 8 }
0x16b3   : > { %3654 = vxpose.xlu0.b32.start.end [1/1] (short) (narrow) %v3567_v27, 8 }
0x1730   : > { %v3734_v34 = vpop.trf.xlu2 }
0x1731   : > { %v3762_v36 = vrot.slane %v3734_v34, 4 }
0x174f   : > { %v3702_v30 = vpop.trf.xlu0 }
0x1750   : > { %v3750_v31 = vrot.slane %v3702_v30, 4  ;;  %v3753_v13 = vsel %vm1505_vm2, %v3702_v30, %v3752_v25 }
0x1751   : > { %v3761_v23 = vperm.slane %v3753_v13, %v4898_v21 }
0x1752   : > { %v3751_v28 = vsel %vm1505_vm2, %v3750_v31, %v3638_v29 }
0x1753   : > { %v3757_v38 = vperm.slane %v3751_v28, %v4898_v21  ;;  %v3788_v62 = vrot.slane %v3761_v23, 4 }
0x1755   : > { %v3776_v5 = vrot.slane %v3757_v38, 4 }
0x1757   : > { %v3670_v39 = vpop.trf.xlu0 }
0x1758   : > { %v3763_v55 = vsel %vm1505_vm2, %v3762_v36, %v3670_v39  ;;  %v3764_v42 = vrot.slane %v3670_v39, 4 }
0x1759   : > { %v3769_v41 = vperm.slane %v3763_v55, %v4898_v21  ;;  %v4232_v55 = vld [vmem:[%s5642_s16] ss:$0 sm:$0xff] }
0x175a   : > { %v3765_v56 = vsel %vm1505_vm2, %v3734_v34, %v3764_v42  ;;  %v3068_v34 = vld [vmem:[%s5641_s15] sm:$0xff] }
0x175b   : > { %v3773_v58 = vperm.slane %v3765_v56, %v4898_v21  ;;  %v3774_v6 = vrot.slane %v3769_v41, 4  ;;  %v3777_v7 = vsel %vm1505_vm2, %v3769_v41, %v3776_v5 }
0x175c   : > { %v3785_v48 = vperm.slane %v3777_v7, %v4906_v33 }
0x175d   : > { %v3775_v8 = vsel %vm1505_vm2, %v3774_v6, %v3757_v38  ;;  %v3786_v49 = vrot.slane %v3773_v58, 4  ;;  %v3789_v9 = vsel %vm1505_vm2, %v3773_v58, %v3788_v62 }
0x175e   : > { %v3781_v10 = vperm.slane %v3775_v8, %v4906_v33  ;;  %v3797_v11 = vperm.slane %v3789_v9, %v4906_v33  ;;  %v3800_v50 = vrot.slane %v3785_v48, 4 }
0x175f   : > { %v3787_v51 = vsel %vm1505_vm2, %v3786_v49, %v3761_v23 }
0x1760   : > { %v3793_v53 = vperm.slane %v3787_v51, %v4906_v33  ;;  %v3798_v54 = vrot.slane %v3781_v10, 4  ;;  %v3801_v57 = vsel %vm1505_vm2, 0.0, %v3800_v50  ;;  %v3804_v35 = vrot.slane %v3797_v11, 4 }
0x1761   : > { %v3806_v60 = vsel %vm1505_vm2, %v3800_v50, %v3781_v10  ;;  %v3811_v52 = vrot.slane %v3801_v57, 4 }
0x1762   : > { %v3799_v40 = vsel %vm1505_vm2, 0.0, %v3798_v54  ;;  %v3802_v32 = vrot.slane %v3793_v53, 4  ;;  %v3805_v37 = vsel %vm1505_vm2, 0.0, %v3804_v35  ;;  %v3810_v59 = vperm.slane %v3806_v60, %v4898_v21 }
0x1763   : > { %v3812_v2 = vsel %vm1505_vm2, %v3811_v52, %v3799_v40  ;;  %v3822_v12 = vrot.slane %v3805_v37, 4  ;;  %v3817_v63 = vsel %vm1505_vm2, %v3804_v35, %v3793_v53 }
0x1764   : > { %v3803_v1 = vsel %vm1505_vm2, 0.0, %v3802_v32  ;;  %v3816_v61 = vperm.slane %v3812_v2, %v4898_v21  ;;  %v3821_v17 = vperm.slane %v3817_v63, %v4898_v21  ;;  %v3830_v3 = vrot.slane %v3810_v59, 4 }
0x1765   : > { %v3823_v22 = vsel %vm1505_vm2, %v3822_v12, %v3803_v1 }
0x1766   : > { %v3827_v19 = vperm.slane %v3823_v22, %v4898_v21  ;;  %v3828_v43 = vrot.slane %v3816_v61, 4  ;;  %v3831_v0 = vsel %vm1505_vm2, %v3816_v61, %v3830_v3  ;;  %v3842_v20 = vrot.slane %v3821_v17, 4 }
0x1767   : > { %v3839_v14 = vperm.slane %v3831_v0, %v4906_v33 }
0x1768   : > { %v3829_v45 = vsel %vm1505_vm2, %v3828_v43, %v3810_v59  ;;  %v3840_v44 = vrot.slane %v3827_v19, 4  ;;  %v3843_v46 = vsel %vm1505_vm2, %v3827_v19, %v3842_v20 }
0x1769   : > { %v3835_v47 = vperm.slane %v3829_v45, %v4906_v33  ;;  %v3851_v4 = vperm.slane %v3843_v46, %v4906_v33  ;;  %v3858_v26 = vrot.slane %v3839_v14, 4 }
0x176a   : > { %v3841_v16 = vsel %vm1505_vm2, %v3840_v44, %v3821_v17 }
0x176b   : > { %v3847_v21 = vperm.slane %v3841_v16, %v4906_v33  ;;  %v3854_v27 = vrot.slane %v3835_v47, 4  ;;  %v3859_v29 = vsel %vm1505_vm2, %v3851_v4, %v3858_v26  ;;  %v3856_v18 = vrot.slane %v3851_v4, 4  ;;  %v3069_v33 = vld [vmem:[%s5641_s15 + $0x8] sm:$0xff] }
0x176c   : > { %3869 = vrot.lane.b32.xlu0 %v3859_v29, %s4400_s4  ;;  %3897 = vmatpush.msra.mxu2 %v3069_v33  ;;  %s4337_s4 = sshra.s32 %s3922_s0, 4  ;;  %s4338_s4 = int_to_ptr.hbm [resolvable:$true] %s4337_s4 }
0x176d   : > { %v3852_v15 = vrot.slane %v3847_v21, 4  ;;  %v3855_v30 = vsel %vm1505_vm2, %v3847_v21, %v3854_v27  ;;  %v3857_v31 = vsel %vm1505_vm2, %v3856_v18, %v3839_v14  ;;  %p4344_p0 = scmp.lt.s32.totalorder %s4338_s4, %s5643_s17 }
0x176e   : > { %3861 = vrot.lane.b32.xlu1 %v3855_v30, %s4401_s6  ;;  %3865 = vrot.lane.b32.xlu2 %v3857_v31, %s4402_s18  ;;  %s4339_s6 = scalar_lea.hbm %s4338_s4, 8 }
0x176f   : > { %v3853_v25 = vsel %vm1505_vm2, %v3852_v15, %v3835_v47  ;;  %3898 = vmatpush.msra.mxu2 %v3068_v34  ;;  %p4340_p11 = scmp.ne.s32.totalorder %s4338_s4, %s4339_s6  ;;  %p4345_p1 = scmp.lt.s32.totalorder %s4343_s30, %s4339_s6 }
0x1771   : > { %p4341_p12 = pnand %p4340_p11, %p4531_p5  ;;  %p4346_p2 = por %p4345_p1, %p4344_p0 }
0x1773   : > { %p4342_p13 = pneg %p4341_p12 }
0x1775   : > { %p4347_p3 = pnand %p4346_p2, %p4342_p13 }
0x17c8   : > { %v3866_v36 = vpop.permute.xlu2 %3865 }
0x17de   : > { %v3870_v23 = vpop.permute.xlu0 %3869 }
0x17e0   : > { %v3862_v28 = vpop.permute.xlu1 %3861 }
0x17e1   : > { %v3872_v13 = vsel %vm1014_vm7, %v3853_v25, %v3862_v28 }
0x17e2   : > { %v3874_v38 = vsel %vm3873_vm8, %v3872_v13, %v3866_v36 }
0x17e3   : > { %v3876_v39 = vsel %vm3875_vm9, %v3874_v38, %v3870_v23 }
0x17e4   : > { %4146 = vmatmul.msk.f32.vlgmr.msra.gmra.mxu2 %vm826_vm12, %v3876_v39 }
0x1867   : > { %v3900_v42 = vpop.f32.mrf.mxu2 }
0x1868   : > { %v3901_v5 = vadd.f32 %v4232_v55, %v3900_v42 }
0x186a   : > { %v3903_v41 = vadd.f32 %v3901_v5, %v5493_v24 }
0x186c   : > { %v3904_v56 = vmul.f32 0.5, %v3903_v41 }
0x186e   : > { %3905 = vst.msk [vmem:[%s567_s23] sm:$0xff] %vm826_vm12, %v3904_v56 }
0x186f   : > { %4350 = shalt.err (!%p4347_p3)
}
0x1870   : > { %4152 = dma.vmem_to_hbm [thread:$0]  (%p4531_p5), %s3920_s5, 128, %s3922_s0, %s3907_s28  }
0x1871 PF: > { %s5702_s20 = sld [smem:[#allocation7_spill]] }
0x1872   : > { %s5703_s24 = sld [smem:[#allocation5_spill]] }
0x1877   : > { %p4158_p4 = scmp.ge.s32.totalorder %s5702_s20, 2 }
0x1878   : > { %s3933_s19 = sand.u32 1, %s5703_s24  }
0x1879   : > { %p4155_p7 = pnand %p4158_p4, %p4535_p6  ;;  %s3934_s26 = scalar_lea.sflag [#allocation3], %s3933_s19 }
0x187b   : > { %p4156_p8 = pneg %p4155_p7 }
0x187d   : > { %4368 = dma.done.wait (%p4156_p8), %s3934_s26, 128  }
0x187e   : > { %4370 = vsyncadd (%p4156_p8), %s3934_s26, 4294967168  ;;  %s5705_s27 = sld [smem:[#allocation8_spill]]  ;;  %s5708_s24 = smov %s4377_s25 }
0x187f   : > { %s5706_s29 = sld [smem:[#allocation6_spill]] }
0x1880   : > { %s5707_s26 = sld [smem:[#allocation9_spill]] }
0x1884   : > { %p27_p9 = scmp.ge.s32.totalorder %s5705_s27, 6  }
0x1885   : > { %s5709_s25 = smov %s5706_s29 }
0x1886   :  { %29 = sbr.rel (!%p27_p9) target bundleno = 12 (0xc), region = 146 }
0x188b   :  { %3940 = vsyncpa [#allocation3], 1 }
0x188c   :  { %3942 = vsyncpa [#allocation3 + $0x1], 1 }

</bundles_post_ra>
